<compile_context>
chip_gen: v7x
topology: tpu7x:2x2x1
jax: 0.10.0
libtpu: 0.0.40
codegen_flags: <defaults>
</compile_context>

<pallas_src>
import jax
import jax.numpy as jnp
from jax.experimental import pallas as pl
from jax.experimental.pallas import tpu as pltpu


def _round_up(n, m):
    return ((n + m - 1) // m) * m


def _choose_tb(batch, cap=512):
    """Pick the batch tile.

    Multiple of 16 (bf16 sublane packing), capped at `cap`, an exact divisor of
    `batch` when possible (so Bp == B: no batch padding and no trailing output
    slice), and leaving >= 4 grid blocks when the batch is large enough so both
    v7x TensorCores stay busy and the z/out DMA pipelines behind compute.
    """
    if batch <= 128:
        return batch  # single full-extent block; nothing worth splitting
    target = min(cap, max(16, (batch // 4) // 16 * 16))  # aim for >= 4 blocks
    for tb in range(target, 15, -16):
        if batch % tb == 0:
            return tb
    return target


def generator_kernel(z_ref, w1_ref, b1_ref, w2_ref, b2_ref, out_ref):
    # Hidden layer: h = relu(z @ W1 + b1)  (bf16 MXU matmul, f32 accumulate).
    # z arrives unpadded in its HBM dtype; cast to bf16 in-register and let
    # Mosaic pad the K dimension internally.
    z = z_ref[...].astype(jnp.bfloat16)                       # (TB, L)
    h = jnp.dot(z, w1_ref[...], preferred_element_type=jnp.float32)
    h = jnp.maximum(h + b1_ref[...], 0.0)                     # f32 epilogue
    # Output layer: y = tanh(h @ W2 + b2)
    y = jnp.dot(h.astype(jnp.bfloat16), w2_ref[...],
                preferred_element_type=jnp.float32)
    out_ref[...] = jnp.tanh(y + b2_ref[...]).astype(out_ref.dtype)


def prepare_generator_params(w1, b1, w2, b2, *, lane=128):
    """One-time parameter prep (hoisted out of the forward pass).

    Casts weights to bf16 and zero-pads the hidden/output feature dims to a
    multiple of `lane` so both matmuls produce lane-dense tiles.  Zero padding
    is numerically free: relu(0)=0 and zero rows of W2 contribute nothing.
    For very wide layers on v6e/v7x, lane=256 fills the 256-wide MXU.
    Reuse the returned dict across forward calls.
    """
    L, H = w1.shape
    O = w2.shape[1]
    Hp = _round_up(H, lane)
    Op = _round_up(O, lane)
    w1_p = jnp.zeros((L, Hp), jnp.bfloat16).at[:, :H].set(w1.astype(jnp.bfloat16))
    b1_p = jnp.zeros((1, Hp), jnp.float32).at[:, :H].set(
        jnp.asarray(b1, jnp.float32).reshape(1, -1))
    w2_p = jnp.zeros((Hp, Op), jnp.bfloat16).at[:H, :O].set(w2.astype(jnp.bfloat16))
    b2_p = jnp.zeros((1, Op), jnp.float32).at[:, :O].set(
        jnp.asarray(b2, jnp.float32).reshape(1, -1))
    return dict(w1=w1_p, b1=b1_p, w2=w2_p, b2=b2_p, out_features=O)


def _build_generator_call(Bp, tb, L, Hp, Op, z_dtype, weight_mode):
    """Builds the pallas_call. weight_mode=None -> default (double) buffering."""
    resident = {} if weight_mode is None else dict(pipeline_mode=weight_mode)
    cost = pl.CostEstimate(
        flops=2 * Bp * (L * Hp + Hp * Op),
        transcendentals=Bp * Op,  # tanh
        bytes_accessed=(Bp * L * jnp.dtype(z_dtype).itemsize      # z read
                        + (L * Hp + Hp * Op) * 2                   # bf16 weights
                        + (Hp + Op) * 4                            # f32 biases
                        + Bp * Op * 2),                            # bf16 output
    )
    return pl.pallas_call(
        generator_kernel,
        out_shape=jax.ShapeDtypeStruct((Bp, Op), jnp.bfloat16),
        grid_spec=pl.GridSpec(
            grid=(Bp // tb,),
            in_specs=[
                # z: tiled over batch, unpadded last dim (== full array dim).
                pl.BlockSpec((tb, L), lambda i: (i, 0)),
                # Weights/biases: constant index_map -> VMEM-resident; single
                # buffer requested (they never change across grid steps).
                pl.BlockSpec((L, Hp), lambda i: (0, 0), **resident),
                pl.BlockSpec((1, Hp), lambda i: (0, 0), **resident),
                pl.BlockSpec((Hp, Op), lambda i: (0, 0), **resident),
                pl.BlockSpec((1, Op), lambda i: (0, 0), **resident),
            ],
            out_specs=pl.BlockSpec((tb, Op), lambda i: (i, 0)),
        ),
        compiler_params=pltpu.CompilerParams(
            dimension_semantics=("parallel",)),  # batch axis splits across TCs
        cost_estimate=cost,
    )


def gan_forward(z, params, *, tb=None):
    """Pallas implementation of GAN.forward(z) = generator(z).

    `params` is the output of prepare_generator_params (padded bf16 weights).
    """
    B, L = z.shape
    w1_p, b1_p, w2_p, b2_p = params["w1"], params["b1"], params["w2"], params["b2"]
    O = params["out_features"]
    assert w1_p.shape[0] == L, "latent dim of z must match W1"
    Hp = w1_p.shape[1]
    Op = w2_p.shape[1]

    if tb is None:
        tb = _choose_tb(B)
    Bp = _round_up(B, tb)
    z_p = z if Bp == B else jnp.zeros((Bp, L), z.dtype).at[:B].set(z)

    try:
        # Single-buffer the resident weights (constant blocks, no revisits).
        call = _build_generator_call(Bp, tb, L, Hp, Op, z.dtype, pl.Buffered(1))
        out = call(z_p, w1_p, b1_p, w2_p, b2_p)
    except Exception:
        # Fallback: default pipelining if single-buffering isn't supported.
        call = _build_generator_call(Bp, tb, L, Hp, Op, z.dtype, None)
        out = call(z_p, w1_p, b1_p, w2_p, b2_p)

    if Bp != B or Op != O:
        out = out[:B, :O]
    return out


def generator_ref(z, w1, b1, w2, b2):
    """Pure-JAX f32 reference (mirrors PyTorch Linear/ReLU/Linear/Tanh)."""
    h = jnp.maximum(z @ w1 + b1, 0.0)
    return jnp.tanh(h @ w2 + b2)


if __name__ == "__main__":
    # MNIST-style vanilla GAN generator: latent 100 -> hidden 256 -> 784 (28x28).
    # Batch 1024 -> tile 256, 4 grid blocks (keeps both v7x TCs busy).
    B, L, H, O = 1024, 100, 256, 784

    key = jax.random.PRNGKey(0)
    k_z, k_w1, k_b1, k_w2, k_b2 = jax.random.split(key, 5)

    z = jax.random.normal(k_z, (B, L), dtype=jnp.float32)
    # Deterministic synthetic parameter init (Kaiming-ish scale).
    w1 = jax.random.normal(k_w1, (L, H), dtype=jnp.float32) * (1.0 / jnp.sqrt(L))
    b1 = jax.random.normal(k_b1, (1, H), dtype=jnp.float32) * 0.01
    w2 = jax.random.normal(k_w2, (H, O), dtype=jnp.float32) * (1.0 / jnp.sqrt(H))
    b2 = jax.random.normal(k_b2, (1, O), dtype=jnp.float32) * 0.01

    params = prepare_generator_params(w1, b1, w2, b2)   # one-time prep, reused
    out = gan_forward(z, params)
    out = jax.block_until_ready(out)

    ref = generator_ref(z, w1, b1, w2, b2)
    assert out.shape == (B, O)
    # bf16 MXU inputs + bf16 output with f32 accumulation: not bit-parity with
    # PyTorch f32 Linear layers, but well within a few e-2 for tanh in [-1, 1].
    diff = jnp.max(jnp.abs(out.astype(jnp.float32) - ref))
    assert jnp.allclose(out.astype(jnp.float32), ref, atol=3e-2, rtol=3e-2), float(diff)

    # TODO(synk): discriminator_loss / generator_loss are training-only helpers
    # (and the discriminator module itself is injected), not part of forward();
    # they are not lowered to Pallas here.
    print("KERNEL_OK")
</pallas_src>

<mosaic_0001>
module attributes {stable_mosaic.version = 11 : i64} {
  func.func @generator_kernel(%arg0: i32, %arg1: memref<256x100xf32, #tpu.memory_space<vmem>>, %arg2: memref<100x256xbf16, #tpu.memory_space<vmem>>, %arg3: memref<1x256xf32, #tpu.memory_space<vmem>>, %arg4: memref<256x896xbf16, #tpu.memory_space<vmem>>, %arg5: memref<1x896xf32, #tpu.memory_space<vmem>>, %arg6: memref<256x896xbf16, #tpu.memory_space<vmem>>) attributes {dimension_semantics = [#tpu.dimension_semantics<parallel>], iteration_bounds = array<i64: 4>, scalar_prefetch = 0 : i64, scratch_operands = 0 : i64, tpu.core_type = #tpu.core_type<tc>, window_params = [{transform_indices = @transform_0, window_bounds = array<i64: 256, 100>}, {pipeline_mode = #tpu.pipeline_mode<synchronous>, transform_indices = @transform_1, window_bounds = array<i64: 100, 256>}, {pipeline_mode = #tpu.pipeline_mode<synchronous>, transform_indices = @transform_2, window_bounds = array<i64: 1, 256>}, {pipeline_mode = #tpu.pipeline_mode<synchronous>, transform_indices = @transform_3, window_bounds = array<i64: 256, 896>}, {pipeline_mode = #tpu.pipeline_mode<synchronous>, transform_indices = @transform_4, window_bounds = array<i64: 1, 896>}, {transform_indices = @transform_5, window_bounds = array<i64: 256, 896>}]} {
    %c0 = arith.constant 0 : index
    %c0_0 = arith.constant 0 : index
    %0 = vector.load %arg1[%c0, %c0_0] : memref<256x100xf32, #tpu.memory_space<vmem>>, vector<256x100xf32>
    %1 = arith.truncf %0 : vector<256x100xf32> to vector<256x100xbf16>
    %c0_1 = arith.constant 0 : index
    %c0_2 = arith.constant 0 : index
    %2 = vector.load %arg2[%c0_1, %c0_2] : memref<100x256xbf16, #tpu.memory_space<vmem>>, vector<100x256xbf16>
    %cst = arith.constant dense<0.000000e+00> : vector<256x256xf32>
    %3 = tpu.matmul %1, %2, %cst {dimension_numbers = #tpu.dot_dimension_numbers<[1], [0], [0], [1], [0, 0, 1, 1], [], []>} : vector<256x100xbf16>, vector<100x256xbf16>, vector<256x256xf32> -> vector<256x256xf32>
    %c0_3 = arith.constant 0 : index
    %c0_4 = arith.constant 0 : index
    %4 = vector.load %arg3[%c0_3, %c0_4] : memref<1x256xf32, #tpu.memory_space<vmem>>, vector<1x256xf32>
    %5 = vector.broadcast %4 : vector<1x256xf32> to vector<256x256xf32>
    %6 = arith.addf %3, %5 : vector<256x256xf32>
    %cst_5 = arith.constant 0.000000e+00 : f32
    %7 = vector.broadcast %cst_5 : f32 to vector<256x256xf32>
    %8 = arith.maximumf %6, %7 : vector<256x256xf32>
    %9 = arith.truncf %8 : vector<256x256xf32> to vector<256x256xbf16>
    %c0_6 = arith.constant 0 : index
    %c0_7 = arith.constant 0 : index
    %10 = vector.load %arg4[%c0_6, %c0_7] : memref<256x896xbf16, #tpu.memory_space<vmem>>, vector<256x896xbf16>
    %cst_8 = arith.constant dense<0.000000e+00> : vector<256x896xf32>
    %11 = tpu.matmul %9, %10, %cst_8 {dimension_numbers = #tpu.dot_dimension_numbers<[1], [0], [0], [1], [0, 0, 1, 1], [], []>} : vector<256x256xbf16>, vector<256x896xbf16>, vector<256x896xf32> -> vector<256x896xf32>
    %c0_9 = arith.constant 0 : index
    %c0_10 = arith.constant 0 : index
    %12 = vector.load %arg5[%c0_9, %c0_10] : memref<1x896xf32, #tpu.memory_space<vmem>>, vector<1x896xf32>
    %13 = vector.broadcast %12 : vector<1x896xf32> to vector<256x896xf32>
    %14 = arith.addf %11, %13 : vector<256x896xf32>
    %15 = math.tanh %14 : vector<256x896xf32>
    %16 = arith.truncf %15 : vector<256x896xf32> to vector<256x896xbf16>
    %c0_11 = arith.constant 0 : index
    %c0_12 = arith.constant 0 : index
    %17 = vector.load %arg6[%c0_11, %c0_12] : memref<256x896xbf16, #tpu.memory_space<vmem>>, vector<256x896xbf16>
    tpu.vector_store %arg6[%c0_11, %c0_12], %16 {strides = array<i32>} : memref<256x896xbf16, #tpu.memory_space<vmem>>, vector<256x896xbf16>,
    return
  }
  func.func @transform_0(%arg0: i32) -> (i32, i32) {
    %c0_i32 = arith.constant 0 : i32
    %c0_i32_0 = arith.constant 0 : i32
    return %arg0, %c0_i32 : i32, i32
  }
  func.func @transform_1(%arg0: i32) -> (i32, i32) {
    %c0_i32 = arith.constant 0 : i32
    %c0_i32_0 = arith.constant 0 : i32
    %c0_i32_1 = arith.constant 0 : i32
    return %c0_i32, %c0_i32_0 : i32, i32
  }
  func.func @transform_2(%arg0: i32) -> (i32, i32) {
    %c0_i32 = arith.constant 0 : i32
    %c0_i32_0 = arith.constant 0 : i32
    %c0_i32_1 = arith.constant 0 : i32
    return %c0_i32, %c0_i32_0 : i32, i32
  }
  func.func @transform_3(%arg0: i32) -> (i32, i32) {
    %c0_i32 = arith.constant 0 : i32
    %c0_i32_0 = arith.constant 0 : i32
    %c0_i32_1 = arith.constant 0 : i32
    return %c0_i32, %c0_i32_0 : i32, i32
  }
  func.func @transform_4(%arg0: i32) -> (i32, i32) {
    %c0_i32 = arith.constant 0 : i32
    %c0_i32_0 = arith.constant 0 : i32
    %c0_i32_1 = arith.constant 0 : i32
    return %c0_i32, %c0_i32_0 : i32, i32
  }
  func.func @transform_5(%arg0: i32) -> (i32, i32) {
    %c0_i32 = arith.constant 0 : i32
    %c0_i32_0 = arith.constant 0 : i32
    return %arg0, %c0_i32 : i32, i32
  }
}

module attributes {stable_mosaic.version = 11 : i64} {
  func.func @generator_kernel(%arg0: i32, %arg1: memref<256x100xf32, #tpu.memory_space<vmem>>, %arg2: memref<100x256xbf16, #tpu.memory_space<vmem>>, %arg3: memref<1x256xf32, #tpu.memory_space<vmem>>, %arg4: memref<256x896xbf16, #tpu.memory_space<vmem>>, %arg5: memref<1x896xf32, #tpu.memory_space<vmem>>, %arg6: memref<256x896xbf16, #tpu.memory_space<vmem>>) attributes {dimension_semantics = [#tpu.dimension_semantics<parallel>], iteration_bounds = array<i64: 4>, scalar_prefetch = 0 : i64, scratch_operands = 0 : i64, tpu.core_type = #tpu.core_type<tc>, window_params = [{transform_indices = @transform_0, window_bounds = array<i64: 256, 100>}, {pipeline_mode = #tpu.pipeline_mode<synchronous>, transform_indices = @transform_1, window_bounds = array<i64: 100, 256>}, {pipeline_mode = #tpu.pipeline_mode<synchronous>, transform_indices = @transform_2, window_bounds = array<i64: 1, 256>}, {pipeline_mode = #tpu.pipeline_mode<synchronous>, transform_indices = @transform_3, window_bounds = array<i64: 256, 896>}, {pipeline_mode = #tpu.pipeline_mode<synchronous>, transform_indices = @transform_4, window_bounds = array<i64: 1, 896>}, {transform_indices = @transform_5, window_bounds = array<i64: 256, 896>}]} {
    %c0 = arith.constant 0 : index
    %c0_0 = arith.constant 0 : index
    %0 = vector.load %arg1[%c0, %c0_0] : memref<256x100xf32, #tpu.memory_space<vmem>>, vector<256x100xf32>
    %1 = arith.truncf %0 : vector<256x100xf32> to vector<256x100xbf16>
    %c0_1 = arith.constant 0 : index
    %c0_2 = arith.constant 0 : index
    %2 = vector.load %arg2[%c0_1, %c0_2] : memref<100x256xbf16, #tpu.memory_space<vmem>>, vector<100x256xbf16>
    %cst = arith.constant dense<0.000000e+00> : vector<256x256xf32>
    %3 = tpu.matmul %1, %2, %cst {dimension_numbers = #tpu.dot_dimension_numbers<[1], [0], [0], [1], [0, 0, 1, 1], [], []>} : vector<256x100xbf16>, vector<100x256xbf16>, vector<256x256xf32> -> vector<256x256xf32>
    %c0_3 = arith.constant 0 : index
    %c0_4 = arith.constant 0 : index
    %4 = vector.load %arg3[%c0_3, %c0_4] : memref<1x256xf32, #tpu.memory_space<vmem>>, vector<1x256xf32>
    %5 = vector.broadcast %4 : vector<1x256xf32> to vector<256x256xf32>
    %6 = arith.addf %3, %5 : vector<256x256xf32>
    %cst_5 = arith.constant 0.000000e+00 : f32
    %7 = vector.broadcast %cst_5 : f32 to vector<256x256xf32>
    %8 = arith.maximumf %6, %7 : vector<256x256xf32>
    %9 = arith.truncf %8 : vector<256x256xf32> to vector<256x256xbf16>
    %c0_6 = arith.constant 0 : index
    %c0_7 = arith.constant 0 : index
    %10 = vector.load %arg4[%c0_6, %c0_7] : memref<256x896xbf16, #tpu.memory_space<vmem>>, vector<256x896xbf16>
    %cst_8 = arith.constant dense<0.000000e+00> : vector<256x896xf32>
    %11 = tpu.matmul %9, %10, %cst_8 {dimension_numbers = #tpu.dot_dimension_numbers<[1], [0], [0], [1], [0, 0, 1, 1], [], []>} : vector<256x256xbf16>, vector<256x896xbf16>, vector<256x896xf32> -> vector<256x896xf32>
    %c0_9 = arith.constant 0 : index
    %c0_10 = arith.constant 0 : index
    %12 = vector.load %arg5[%c0_9, %c0_10] : memref<1x896xf32, #tpu.memory_space<vmem>>, vector<1x896xf32>
    %13 = vector.broadcast %12 : vector<1x896xf32> to vector<256x896xf32>
    %14 = arith.addf %11, %13 : vector<256x896xf32>
    %15 = math.tanh %14 : vector<256x896xf32>
    %16 = arith.truncf %15 : vector<256x896xf32> to vector<256x896xbf16>
    %c0_11 = arith.constant 0 : index
    %c0_12 = arith.constant 0 : index
    %17 = vector.load %arg6[%c0_11, %c0_12] : memref<256x896xbf16, #tpu.memory_space<vmem>>, vector<256x896xbf16>
    tpu.vector_store %arg6[%c0_11, %c0_12], %16 {strides = array<i32>} : memref<256x896xbf16, #tpu.memory_space<vmem>>, vector<256x896xbf16>,
    return
  }
  func.func @transform_0(%arg0: i32) -> (i32, i32) {
    %c0_i32 = arith.constant 0 : i32
    %c0_i32_0 = arith.constant 0 : i32
    return %arg0, %c0_i32 : i32, i32
  }
  func.func @transform_1(%arg0: i32) -> (i32, i32) {
    %c0_i32 = arith.constant 0 : i32
    %c0_i32_0 = arith.constant 0 : i32
    %c0_i32_1 = arith.constant 0 : i32
    return %c0_i32, %c0_i32_0 : i32, i32
  }
  func.func @transform_2(%arg0: i32) -> (i32, i32) {
    %c0_i32 = arith.constant 0 : i32
    %c0_i32_0 = arith.constant 0 : i32
    %c0_i32_1 = arith.constant 0 : i32
    return %c0_i32, %c0_i32_0 : i32, i32
  }
  func.func @transform_3(%arg0: i32) -> (i32, i32) {
    %c0_i32 = arith.constant 0 : i32
    %c0_i32_0 = arith.constant 0 : i32
    %c0_i32_1 = arith.constant 0 : i32
    return %c0_i32, %c0_i32_0 : i32, i32
  }
  func.func @transform_4(%arg0: i32) -> (i32, i32) {
    %c0_i32 = arith.constant 0 : i32
    %c0_i32_0 = arith.constant 0 : i32
    %c0_i32_1 = arith.constant 0 : i32
    return %c0_i32, %c0_i32_0 : i32, i32
  }
  func.func @transform_5(%arg0: i32) -> (i32, i32) {
    %c0_i32 = arith.constant 0 : i32
    %c0_i32_0 = arith.constant 0 : i32
    return %arg0, %c0_i32 : i32, i32
  }
}

</mosaic_0001>

<bundles_post_ra>
// kernel: tpu_custom_call.1
= control target key start
LH: loop header
LB: loop body
LE: loop exit
PB: predicated region body
PF: predicated region fallthrough
CT: control target
= control target key end

     0   :  { %s5848_s0 = inlined_call_operand.vmem [shape: f32[1024,100], index: 0, kind: input, shape index: {}]   ;;  %s5849_s1 = inlined_call_operand.hbm [shape: bf16[100,256], index: 1, kind: input, shape index: {}]   ;;  %s5850_s2 = inlined_call_operand.hbm [shape: f32[1,256], index: 2, kind: input, shape index: {}]   ;;  %s5851_s3 = inlined_call_operand.hbm [shape: bf16[256,896], index: 3, kind: input, shape index: {}]   ;;  %s5852_s4 = inlined_call_operand.hbm [shape: f32[1,896], index: 4, kind: input, shape index: {}]   ;;  %s5853_s5 = inlined_call_operand.hbm [shape: bf16[1024,896], index: 5, kind: output, shape index: {}]  }
   0x1   :  { %5857 = sst [smem:[#allocation15_spill]] %s5849_s1 }
   0x2   :  { %10 = vsyncpa [#allocation3], 0 }
   0x3   :  { %11 = vsyncpa [#allocation6], 0 }
   0x4   :  { %12 = vsyncpa [#allocation9], 0 }
   0x5   :  { %13 = vsyncpa [#allocation4], 0 }
   0x6   :  { %15 = vsyncpa [#allocation4 + $0x1], 0  ;;  %s4912_s18 = smov 0   ;;  %s4914_s19 = smov 0  }
   0x7   :  { %s4916_s20 = smov 0   ;;  %s4918_s21 = smov 0  }
   0x8 LB: > { %s4933_s22 = sadd.s32 4294967295, %s4868_s21   ;;  %s3420_s23 = sadd.s32 4294967294, %s4868_s21   ;;  %s4868_s21 = sphi %s4918_s21, %s5876_s21   ;;  %s4864_s20 = sphi %s4916_s20, %s5875_s20   ;;  %s4860_s19 = sphi %s4914_s19, %s5874_s19   ;;  %s4856_s18 = sphi %s4912_s18, %s5873_s18  }
   0x9   : > { %s4937_s24 = sadd.s32 1, %s4868_s21   ;;  %s138_s25 = sadd.s32 1, %s4864_s20 }
   0xa   : > { %s135_s26 = ssub.s32 %s4868_s21, %s4937_s24  ;;  %p148_p0 = scmp.ne.s32.totalorder %s4864_s20, %s4860_s19 }
   0xb   : > { %p136_p1 = scmp.eq.s32.totalorder %s135_s26, 0  ;;  %p149_p2 = scmp.eq.s32.totalorder %s4933_s22, 3 }
   0xc   : > { %p154_p3 = scmp.ne.s32.totalorder %s4860_s19, %s4856_s18  ;;  %p155_p4 = scmp.eq.s32.totalorder %s3420_s23, 3 }
   0xd   : > { %s4948_s27 = scalar_select %p136_p1, %s4864_s20, %s138_s25  }
   0xe   : > { %p4950_p5 = por %p149_p2, %p148_p0  ;;  %p4954_p6 = por %p155_p4, %p154_p3 }
   0xf   : > { %p3421_p7 = scmp.ge.s32.totalorder %s4868_s21, 1  ;;  %p162_p8 = scmp.lt.s32.totalorder %s4868_s21, 5 }
  0x10   : > { %s5858_s28 = scalar_select %p4950_p5, 1, 0 }
  0x11   : > { %s5859_s29 = scalar_select %p4954_p6, 1, 0 }
  0x12   : > { %p5854_p9 = scmp.eq.s32.totalorder %s4933_s22, 0  ;;  %p4961_p10 = pnand %p3421_p7, %p162_p8 }
  0x13   : > { %s4870_s6 = smov [#allocation5]   ;;  %s4871_s8 = smov [#allocation2]  }
  0x14   : > { %s5860_s30 = scalar_select %p4961_p10, 1, 0 }
  0x15   : > { %s188_s7 = sshll.u32 %s4870_s6, 4  ;;  %p3984_p11 = pneg %p4961_p10  ;;  %s189_s7 = int_to_ptr.vmem [resolvable:$true] %s188_s7 }
  0x16   : > { %s174_s9 = sshll.u32 %s4871_s8, 4  ;;  %s4872_s11 = smov [#allocation7]   ;;  %s4973_s9 = int_to_ptr.vmem [resolvable:$true] %s174_s9 }
  0x17   : > { %p4969_p12 = pnand %p5854_p9, %p3984_p11  ;;  %s4975_s12 = sshll.u32 %s4872_s11, 4  ;;  %s199_s12 = int_to_ptr.vmem [resolvable:$true] %s4975_s12 }
  0x18   : > { %s4682_s15 = scalar_lea.hbm %s5850_s2, 32 }
  0x19   : > { %p4683_p13 = scmp.ne.s32.totalorder %s5850_s2, %s4682_s15  ;;  %p4985_p0 = pneg %p4969_p12 }
  0x1a   : > { %p4689_p3 = scmp.lt.u32.totalorder %s4682_s15, %s5850_s2 }
  0x1b   : > { %p4685_p1 = pnand %p4985_p0, %p4683_p13 }
  0x1d   : > { %p4686_p2 = pneg %p4685_p1 }
  0x1f   : > { %p4691_p4 = pnand %p4689_p3, %p4686_p2 }
  0x21   : > { %4694 = shalt.err (!%p4691_p4)
}
  0x22   : > { %s4695_s6 = scalar_lea.vmem %s189_s7, 32  ;;  %p4703_p9 = scmp.lt.s32.totalorder %s189_s7, %s189_s7 }
  0x23   : > { %p4696_p7 = scmp.ne.s32.totalorder %s189_s7, %s4695_s6  ;;  %p4704_p6 = scmp.lt.s32.totalorder %s4695_s6, %s4695_s6 }
  0x25   : > { %p4698_p8 = pnand %p4696_p7, %p4985_p0  ;;  %p4705_p5 = por %p4704_p6, %p4703_p9 }
  0x27   : > { %p4699_p11 = pneg %p4698_p8 }
  0x29   : > { %p4706_p10 = pnand %p4705_p5, %p4699_p11 }
  0x2b   : > { %4709 = shalt.err (!%p4706_p10)
}
  0x2c   : > { %3990 = dma.hbm_to_vmem [thread:$0]  (!%p4969_p12), %s5850_s2, 32, %s189_s7, [#allocation6]  }
  0x2d   : > { %s5863_s1 = sld [smem:[#allocation15_spill]] }
  0x33   : > { %s4710_s15 = scalar_lea.hbm %s5863_s1, 1664 }
  0x34   : > { %p4711_p13 = scmp.ne.s32.totalorder %s5863_s1, %s4710_s15  ;;  %p4717_p5 = scmp.lt.u32.totalorder %s4710_s15, %s5863_s1 }
  0x36   : > { %p4713_p1 = pnand %p4711_p13, %p4985_p0 }
  0x38   : > { %p4714_p6 = pneg %p4713_p1 }
  0x3a   : > { %p4719_p9 = pnand %p4717_p5, %p4714_p6 }
  0x3c   : > { %4722 = shalt.err (!%p4719_p9)
}
  0x3d   : > { %s4723_s7 = scalar_lea.vmem %s4973_s9, 1664  ;;  %p4731_p4 = scmp.lt.s32.totalorder %s4973_s9, %s4973_s9 }
  0x3e   : > { %p4724_p10 = scmp.ne.s32.totalorder %s4973_s9, %s4723_s7  ;;  %p4732_p7 = scmp.lt.s32.totalorder %s4723_s7, %s4723_s7 }
  0x40   : > { %p4726_p2 = pnand %p4724_p10, %p4985_p0  ;;  %p4733_p8 = por %p4732_p7, %p4731_p4 }
  0x42   : > { %p4727_p3 = pneg %p4726_p2 }
  0x44   : > { %p4734_p11 = pnand %p4733_p8, %p4727_p3 }
  0x46   : > { %4737 = shalt.err (!%p4734_p11)
}
  0x47   : > { %s4873_s6 = smov 128   ;;  %s4874_s8 = smov 8  }
  0x48   : > { %3987 = dma.hbm_to_vmem [thread:$0]  (!%p4969_p12), %s5863_s1, 1664, %s4973_s9, [#allocation3], %s4873_s6, %s4873_s6, %s4874_s8  }
  0x49   : > { %s4738_s16 = scalar_lea.hbm %s5851_s3, 14336 }
  0x4a   : > { %p4739_p13 = scmp.ne.s32.totalorder %s5851_s3, %s4738_s16  ;;  %p4745_p5 = scmp.lt.u32.totalorder %s4738_s16, %s5851_s3 }
  0x4c   : > { %p4741_p1 = pnand %p4739_p13, %p4985_p0 }
  0x4e   : > { %p4742_p6 = pneg %p4741_p1 }
  0x50   : > { %p4747_p9 = pnand %p4745_p5, %p4742_p6 }
  0x52   : > { %4750 = shalt.err (!%p4747_p9)
}
  0x53   : > { %s4751_s11 = scalar_lea.vmem %s199_s12, 14336  ;;  %p4759_p4 = scmp.lt.s32.totalorder %s199_s12, %s199_s12 }
  0x54   : > { %p4752_p10 = scmp.ne.s32.totalorder %s199_s12, %s4751_s11  ;;  %p4760_p7 = scmp.lt.s32.totalorder %s4751_s11, %s4751_s11 }
  0x56   : > { %p4754_p2 = pnand %p4752_p10, %p4985_p0  ;;  %p4761_p8 = por %p4760_p7, %p4759_p4 }
  0x58   : > { %p4755_p3 = pneg %p4754_p2 }
  0x5a   : > { %p4762_p11 = pnand %p4761_p8, %p4755_p3 }
  0x5c   : > { %4765 = shalt.err (!%p4762_p11)
}
  0x5d   : > { %s4875_s9 = smov 448   ;;  %s4876_s6 = smov 28  }
  0x5e   : > { %3993 = dma.hbm_to_vmem [thread:$0]  (!%p4969_p12), %s5851_s3, 14336, %s199_s12, [#allocation6], %s4875_s9, %s4875_s9, %s4876_s6  }
  0x5f   : > { %s4877_s14 = smov [#allocation8]   ;;  %s4766_s25 = scalar_lea.hbm %s5852_s4, 112 }
  0x60   : > { %s212_s15 = sshll.u32 %s4877_s14, 4  ;;  %p4767_p13 = scmp.ne.s32.totalorder %s5852_s4, %s4766_s25  ;;  %s213_s15 = int_to_ptr.vmem [resolvable:$true] %s212_s15 }
  0x61   : > { %p4773_p5 = scmp.lt.u32.totalorder %s4766_s25, %s5852_s4 }
  0x62   : > { %p4769_p1 = pnand %p4767_p13, %p4985_p0 }
  0x64   : > { %p4770_p6 = pneg %p4769_p1 }
  0x66   : > { %p4775_p9 = pnand %p4773_p5, %p4770_p6 }
  0x68   : > { %4778 = shalt.err (!%p4775_p9)
}
  0x69   : > { %s4779_s12 = scalar_lea.vmem %s213_s15, 112  ;;  %s4786_s9 = scalar_lea.vmem %s213_s15, 128 }
  0x6a   : > { %p4780_p10 = scmp.ne.s32.totalorder %s213_s15, %s4779_s12  ;;  %p4787_p4 = scmp.lt.s32.totalorder %s213_s15, %s213_s15 }
  0x6b   : > { %p4788_p7 = scmp.lt.s32.totalorder %s4786_s9, %s4779_s12 }
  0x6c   : > { %p4782_p2 = pnand %p4780_p10, %p4985_p0 }
  0x6d   : > { %p4789_p8 = por %p4788_p7, %p4787_p4 }
  0x6e   : > { %p4783_p3 = pneg %p4782_p2 }
  0x70   : > { %p4790_p11 = pnand %p4789_p8, %p4783_p3 }
  0x72   : > { %4793 = shalt.err (!%p4790_p11)
}
  0x73   : > { %3996 = dma.hbm_to_vmem [thread:$0]  (!%p4969_p12), %s5852_s4, 112, %s213_s15, [#allocation9]  }
  0x74   : > { %p5864_p13 = scmp.ne.s32.totalorder %s5860_s30, 0 }
  0x75   : > { %p5865_p1 = scmp.eq.s32.totalorder (!%p5864_p13), %s4933_s22, 0 }
  0x76   : > { %234 = sbr.rel (%p5864_p13) target bundleno = 882 (0x372), region = 40 }
  0x7d   : > { %4839 = dma.done.wait (%p5865_p1), [#allocation3], 1664   ;;  %p5866_p0 = pmov %p5865_p1 }
  0x7f   : > { %4841 = vsyncadd (%p5866_p0), [#allocation3], 4294965632  ;;  %p5867_p6 = pmov %p5866_p0 }
  0x80   : > { %p5868_p5 = pmov %p5866_p0 }
  0x81   : > { %4843 = dma.done.wait (%p5867_p6), [#allocation6], 14368  }
  0x82   : > { %4845 = vsyncadd (%p5868_p5), [#allocation6], 4294952928  ;;  %p5869_p9 = pmov %p5866_p0 }
  0x83   : > { %p5870_p12 = pmov %p5866_p0 }
  0x84   : > { %4847 = dma.done.wait (%p5869_p9), [#allocation9], 112  }
  0x85   : > { %4849 = vsyncadd (%p5870_p12), [#allocation9], 4294967184  ;;  %v4878_v0 = vmov 0   ;;  %v4053_v1 = vld [vmem:[#allocation2 + $0x4] ss:$8 sps:$4 sm:$0xff]   ;;  %s3432_s1 = sshll.u32 %s4933_s22, 5 }
  0x86   : > { %508 = vmatprep.mubr.bf16.mxu0 %v4878_v0  ;;  %588 = vmatprep.mubr.bf16.mxu1 %v4878_v0  ;;  %v4055_v2 = vld [vmem:[#allocation2] ss:$8 sps:$4 sm:$0xff]   ;;  %v4056_v3 = vld [vmem:[#allocation2 + $0x14] ss:$8 sps:$4 sm:$0xff]   ;;  %v4058_v4 = vld [vmem:[#allocation2 + $0x10] ss:$8 sps:$4 sm:$0xff]  }
  0x87   : > { %476 = vmatprep.subr.bf16.mxu0 %v4053_v1  ;;  %3950 = vmatprep.subr.bf16.mxu1 %v4053_v1  ;;  %v4059_v5 = vld [vmem:[#allocation2 + $0x24] ss:$8 sps:$4 sm:$0xff]   ;;  %v4061_v6 = vld [vmem:[#allocation2 + $0x20] ss:$8 sps:$4 sm:$0xff]   ;;  %p275_p10 = scmp.lt.s32.totalorder %s3432_s1, 127  ;;  %vm469_vm0 = vcmask 1041408  }
  0x88   : > { %477 = vmatpush1.bf16.msra.mxu0 %v4055_v2  ;;  %3957 = vmatpush1.bf16.msra.mxu1 %v4055_v2  ;;  %v4062_v7 = vld [vmem:[#allocation2 + $0x34] ss:$8 sps:$4 sm:$0xff]   ;;  %v4064_v8 = vld [vmem:[#allocation2 + $0x30] ss:$8 sps:$4 sm:$0xff]   ;;  %v4065_v9 = vld [vmem:[#allocation2 + $0x44] ss:$8 sps:$4 sm:$0xff]  }
  0x89   : > { %478 = vmatprep.subr.bf16.mxu0 %v4056_v3  ;;  %3951 = vmatprep.subr.bf16.mxu1 %v4056_v3  ;;  %s5878_s1 = smov (!%p275_p10, %s3432_s1), 127  ;;  %v4067_v10 = vld [vmem:[#allocation2 + $0x40] ss:$8 sps:$4 sm:$0xff]   ;;  %v4068_v11 = vld [vmem:[#allocation2 + $0x54] ss:$8 sps:$4 sm:$0xff]   ;;  %vm420_vm1 = vcmask 818176  }
  0x8a   : > { %s3433_s30 = sshll.u32 %s5878_s1, 3  ;;  %v342_v12 = vld [vmem:[#allocation2 + $0x60] sm:$0x33]  ;;  %v4070_v13 = vld [vmem:[#allocation2 + $0x50] ss:$8 sps:$4 sm:$0xff]   ;;  %s271_s14 = sand.u32 1, %s4860_s19  }
  0x8b   : > { %s5081_s13 = scalar_lea.vmem %s5848_s0, %s3433_s30  ;;  %v3447_v14 = vcombine.high %v342_v12, %v342_v12  ;;  %v3446_v15 = vcombine.low %v342_v12, %v342_v12  ;;  %v4075_v20 = vld [vmem:[#allocation7 + $0xc] ss:$28 sps:$4 sm:$0xff]   ;;  %v4078_v22 = vld [vmem:[#allocation7 + $0x4] ss:$28 sps:$4 sm:$0xff]   ;;  %v4084_v30 = vld [vmem:[#allocation7 + $0x3c] ss:$28 sps:$4 sm:$0xff]  }
  0x8c   : > { %479 = vmatpush1.bf16.msra.mxu0 %v4058_v4  ;;  %3958 = vmatpush1.bf16.msra.mxu1 %v4058_v4  ;;  %v282_v16 = vld [vmem:[%s5081_s13] sm:$0xff]  ;;  %v283_v17 = vld [vmem:[%s5081_s13 + $0x8] sm:$0xff]  ;;  %v284_v27 = vld [vmem:[%s5081_s13 + $0x10] sm:$0xff]  ;;  %s5428_s15 = smul.u32 896, %s271_s14  ;;  %p5871_p3 = scmp.ne.s32.totalorder %s5858_s28, 0 }
  0x8d   : > { %480 = vmatprep.subr.bf16.mxu0 %v4059_v5  ;;  %3952 = vmatprep.subr.bf16.mxu1 %v4059_v5  ;;  %v298_v18 = vld [vmem:[%s5081_s13 + $0x80] sm:$0xff]  ;;  %v299_v19 = vld [vmem:[%s5081_s13 + $0x88] sm:$0xff]  ;;  %v471_v21 = vsel %vm469_vm0, %v3446_v15, 0  ;;  %v314_v23 = vpack.c.bf16 %v283_v17, %v282_v16  ;;  %v285_v28 = vld [vmem:[%s5081_s13 + $0x18] sm:$0xff]  ;;  %s3965_s17 = smul.u32 14336, %s4933_s22  ;;  %s5807_s22 = scalar_lea.sflag [#allocation4], %s271_s14 }
  0x8e   : > { %v322_v24 = vpack.c.bf16 %v299_v19, %v298_v18  ;;  %v4073_v25 = vld [vmem:[#allocation7 + $0x8] ss:$28 sps:$4 sm:$0xff]   ;;  %v4076_v26 = vld [vmem:[#allocation7] ss:$28 sps:$4 sm:$0xff]   ;;  %v301_v32 = vld [vmem:[%s5081_s13 + $0x98] sm:$0xff]  ;;  %v315_v37 = vpack.c.bf16 %v285_v28, %v284_v27  ;;  %s5441_s16 = scalar_lea.vmem [#allocation10], %s5428_s15 }
  0x8f   : > { %v4081_v29 = vld [vmem:[#allocation7 + $0x44] ss:$28 sps:$4 sm:$0xff]   ;;  %v4082_v34 = vld [vmem:[#allocation7 + $0x38] ss:$28 sps:$4 sm:$0xff]   ;;  %v4088_v40 = vld [vmem:[#allocation7 + $0x70] ss:$28 sps:$4 sm:$0xff]   ;;  %s5799_s11 = scalar_lea.hbm %s5853_s5, %s3965_s17 }
  0x90   : > { %481 = vmatpush1.bf16.msra.mxu0 %v4061_v6  ;;  %3959 = vmatpush1.bf16.msra.mxu1 %v4061_v6  ;;  %v300_v31 = vld [vmem:[%s5081_s13 + $0x90] sm:$0xff]  ;;  %v4079_v33 = vld [vmem:[#allocation7 + $0x40] ss:$28 sps:$4 sm:$0xff]   ;;  %v4090_v36 = vld [vmem:[#allocation7 + $0x74] ss:$28 sps:$4 sm:$0xff]   ;;  %s3317_s25 = sshll.u32 %s5441_s16, 4  ;;  %s5802_s25 = int_to_ptr.vmem [resolvable:$true] %s3317_s25 }
  0x91   : > { %482 = vmatprep.subr.bf16.mxu0 %v4062_v7  ;;  %3953 = vmatprep.subr.bf16.mxu1 %v4062_v7  ;;  %v4087_v35 = vld [vmem:[#allocation7 + $0x7c] ss:$28 sps:$4 sm:$0xff]   ;;  %v323_v38 = vpack.c.bf16 %v301_v32, %v300_v31  ;;  %v4093_v43 = vld [vmem:[#allocation7 + $0xb4] ss:$28 sps:$4 sm:$0xff]   ;;  %v4096_v44 = vld [vmem:[#allocation7 + $0xac] ss:$28 sps:$4 sm:$0xff]  }
  0x92   : > { %v4085_v39 = vld [vmem:[#allocation7 + $0x78] ss:$28 sps:$4 sm:$0xff]   ;;  %v287_v42 = vld [vmem:[%s5081_s13 + $0x28] sm:$0xff]  ;;  %v4091_v47 = vld [vmem:[#allocation7 + $0xb0] ss:$28 sps:$4 sm:$0xff]   ;;  %s4794_s12 = scalar_lea.vmem %s5802_s25, 14336 }
  0x93   : > { %v286_v41 = vld [vmem:[%s5081_s13 + $0x20] sm:$0xff]  ;;  %v303_v46 = vld [vmem:[%s5081_s13 + $0xa8] sm:$0xff]  ;;  %v4099_v49 = vld [vmem:[#allocation7 + $0xec] ss:$28 sps:$4 sm:$0xff]   ;;  %p4795_p2 = scmp.ne.s32.totalorder %s5802_s25, %s4794_s12  ;;  %s4879_s9 = smov [#allocation10]  }
  0x94   : > { %483 = vmatpush1.bf16.msra.mxu0 %v4064_v8  ;;  %3960 = vmatpush1.bf16.msra.mxu1 %v4064_v8  ;;  %v302_v45 = vld [vmem:[%s5081_s13 + $0xa0] sm:$0xff]  ;;  %v4094_v48 = vld [vmem:[#allocation7 + $0xa8] ss:$28 sps:$4 sm:$0xff]   ;;  %v316_v51 = vpack.c.bf16 %v287_v42, %v286_v41  ;;  %v289_v56 = vld [vmem:[%s5081_s13 + $0x38] sm:$0xff]  ;;  %s4798_s6 = sshll.u32 %s4879_s9, 4  ;;  %s4799_s6 = int_to_ptr.vmem [resolvable:$false] %s4798_s6 }
  0x95   : > { %484 = vmatprep.subr.bf16.mxu0 %v4065_v9  ;;  %3954 = vmatprep.subr.bf16.mxu1 %v4065_v9  ;;  %v4102_v50 = vld [vmem:[#allocation7 + $0xe4] ss:$28 sps:$4 sm:$0xff]   ;;  %v324_v52 = vpack.c.bf16 %v303_v46, %v302_v45  ;;  %v4108_v58 = vld [vmem:[#allocation7 + $0x11c] ss:$28 sps:$4 sm:$0xff]   ;;  %v305_v60 = vld [vmem:[%s5081_s13 + $0xb8] sm:$0xff]  ;;  %p4796_p4 = pnand %p4795_p2, %p5871_p3  ;;  %s4800_s8 = scalar_lea.vmem %s4799_s6, 28672 }
  0x96   : > { %v4097_v53 = vld [vmem:[#allocation7 + $0xe8] ss:$28 sps:$4 sm:$0xff]   ;;  %v4100_v54 = vld [vmem:[#allocation7 + $0xe0] ss:$28 sps:$4 sm:$0xff]   ;;  %v4106_v62 = vld [vmem:[#allocation7 + $0x118] ss:$28 sps:$4 sm:$0xff]   ;;  %p4801_p8 = scmp.lt.s32.totalorder %s5802_s25, %s4799_s6  ;;  %p4802_p11 = scmp.lt.s32.totalorder %s4800_s8, %s4794_s12 }
  0x97   : > { %v288_v55 = vld [vmem:[%s5081_s13 + $0x30] sm:$0xff]  ;;  %v4103_v61 = vld [vmem:[#allocation7 + $0x120] ss:$28 sps:$4 sm:$0xff]   ;;  %v4114_v1 = vld [vmem:[#allocation7 + $0x154] ss:$28 sps:$4 sm:$0xff]   ;;  %p4797_p7 = pneg %p4796_p4 }
  0x98   : > { %485 = vmatpush1.bf16.msra.mxu0 %v4067_v10  ;;  %3961 = vmatpush1.bf16.msra.mxu1 %v4067_v10  ;;  %v4105_v57 = vld [vmem:[#allocation7 + $0x124] ss:$28 sps:$4 sm:$0xff]   ;;  %v4111_v63 = vld [vmem:[#allocation7 + $0x15c] ss:$28 sps:$4 sm:$0xff]   ;;  %v317_v2 = vpack.c.bf16 %v289_v56, %v288_v55  ;;  %v4112_v5 = vld [vmem:[#allocation7 + $0x150] ss:$28 sps:$4 sm:$0xff]   ;;  %p4803_p13 = por %p4802_p11, %p4801_p8 }
  0x99   : > { %486 = vmatprep.subr.bf16.mxu0 %v4068_v11  ;;  %3955 = vmatprep.subr.bf16.mxu1 %v4068_v11  ;;  %v304_v59 = vld [vmem:[%s5081_s13 + $0xb0] sm:$0xff]  ;;  %v4109_v4 = vld [vmem:[#allocation7 + $0x158] ss:$28 sps:$4 sm:$0xff]   ;;  %v291_v7 = vld [vmem:[%s5081_s13 + $0x48] sm:$0xff] }
  0x9a   : > { %v325_v3 = vpack.c.bf16 %v305_v60, %v304_v59  ;;  %v290_v6 = vld [vmem:[%s5081_s13 + $0x40] sm:$0xff]  ;;  %v4120_v10 = vld [vmem:[#allocation7 + $0x18c] ss:$28 sps:$4 sm:$0xff]   ;;  %v307_v11 = vld [vmem:[%s5081_s13 + $0xc8] sm:$0xff]  ;;  %p4804_p1 = pnand %p4803_p13, %p4797_p7 }
  0x9b   : > { %v306_v8 = vld [vmem:[%s5081_s13 + $0xc0] sm:$0xff]  ;;  %v4115_v12 = vld [vmem:[#allocation7 + $0x190] ss:$28 sps:$4 sm:$0xff]   ;;  %v4126_v15 = vld [vmem:[#allocation7 + $0x1c4] ss:$28 sps:$4 sm:$0xff]   ;;  %v318_v16 = vpack.c.bf16 %v291_v7, %v290_v6 }
  0x9c   : > { %487 = vmatpush1.bf16.msra.mxu0 %v4070_v13  ;;  %3962 = vmatpush1.bf16.msra.mxu1 %v4070_v13  ;;  %v4117_v9 = vld [vmem:[#allocation7 + $0x194] ss:$28 sps:$4 sm:$0xff]   ;;  %v4118_v13 = vld [vmem:[#allocation7 + $0x188] ss:$28 sps:$4 sm:$0xff]   ;;  %v326_v17 = vpack.c.bf16 %v307_v11, %v306_v8  ;;  %v4124_v19 = vld [vmem:[#allocation7 + $0x1c0] ss:$28 sps:$4 sm:$0xff]  }
  0x9d   : > { %3448 = vmatprep.subr.msk.bf16.mxu0 %vm469_vm0, %v3447_v14  ;;  %3956 = vmatprep.subr.msk.bf16.mxu1 %vm469_vm0, %v3447_v14  ;;  %v4123_v14 = vld [vmem:[#allocation7 + $0x1cc] ss:$28 sps:$4 sm:$0xff]   ;;  %v4130_v27 = vld [vmem:[#allocation7 + $0x1f8] ss:$28 sps:$4 sm:$0xff]   ;;  %v343_v7 = vld [vmem:[#allocation5] sm:$0x3] }
  0x9e   : > { %v4121_v18 = vld [vmem:[#allocation7 + $0x1c8] ss:$28 sps:$4 sm:$0xff]   ;;  %v4135_v28 = vld [vmem:[#allocation7 + $0x23c] ss:$28 sps:$4 sm:$0xff]   ;;  %v4162_v59 = vld [vmem:[#allocation7 + $0x314] ss:$28 sps:$4 sm:$0xff]  }
  0x9f   : > { %v4133_v32 = vld [vmem:[#allocation7 + $0x238] ss:$28 sps:$4 sm:$0xff]   ;;  %v4142_v41 = vld [vmem:[#allocation7 + $0x268] ss:$28 sps:$4 sm:$0xff]  }
  0xa0   : > { %489 = vmatpush1.bf16.msra.mxu0 %v471_v21  ;;  %3963 = vmatpush1.bf16.msra.mxu1 %v471_v21  ;;  %v4132_v21 = vld [vmem:[#allocation7 + $0x1fc] ss:$28 sps:$4 sm:$0xff]   ;;  %v4147_v42 = vld [vmem:[#allocation7 + $0x2ac] ss:$28 sps:$4 sm:$0xff]  }
  0xa1   : > { %1699 = vmatprep.subr.bf16.mxu0 %v4075_v20  ;;  %1506 = vmatprep.subr.bf16.mxu1 %v4078_v22  ;;  %v4129_v20 = vld [vmem:[#allocation7 + $0x204] ss:$28 sps:$4 sm:$0xff]   ;;  %v4154_v55 = vld [vmem:[#allocation7 + $0x2d8] ss:$28 sps:$4 sm:$0xff]  }
  0xa2   : > { %v292_v22 = vld [vmem:[%s5081_s13 + $0x50] sm:$0xff]  ;;  %v4157_v60 = vld [vmem:[#allocation7 + $0x318] ss:$28 sps:$4 sm:$0xff]  }
  0xa3   : > { %3449 = vmatmul.mubr.msk.bf16.vlgmr.msra.gmra.mrb[0].mxu0 %vm420_vm1, %v314_v23  ;;  %3457 = vmatmul.mubr.msk.bf16.vlgmr.msra.gmra.mrb[0].mxu1 %vm420_vm1, %v322_v24  ;;  %v293_v23 = vld [vmem:[%s5081_s13 + $0x58] sm:$0xff]  ;;  %v308_v24 = vld [vmem:[%s5081_s13 + $0xd0] sm:$0xff] }
  0xa4   : > { %518 = vmatprep.mubr.bf16.mxu0 %v4878_v0  ;;  %598 = vmatprep.mubr.bf16.mxu1 %v4878_v0  ;;  %v4145_v46 = vld [vmem:[#allocation7 + $0x2a8] ss:$28 sps:$4 sm:$0xff]  }
  0xa5   : > { %1700 = vmatpush1.bf16.msra.mxu0 %v4073_v25  ;;  %1507 = vmatpush1.bf16.msra.mxu1 %v4076_v26  ;;  %v309_v25 = vld [vmem:[%s5081_s13 + $0xd8] sm:$0xff]  ;;  %v4127_v26 = vld [vmem:[#allocation7 + $0x200] ss:$28 sps:$4 sm:$0xff]  }
  0xa6   : > { %1701 = vmatprep.subr.bf16.mxu0 %v4081_v29  ;;  %1508 = vmatprep.subr.bf16.mxu1 %v4084_v30  ;;  %v4138_v29 = vld [vmem:[#allocation7 + $0x234] ss:$28 sps:$4 sm:$0xff]   ;;  %v319_v30 = vpack.c.bf16 %v293_v23, %v292_v22  ;;  %v327_v31 = vpack.c.bf16 %v309_v25, %v308_v24 }
  0xa9   : > { %1702 = vmatpush1.bf16.msra.mxu0 %v4079_v33  ;;  %1509 = vmatpush1.bf16.msra.mxu1 %v4082_v34  ;;  %v4136_v33 = vld [vmem:[#allocation7 + $0x230] ss:$28 sps:$4 sm:$0xff]  }
  0xaa   : > { %1703 = vmatprep.subr.bf16.mxu0 %v4087_v35  ;;  %1510 = vmatprep.subr.bf16.mxu1 %v4090_v36  ;;  %v4141_v34 = vld [vmem:[#allocation7 + $0x274] ss:$28 sps:$4 sm:$0xff]   ;;  %v4144_v35 = vld [vmem:[#allocation7 + $0x26c] ss:$28 sps:$4 sm:$0xff]  }
  0xab   : > { %3450 = vmatmul.mubr.msk.bf16.gmra.mrb[4].mxu0 %vm420_vm1, %v315_v37  ;;  %3458 = vmatmul.mubr.msk.bf16.gmra.mrb[4].mxu1 %vm420_vm1, %v323_v38  ;;  %v294_v36 = vld [vmem:[%s5081_s13 + $0x60] sm:$0xff]  ;;  %v295_v37 = vld [vmem:[%s5081_s13 + $0x68] sm:$0xff] }
  0xac   : > { %528 = vmatprep.mubr.bf16.mxu0 %v4878_v0  ;;  %608 = vmatprep.mubr.bf16.mxu1 %v4878_v0  ;;  %v310_v38 = vld [vmem:[%s5081_s13 + $0xe0] sm:$0xff] }
  0xad   : > { %1704 = vmatpush1.bf16.msra.mxu0 %v4085_v39  ;;  %1511 = vmatpush1.bf16.msra.mxu1 %v4088_v40  ;;  %v311_v39 = vld [vmem:[%s5081_s13 + $0xe8] sm:$0xff]  ;;  %v4139_v40 = vld [vmem:[#allocation7 + $0x270] ss:$28 sps:$4 sm:$0xff]  }
  0xae   : > { %1705 = vmatprep.subr.bf16.mxu0 %v4093_v43  ;;  %1512 = vmatprep.subr.bf16.mxu1 %v4096_v44  ;;  %v4150_v43 = vld [vmem:[#allocation7 + $0x2a4] ss:$28 sps:$4 sm:$0xff]   ;;  %v320_v44 = vpack.c.bf16 %v295_v37, %v294_v36  ;;  %v328_v45 = vpack.c.bf16 %v311_v39, %v310_v38  ;;  %v4170_v39 = vld [vmem:[#allocation7 + $0x18] ss:$28 sps:$4 sm:$0xff]  }
  0xb1   : > { %1706 = vmatpush1.bf16.msra.mxu0 %v4091_v47  ;;  %1513 = vmatpush1.bf16.msra.mxu1 %v4094_v48  ;;  %v4148_v47 = vld [vmem:[#allocation7 + $0x2a0] ss:$28 sps:$4 sm:$0xff]  }
  0xb2   : > { %1707 = vmatprep.subr.bf16.mxu0 %v4099_v49  ;;  %1514 = vmatprep.subr.bf16.mxu1 %v4102_v50  ;;  %v4153_v48 = vld [vmem:[#allocation7 + $0x2e4] ss:$28 sps:$4 sm:$0xff]   ;;  %v4156_v49 = vld [vmem:[#allocation7 + $0x2dc] ss:$28 sps:$4 sm:$0xff]  }
  0xb3   : > { %3451 = vmatmul.mubr.msk.bf16.gmra.mrb[8].mxu0 %vm420_vm1, %v316_v51  ;;  %3459 = vmatmul.mubr.msk.bf16.gmra.mrb[8].mxu1 %vm420_vm1, %v324_v52  ;;  %v296_v50 = vld [vmem:[%s5081_s13 + $0x70] sm:$0xff]  ;;  %v297_v51 = vld [vmem:[%s5081_s13 + $0x78] sm:$0xff] }
  0xb4   : > { %538 = vmatprep.mubr.bf16.mxu0 %v4878_v0  ;;  %618 = vmatprep.mubr.bf16.mxu1 %v4878_v0  ;;  %v312_v52 = vld [vmem:[%s5081_s13 + $0xf0] sm:$0xff]  ;;  %v321_v56 = vpack.c.bf16 %v297_v51, %v296_v50 }
  0xb5   : > { %1708 = vmatpush1.bf16.msra.mxu0 %v4097_v53  ;;  %1515 = vmatpush1.bf16.msra.mxu1 %v4100_v54  ;;  %v313_v53 = vld [vmem:[%s5081_s13 + $0xf8] sm:$0xff]  ;;  %v4151_v54 = vld [vmem:[#allocation7 + $0x2e0] ss:$28 sps:$4 sm:$0xff]  }
  0xb6   : > { %1709 = vmatprep.subr.bf16.mxu0 %v4105_v57  ;;  %1516 = vmatprep.subr.bf16.mxu1 %v4108_v58  ;;  %v329_v57 = vpack.c.bf16 %v313_v53, %v312_v52  ;;  %v4159_v58 = vld [vmem:[#allocation7 + $0x31c] ss:$28 sps:$4 sm:$0xff]  }
  0xb9   : > { %1710 = vmatpush1.bf16.msra.mxu0 %v4103_v61  ;;  %1517 = vmatpush1.bf16.msra.mxu1 %v4106_v62  ;;  %v4160_v61 = vld [vmem:[#allocation7 + $0x310] ss:$28 sps:$4 sm:$0xff]  }
  0xba   : > { %1711 = vmatprep.subr.bf16.mxu0 %v4111_v63  ;;  %1518 = vmatprep.subr.bf16.mxu1 %v4114_v1  ;;  %v4168_v62 = vld [vmem:[#allocation7 + $0x34c] ss:$28 sps:$4 sm:$0xff]  }
  0xbb   : > { %3452 = vmatmul.mubr.msk.bf16.gmra.mrb[12].mxu0 %vm420_vm1, %v317_v2  ;;  %3460 = vmatmul.mubr.msk.bf16.gmra.mrb[12].mxu1 %vm420_vm1, %v325_v3  ;;  %v4163_v63 = vld [vmem:[#allocation7 + $0x350] ss:$28 sps:$4 sm:$0xff]   ;;  %v4166_v1 = vld [vmem:[#allocation7 + $0x348] ss:$28 sps:$4 sm:$0xff]   ;;  %v4169_v2 = vld [vmem:[#allocation7 + $0x1d8] ss:$28 sps:$4 sm:$0xff]  }
  0xbc   : > { %548 = vmatprep.mubr.bf16.mxu0 %v4878_v0  ;;  %628 = vmatprep.mubr.bf16.mxu1 %v4878_v0  ;;  %v4173_v3 = vld [vmem:[#allocation7 + $0x14] ss:$28 sps:$4 sm:$0xff]  }
  0xbd   : > { %1712 = vmatpush1.bf16.msra.mxu0 %v4109_v4  ;;  %1519 = vmatpush1.bf16.msra.mxu1 %v4112_v5  ;;  %v345_v4 = vlaneseq }
  0xbe   : > { %1713 = vmatprep.subr.bf16.mxu0 %v4117_v9  ;;  %1520 = vmatprep.subr.bf16.mxu1 %v4120_v10 }
  0xbf   : > { %v5145_v5 = vshrl.u32 %v345_v4, 7 }
  0xc1   : > { %1714 = vmatpush1.bf16.msra.mxu0 %v4115_v12  ;;  %1521 = vmatpush1.bf16.msra.mxu1 %v4118_v13  ;;  %v347_v6 = vsub.s32 0, %v5145_v5  ;;  %v351_v8 = vsub.s32 1, %v5145_v5 }
  0xc2   : > { %1715 = vmatprep.subr.bf16.mxu0 %v4123_v14  ;;  %1522 = vmatprep.subr.bf16.mxu1 %v4126_v15 }
  0xc3   : > { %3453 = vmatmul.mubr.msk.bf16.gmra.mrb[16].mxu0 %vm420_vm1, %v318_v16  ;;  %3461 = vmatmul.mubr.msk.bf16.gmra.mrb[16].mxu1 %vm420_vm1, %v326_v17  ;;  %v5151_v9 = vrot.slane %v343_v7, %v347_v6  ;;  %v5155_v10 = vrot.slane %v343_v7, %v351_v8 }
  0xc4   : > { %558 = vmatprep.mubr.bf16.mxu0 %v4878_v0  ;;  %638 = vmatprep.mubr.bf16.mxu1 %v4878_v0 }
  0xc5   : > { %1716 = vmatpush1.bf16.msra.mxu0 %v4121_v18  ;;  %1523 = vmatpush1.bf16.msra.mxu1 %v4124_v19 }
  0xc6   : > { %1717 = vmatprep.subr.bf16.mxu0 %v4129_v20  ;;  %1524 = vmatprep.subr.bf16.mxu1 %v4132_v21 }
  0xc9   : > { %1718 = vmatpush1.bf16.msra.mxu0 %v4127_v26  ;;  %1525 = vmatpush1.bf16.msra.mxu1 %v4130_v27 }
  0xca   : > { %1719 = vmatprep.subr.bf16.mxu0 %v4135_v28  ;;  %1526 = vmatprep.subr.bf16.mxu1 %v4138_v29 }
  0xcb   : > { %3454 = vmatmul.mubr.msk.bf16.gmra.mrb[20].mxu0 %vm420_vm1, %v319_v30  ;;  %3462 = vmatmul.mubr.msk.bf16.gmra.mrb[20].mxu1 %vm420_vm1, %v327_v31 }
  0xcc   : > { %568 = vmatprep.mubr.bf16.mxu0 %v4878_v0  ;;  %648 = vmatprep.mubr.bf16.mxu1 %v4878_v0 }
  0xcd   : > { %1720 = vmatpush1.bf16.msra.mxu0 %v4133_v32  ;;  %1527 = vmatpush1.bf16.msra.mxu1 %v4136_v33 }
  0xce   : > { %1721 = vmatprep.subr.bf16.mxu0 %v4141_v34  ;;  %1528 = vmatprep.subr.bf16.mxu1 %v4144_v35 }
  0xd1   : > { %1722 = vmatpush1.bf16.msra.mxu0 %v4139_v40  ;;  %1529 = vmatpush1.bf16.msra.mxu1 %v4142_v41  ;;  %v4171_v40 = vld [vmem:[#allocation7 + $0x10] ss:$28 sps:$4 sm:$0xff]  }
  0xd2   : > { %1723 = vmatprep.subr.bf16.mxu0 %v4147_v42  ;;  %1530 = vmatprep.subr.bf16.mxu1 %v4150_v43 }
  0xd3   : > { %3455 = vmatmul.mubr.msk.bf16.gmra.mrb[24].mxu0 %vm420_vm1, %v320_v44  ;;  %3463 = vmatmul.mubr.msk.bf16.gmra.mrb[24].mxu1 %vm420_vm1, %v328_v45  ;;  %v4176_v45 = vld [vmem:[#allocation7 + $0x4c] ss:$28 sps:$4 sm:$0xff]  }
  0xd4   : > { %578 = vmatprep.mubr.bf16.mxu0 %v4878_v0  ;;  %658 = vmatprep.mubr.bf16.mxu1 %v4878_v0  ;;  %v4165_v0 = vld [vmem:[#allocation7 + $0x354] ss:$28 sps:$4 sm:$0xff]  }
  0xd5   : > { %1724 = vmatpush1.bf16.msra.mxu0 %v4145_v46  ;;  %1531 = vmatpush1.bf16.msra.mxu1 %v4148_v47  ;;  %v4177_v46 = vld [vmem:[#allocation7 + $0x210] ss:$28 sps:$4 sm:$0xff]  }
  0xd6   : > { %1725 = vmatprep.subr.bf16.mxu0 %v4153_v48  ;;  %1532 = vmatprep.subr.bf16.mxu1 %v4156_v49 }
  0xd9   : > { %1726 = vmatpush1.bf16.msra.mxu0 %v4151_v54  ;;  %1533 = vmatpush1.bf16.msra.mxu1 %v4154_v55  ;;  %v4174_v55 = vld [vmem:[#allocation7 + $0x48] ss:$28 sps:$4 sm:$0xff]  }
  0xda   : > { %1727 = vmatprep.subr.bf16.mxu0 %v4159_v58  ;;  %1534 = vmatprep.subr.bf16.mxu1 %v4162_v59 }
  0xdb   : > { %3456 = vmatmul.mubr.msk.bf16.gmra.mrb[28].mxu0 %vm420_vm1, %v321_v56  ;;  %3464 = vmatmul.mubr.msk.bf16.gmra.mrb[28].mxu1 %vm420_vm1, %v329_v57 }
  0xdd   : > { %1728 = vmatpush1.bf16.msra.mxu0 %v4157_v60  ;;  %1535 = vmatpush1.bf16.msra.mxu1 %v4160_v61  ;;  %v4178_v60 = vld [vmem:[#allocation7 + $0x50] ss:$28 sps:$4 sm:$0xff]   ;;  %v4181_v61 = vld [vmem:[#allocation7 + $0x84] ss:$28 sps:$4 sm:$0xff]  }
  0xde   : > { %1729 = vmatprep.subr.bf16.mxu0 %v4165_v0  ;;  %1536 = vmatprep.subr.bf16.mxu1 %v4168_v62 }
  0xe1   : > { %1730 = vmatpush1.bf16.msra.mxu0 %v4163_v63  ;;  %1537 = vmatpush1.bf16.msra.mxu1 %v4166_v1 }
  0xe2   : > { %3838 = vmatprep.subr.bf16.mxu0 %v4169_v2  ;;  %1892 = vmatprep.subr.bf16.mxu1 %v4173_v3  ;;  %v4185_v2 = vld [vmem:[#allocation7 + $0x248] ss:$28 sps:$4 sm:$0xff]  }
 0x176   : > { %v510_v11 = vpop.f32.mrb[0].mxu0  ;;  %v590_v12 = vpop.f32.mrb[0].mxu1 }
 0x177   : > { %v511_v13 = vadd.f32 %v510_v11, %v5151_v9  ;;  %v512_v14 = vpop.f32.mrb[1].mxu0  ;;  %v591_v15 = vadd.f32 %v590_v12, %v5151_v9  ;;  %v592_v16 = vpop.f32.mrb[1].mxu1 }
 0x178   : > { %v513_v17 = vadd.f32 %v512_v14, %v5155_v10  ;;  %v514_v18 = vpop.f32.mrb[2].mxu0  ;;  %v593_v19 = vadd.f32 %v592_v16, %v5155_v10  ;;  %v594_v20 = vpop.f32.mrb[2].mxu1  ;;  %v4179_v16 = vld [vmem:[#allocation7 + $0x80] ss:$28 sps:$4 sm:$0xff]  }
 0x179   : > { %v515_v21 = vadd.f32 %v514_v18, %v5151_v9  ;;  %v516_v22 = vpop.f32.mrb[3].mxu0  ;;  %v701_v23 = vmax.f32 %v591_v15, 0.0  ;;  %v595_v24 = vadd.f32 %v594_v20, %v5151_v9  ;;  %v596_v25 = vpop.f32.mrb[3].mxu1  ;;  %v669_v29 = vmax.f32 %v511_v13, 0.0 }
 0x17a   : > { %v517_v26 = vadd.f32 %v516_v22, %v5155_v10  ;;  %v702_v27 = vmax.f32 %v593_v19, 0.0  ;;  %v597_v28 = vadd.f32 %v596_v25, %v5155_v10  ;;  %v670_v32 = vmax.f32 %v513_v17, 0.0  ;;  %v4186_v17 = vld [vmem:[#allocation7 + $0x88] ss:$28 sps:$4 sm:$0xff]   ;;  %v4184_v22 = vld [vmem:[#allocation7 + $0xbc] ss:$28 sps:$4 sm:$0xff]  }
 0x17b   : > { %v671_v30 = vmax.f32 %v515_v21, 0.0  ;;  %v703_v31 = vmax.f32 %v595_v24, 0.0 }
 0x17c   : > { %v672_v33 = vmax.f32 %v517_v26, 0.0  ;;  %v704_v34 = vmax.f32 %v597_v28, 0.0 }
 0x17d   : > { %v5165_v35 = vpack.c.bf16 %v671_v30, %v669_v29  ;;  %v5167_v36 = vpack.c.bf16 %v703_v31, %v701_v23  ;;  %v4193_v23 = vld [vmem:[#allocation7 + $0x280] ss:$28 sps:$4 sm:$0xff]  }
 0x17e   : > { %v5169_v37 = vpack.c.bf16 %v672_v33, %v670_v32  ;;  %v520_v38 = vpop.f32.mrb[4].mxu0  ;;  %v5171_v41 = vpack.c.bf16 %v704_v34, %v702_v27  ;;  %v600_v42 = vpop.f32.mrb[4].mxu1  ;;  %v4182_v32 = vld [vmem:[#allocation7 + $0xb8] ss:$28 sps:$4 sm:$0xff]  }
 0x17f   : > { %v521_v43 = vadd.f32 %v520_v38, %v5151_v9  ;;  %v522_v44 = vpop.f32.mrb[5].mxu0  ;;  %v601_v47 = vadd.f32 %v600_v42, %v5151_v9  ;;  %v602_v48 = vpop.f32.mrb[5].mxu1  ;;  %v4194_v42 = vld [vmem:[#allocation7 + $0xc0] ss:$28 sps:$4 sm:$0xff]  }
 0x180   : > { %v523_v49 = vadd.f32 %v522_v44, %v5155_v10  ;;  %v524_v50 = vpop.f32.mrb[6].mxu0  ;;  %1538 = vmatprep.mubr.bf16.mxu1 %v5169_v37  ;;  %1731 = vmatprep.mubr.bf16.mxu0 %v5169_v37  ;;  %v603_v51 = vadd.f32 %v602_v48, %v5155_v10  ;;  %v604_v52 = vpop.f32.mrb[6].mxu1 }
 0x181   : > { %v525_v53 = vadd.f32 %v524_v50, %v5151_v9  ;;  %v526_v54 = vpop.f32.mrb[7].mxu0  ;;  %1539 = vmatmul.mubr.bf16.vlgmr.msra.gmra.mrb[32].mxu1 %v5165_v35  ;;  %1732 = vmatmul.mubr.bf16.vlgmr.msra.gmra.mrb[32].mxu0 %v5165_v35  ;;  %v705_v56 = vmax.f32 %v601_v47, 0.0  ;;  %v605_v57 = vadd.f32 %v604_v52, %v5151_v9  ;;  %v606_v58 = vpop.f32.mrb[7].mxu1  ;;  %v673_v63 = vmax.f32 %v521_v43, 0.0  ;;  %v4201_v47 = vld [vmem:[#allocation7 + $0x2b8] ss:$28 sps:$4 sm:$0xff]  }
 0x182   : > { %v527_v59 = vadd.f32 %v526_v54, %v5155_v10  ;;  %3839 = vmatpush3.bf16.msra.mxu0 %v4170_v39  ;;  %1893 = vmatpush1.bf16.msra.mxu1 %v4171_v40  ;;  %v706_v0 = vmax.f32 %v603_v51, 0.0  ;;  %v607_v62 = vadd.f32 %v606_v58, %v5155_v10  ;;  %v674_v4 = vmax.f32 %v523_v49, 0.0  ;;  %v4189_v40 = vld [vmem:[#allocation7 + $0xf4] ss:$28 sps:$4 sm:$0xff]  }
 0x183   : > { %v675_v1 = vmax.f32 %v525_v53, 0.0  ;;  %1894 = vmatprep.subr.bf16.mxu1 %v4176_v45  ;;  %3840 = vmatprep.subr.bf16.mxu0 %v4177_v46  ;;  %v707_v3 = vmax.f32 %v605_v57, 0.0  ;;  %v4202_v57 = vld [vmem:[#allocation7 + $0xf8] ss:$28 sps:$4 sm:$0xff]  }
 0x184   : > { %v676_v7 = vmax.f32 %v527_v59, 0.0  ;;  %v708_v11 = vmax.f32 %v607_v62, 0.0 }
 0x185   : > { %v5185_v12 = vpack.c.bf16 %v675_v1, %v673_v63  ;;  %v5187_v13 = vpack.c.bf16 %v707_v3, %v705_v56  ;;  %v4187_v56 = vld [vmem:[#allocation7 + $0xf0] ss:$28 sps:$4 sm:$0xff]  }
 0x186   : > { %v5189_v14 = vpack.c.bf16 %v676_v7, %v674_v4  ;;  %v530_v15 = vpop.f32.mrb[8].mxu0  ;;  %1895 = vmatpush1.bf16.msra.mxu1 %v4174_v55  ;;  %3841 = vmatpush3.bf16.msra.mxu0 %v4178_v60  ;;  %v5191_v18 = vpack.c.bf16 %v708_v11, %v706_v0  ;;  %v610_v19 = vpop.f32.mrb[8].mxu1  ;;  %v4192_v0 = vld [vmem:[#allocation7 + $0x12c] ss:$28 sps:$4 sm:$0xff]  }
 0x187   : > { %v531_v20 = vadd.f32 %v530_v15, %v5151_v9  ;;  %v532_v21 = vpop.f32.mrb[9].mxu0  ;;  %1896 = vmatprep.subr.bf16.mxu1 %v4181_v61  ;;  %3842 = vmatprep.subr.bf16.mxu0 %v4185_v2  ;;  %v611_v24 = vadd.f32 %v610_v19, %v5151_v9  ;;  %v612_v25 = vpop.f32.mrb[9].mxu1  ;;  %v4209_v1 = vld [vmem:[#allocation7 + $0x2f0] ss:$28 sps:$4 sm:$0xff]  }
 0x188   : > { %v533_v26 = vadd.f32 %v532_v21, %v5155_v10  ;;  %v534_v27 = vpop.f32.mrb[10].mxu0  ;;  %1548 = vmatprep.mubr.bf16.mxu1 %v5189_v14  ;;  %1741 = vmatprep.mubr.bf16.mxu0 %v5189_v14  ;;  %v613_v28 = vadd.f32 %v612_v25, %v5155_v10  ;;  %v614_v29 = vpop.f32.mrb[10].mxu1  ;;  %v4210_v25 = vld [vmem:[#allocation7 + $0x130] ss:$28 sps:$4 sm:$0xff]  }
 0x189   : > { %v535_v30 = vadd.f32 %v534_v27, %v5151_v9  ;;  %v536_v31 = vpop.f32.mrb[11].mxu0  ;;  %1549 = vmatmul.mubr.bf16.gmra.mrb[36].mxu1 %v5185_v12  ;;  %1742 = vmatmul.mubr.bf16.gmra.mrb[36].mxu0 %v5185_v12  ;;  %v709_v33 = vmax.f32 %v611_v24, 0.0  ;;  %v615_v34 = vadd.f32 %v614_v29, %v5151_v9  ;;  %v616_v38 = vpop.f32.mrb[11].mxu1  ;;  %v677_v45 = vmax.f32 %v531_v20, 0.0  ;;  %v4217_v29 = vld [vmem:[#allocation7 + $0x328] ss:$28 sps:$4 sm:$0xff]  }
 0x18a   : > { %v537_v39 = vadd.f32 %v536_v31, %v5155_v10  ;;  %1897 = vmatpush1.bf16.msra.mxu1 %v4179_v16  ;;  %3843 = vmatpush3.bf16.msra.mxu0 %v4186_v17  ;;  %v710_v43 = vmax.f32 %v613_v28, 0.0  ;;  %v617_v44 = vadd.f32 %v616_v38, %v5155_v10  ;;  %v678_v49 = vmax.f32 %v533_v26, 0.0  ;;  %v4190_v16 = vld [vmem:[#allocation7 + $0x128] ss:$28 sps:$4 sm:$0xff]  }
 0x18b   : > { %v679_v46 = vmax.f32 %v535_v30, 0.0  ;;  %1898 = vmatprep.subr.bf16.mxu1 %v4184_v22  ;;  %3844 = vmatprep.subr.bf16.mxu0 %v4193_v23  ;;  %v711_v48 = vmax.f32 %v615_v34, 0.0  ;;  %v4197_v22 = vld [vmem:[#allocation7 + $0x164] ss:$28 sps:$4 sm:$0xff]  }
 0x18c   : > { %v680_v50 = vmax.f32 %v537_v39, 0.0  ;;  %v712_v51 = vmax.f32 %v617_v44, 0.0  ;;  %v4218_v44 = vld [vmem:[#allocation7 + $0x168] ss:$28 sps:$4 sm:$0xff]  }
 0x18d   : > { %v5205_v52 = vpack.c.bf16 %v679_v46, %v677_v45  ;;  %v5207_v53 = vpack.c.bf16 %v711_v48, %v709_v33 }
 0x18e   : > { %v5209_v54 = vpack.c.bf16 %v680_v50, %v678_v49  ;;  %v540_v55 = vpop.f32.mrb[12].mxu0  ;;  %1899 = vmatpush1.bf16.msra.mxu1 %v4182_v32  ;;  %3845 = vmatpush3.bf16.msra.mxu0 %v4194_v42  ;;  %v5211_v58 = vpack.c.bf16 %v712_v51, %v710_v43  ;;  %v620_v59 = vpop.f32.mrb[12].mxu1  ;;  %v4225_v50 = vld [vmem:[#allocation7 + $0x360] ss:$28 sps:$4 sm:$0xff]  }
 0x18f   : > { %v541_v60 = vadd.f32 %v540_v55, %v5151_v9  ;;  %v542_v61 = vpop.f32.mrb[13].mxu0  ;;  %1900 = vmatprep.subr.bf16.mxu1 %v4189_v40  ;;  %3846 = vmatprep.subr.bf16.mxu0 %v4201_v47  ;;  %v621_v62 = vadd.f32 %v620_v59, %v5151_v9  ;;  %v622_v63 = vpop.f32.mrb[13].mxu1  ;;  %v4195_v40 = vld [vmem:[#allocation7 + $0x160] ss:$28 sps:$4 sm:$0xff]  }
 0x190   : > { %v543_v2 = vadd.f32 %v542_v61, %v5155_v10  ;;  %v544_v3 = vpop.f32.mrb[14].mxu0  ;;  %1558 = vmatprep.mubr.bf16.mxu1 %v5209_v54  ;;  %1751 = vmatprep.mubr.bf16.mxu0 %v5209_v54  ;;  %v623_v4 = vadd.f32 %v622_v63, %v5155_v10  ;;  %v624_v7 = vpop.f32.mrb[14].mxu1  ;;  %v4200_v47 = vld [vmem:[#allocation7 + $0x19c] ss:$28 sps:$4 sm:$0xff]  }
 0x191   : > { %v545_v11 = vadd.f32 %v544_v3, %v5151_v9  ;;  %v546_v15 = vpop.f32.mrb[15].mxu0  ;;  %1559 = vmatmul.mubr.bf16.gmra.mrb[40].mxu1 %v5205_v52  ;;  %1752 = vmatmul.mubr.bf16.gmra.mrb[40].mxu0 %v5205_v52  ;;  %v713_v17 = vmax.f32 %v621_v62, 0.0  ;;  %v625_v19 = vadd.f32 %v624_v7, %v5151_v9  ;;  %v626_v20 = vpop.f32.mrb[15].mxu1  ;;  %v681_v26 = vmax.f32 %v541_v60, 0.0 }
 0x192   : > { %v547_v21 = vadd.f32 %v546_v15, %v5155_v10  ;;  %1901 = vmatpush1.bf16.msra.mxu1 %v4187_v56  ;;  %3847 = vmatpush3.bf16.msra.mxu0 %v4202_v57  ;;  %v714_v23 = vmax.f32 %v623_v4, 0.0  ;;  %v627_v24 = vadd.f32 %v626_v20, %v5155_v10  ;;  %v682_v30 = vmax.f32 %v543_v2, 0.0  ;;  %v4226_v4 = vld [vmem:[#allocation7 + $0x1a0] ss:$28 sps:$4 sm:$0xff]   ;;  %v4205_v15 = vld [vmem:[#allocation7 + $0x1d4] ss:$28 sps:$4 sm:$0xff]  }
 0x193   : > { %v683_v27 = vmax.f32 %v545_v11, 0.0  ;;  %1902 = vmatprep.subr.bf16.mxu1 %v4192_v0  ;;  %v715_v28 = vmax.f32 %v625_v19, 0.0  ;;  %3848 = vmatprep.subr.bf16.mxu0 %v4209_v1  ;;  %v4198_v1 = vld [vmem:[#allocation7 + $0x198] ss:$28 sps:$4 sm:$0xff]  }
 0x194   : > { %v684_v31 = vmax.f32 %v547_v21, 0.0  ;;  %v716_v32 = vmax.f32 %v627_v24, 0.0 }
 0x195   : > { %v5225_v33 = vpack.c.bf16 %v683_v27, %v681_v26  ;;  %v5227_v34 = vpack.c.bf16 %v715_v28, %v713_v17 }
 0x196   : > { %v5229_v38 = vpack.c.bf16 %v684_v31, %v682_v30  ;;  %v550_v39 = vpop.f32.mrb[16].mxu0  ;;  %1903 = vmatpush1.bf16.msra.mxu1 %v4190_v16  ;;  %v5231_v42 = vpack.c.bf16 %v716_v32, %v714_v23  ;;  %3849 = vmatpush3.bf16.msra.mxu0 %v4210_v25  ;;  %v630_v43 = vpop.f32.mrb[16].mxu1  ;;  %v4203_v25 = vld [vmem:[#allocation7 + $0x1d0] ss:$28 sps:$4 sm:$0xff]  }
 0x197   : > { %v551_v45 = vadd.f32 %v550_v39, %v5151_v9  ;;  %v552_v46 = vpop.f32.mrb[17].mxu0  ;;  %1904 = vmatprep.subr.bf16.mxu1 %v4197_v22  ;;  %v631_v48 = vadd.f32 %v630_v43, %v5151_v9  ;;  %v632_v49 = vpop.f32.mrb[17].mxu1  ;;  %3850 = vmatprep.subr.bf16.mxu0 %v4217_v29  ;;  %v4208_v30 = vld [vmem:[#allocation7 + $0x20c] ss:$28 sps:$4 sm:$0xff]  }
 0x198   : > { %v553_v51 = vadd.f32 %v552_v46, %v5155_v10  ;;  %v554_v55 = vpop.f32.mrb[18].mxu0  ;;  %1568 = vmatprep.mubr.bf16.mxu1 %v5229_v38  ;;  %1761 = vmatprep.mubr.bf16.mxu0 %v5229_v38  ;;  %v633_v56 = vadd.f32 %v632_v49, %v5155_v10  ;;  %v634_v57 = vpop.f32.mrb[18].mxu1 }
 0x199   : > { %v555_v59 = vadd.f32 %v554_v55, %v5151_v9  ;;  %v556_v60 = vpop.f32.mrb[19].mxu0  ;;  %1569 = vmatmul.mubr.bf16.gmra.mrb[44].mxu1 %v5225_v33  ;;  %1762 = vmatmul.mubr.bf16.gmra.mrb[44].mxu0 %v5225_v33  ;;  %v717_v61 = vmax.f32 %v631_v48, 0.0  ;;  %v635_v0 = vadd.f32 %v634_v57, %v5151_v9  ;;  %v636_v62 = vpop.f32.mrb[19].mxu1  ;;  %v685_v7 = vmax.f32 %v551_v45, 0.0 }
 0x19a   : > { %v557_v63 = vadd.f32 %v556_v60, %v5155_v10  ;;  %1905 = vmatpush1.bf16.msra.mxu1 %v4195_v40  ;;  %v718_v2 = vmax.f32 %v633_v56, 0.0  ;;  %v637_v3 = vadd.f32 %v636_v62, %v5155_v10  ;;  %3851 = vmatpush3.bf16.msra.mxu0 %v4218_v44  ;;  %v686_v17 = vmax.f32 %v553_v51, 0.0  ;;  %v4206_v51 = vld [vmem:[#allocation7 + $0x208] ss:$28 sps:$4 sm:$0xff]  }
 0x19b   : > { %v687_v11 = vmax.f32 %v555_v59, 0.0  ;;  %1906 = vmatprep.subr.bf16.mxu1 %v4200_v47  ;;  %v719_v16 = vmax.f32 %v635_v0, 0.0  ;;  %3852 = vmatprep.subr.bf16.mxu0 %v4225_v50  ;;  %v4213_v60 = vld [vmem:[#allocation7 + $0x244] ss:$28 sps:$4 sm:$0xff]  }
 0x19c   : > { %v688_v19 = vmax.f32 %v557_v63, 0.0  ;;  %v720_v20 = vmax.f32 %v637_v3, 0.0 }
 0x19d   : > { %v5245_v21 = vpack.c.bf16 %v687_v11, %v685_v7  ;;  %v5247_v22 = vpack.c.bf16 %v719_v16, %v717_v61  ;;  %v4211_v7 = vld [vmem:[#allocation7 + $0x240] ss:$28 sps:$4 sm:$0xff]  }
 0x19e   : > { %v5249_v23 = vpack.c.bf16 %v688_v19, %v686_v17  ;;  %v560_v24 = vpop.f32.mrb[20].mxu0  ;;  %1907 = vmatpush1.bf16.msra.mxu1 %v4198_v1  ;;  %v5251_v26 = vpack.c.bf16 %v720_v20, %v718_v2  ;;  %v640_v27 = vpop.f32.mrb[20].mxu1  ;;  %3853 = vmatpush3.bf16.msra.mxu0 %v4226_v4  ;;  %v4216_v19 = vld [vmem:[#allocation7 + $0x27c] ss:$28 sps:$4 sm:$0xff]  }
 0x19f   : > { %v561_v28 = vadd.f32 %v560_v24, %v5151_v9  ;;  %v562_v29 = vpop.f32.mrb[21].mxu0  ;;  %1908 = vmatprep.subr.bf16.mxu1 %v4205_v15  ;;  %v641_v31 = vadd.f32 %v640_v27, %v5151_v9  ;;  %v642_v32 = vpop.f32.mrb[21].mxu1 }
 0x1a0   : > { %v563_v39 = vadd.f32 %v562_v29, %v5155_v10  ;;  %v564_v40 = vpop.f32.mrb[22].mxu0  ;;  %1578 = vmatprep.mubr.bf16.mxu1 %v5249_v23  ;;  %1771 = vmatprep.mubr.bf16.mxu0 %v5249_v23  ;;  %v643_v43 = vadd.f32 %v642_v32, %v5155_v10  ;;  %v644_v44 = vpop.f32.mrb[22].mxu1 }
 0x1a1   : > { %v565_v45 = vadd.f32 %v564_v40, %v5151_v9  ;;  %v566_v46 = vpop.f32.mrb[23].mxu0  ;;  %1579 = vmatmul.mubr.bf16.gmra.mrb[48].mxu1 %v5245_v21  ;;  %1772 = vmatmul.mubr.bf16.gmra.mrb[48].mxu0 %v5245_v21  ;;  %v721_v47 = vmax.f32 %v641_v31, 0.0  ;;  %v645_v48 = vadd.f32 %v644_v44, %v5151_v9  ;;  %v646_v49 = vpop.f32.mrb[23].mxu1  ;;  %v689_v57 = vmax.f32 %v561_v28, 0.0  ;;  %v4214_v44 = vld [vmem:[#allocation7 + $0x278] ss:$28 sps:$4 sm:$0xff]  }
 0x1a2   : > { %v567_v50 = vadd.f32 %v566_v46, %v5155_v10  ;;  %1909 = vmatpush1.bf16.msra.mxu1 %v4203_v25  ;;  %v722_v55 = vmax.f32 %v643_v43, 0.0  ;;  %v647_v56 = vadd.f32 %v646_v49, %v5155_v10  ;;  %v690_v0 = vmax.f32 %v563_v39, 0.0  ;;  %v4221_v49 = vld [vmem:[#allocation7 + $0x2b4] ss:$28 sps:$4 sm:$0xff]  }
 0x1a3   : > { %v691_v59 = vmax.f32 %v565_v45, 0.0  ;;  %1910 = vmatprep.subr.bf16.mxu1 %v4208_v30  ;;  %v723_v61 = vmax.f32 %v645_v48, 0.0 }
 0x1a4   : > { %v692_v62 = vmax.f32 %v567_v50, 0.0  ;;  %v724_v63 = vmax.f32 %v647_v56, 0.0 }
 0x1a5   : > { %v5265_v1 = vpack.c.bf16 %v691_v59, %v689_v57  ;;  %v5267_v2 = vpack.c.bf16 %v723_v61, %v721_v47 }
 0x1a6   : > { %v5269_v3 = vpack.c.bf16 %v692_v62, %v690_v0  ;;  %v570_v4 = vpop.f32.mrb[24].mxu0  ;;  %1911 = vmatpush1.bf16.msra.mxu1 %v4206_v51  ;;  %v5271_v11 = vpack.c.bf16 %v724_v63, %v722_v55  ;;  %v650_v15 = vpop.f32.mrb[24].mxu1  ;;  %v4219_v0 = vld [vmem:[#allocation7 + $0x2b0] ss:$28 sps:$4 sm:$0xff]  }
 0x1a7   : > { %v571_v16 = vadd.f32 %v570_v4, %v5151_v9  ;;  %v572_v17 = vpop.f32.mrb[25].mxu0  ;;  %1912 = vmatprep.subr.bf16.mxu1 %v4213_v60  ;;  %v651_v20 = vadd.f32 %v650_v15, %v5151_v9  ;;  %v652_v24 = vpop.f32.mrb[25].mxu1  ;;  %v4224_v15 = vld [vmem:[#allocation7 + $0x2ec] ss:$28 sps:$4 sm:$0xff]  }
 0x1a8   : > { %v573_v25 = vadd.f32 %v572_v17, %v5155_v10  ;;  %v574_v27 = vpop.f32.mrb[26].mxu0  ;;  %1588 = vmatprep.mubr.bf16.mxu1 %v5269_v3  ;;  %1781 = vmatprep.mubr.bf16.mxu0 %v5269_v3  ;;  %v653_v28 = vadd.f32 %v652_v24, %v5155_v10  ;;  %v654_v29 = vpop.f32.mrb[26].mxu1 }
 0x1a9   : > { %v575_v30 = vadd.f32 %v574_v27, %v5151_v9  ;;  %v576_v31 = vpop.f32.mrb[27].mxu0  ;;  %1589 = vmatmul.mubr.bf16.gmra.mrb[52].mxu1 %v5265_v1  ;;  %1782 = vmatmul.mubr.bf16.gmra.mrb[52].mxu0 %v5265_v1  ;;  %v725_v32 = vmax.f32 %v651_v20, 0.0  ;;  %v655_v39 = vadd.f32 %v654_v29, %v5151_v9  ;;  %v656_v40 = vpop.f32.mrb[27].mxu1  ;;  %v693_v47 = vmax.f32 %v571_v16, 0.0 }
 0x1aa   : > { %v577_v43 = vadd.f32 %v576_v31, %v5155_v10  ;;  %1913 = vmatpush1.bf16.msra.mxu1 %v4211_v7  ;;  %v726_v45 = vmax.f32 %v653_v28, 0.0  ;;  %v657_v46 = vadd.f32 %v656_v40, %v5155_v10  ;;  %v694_v51 = vmax.f32 %v573_v25, 0.0 }
 0x1ab   : > { %v695_v48 = vmax.f32 %v575_v30, 0.0  ;;  %1914 = vmatprep.subr.bf16.mxu1 %v4216_v19  ;;  %v727_v50 = vmax.f32 %v655_v39, 0.0  ;;  %v4222_v39 = vld [vmem:[#allocation7 + $0x2e8] ss:$28 sps:$4 sm:$0xff]  }
 0x1ac   : > { %v696_v55 = vmax.f32 %v577_v43, 0.0  ;;  %v728_v56 = vmax.f32 %v657_v46, 0.0 }
 0x1ad   : > { %v5285_v57 = vpack.c.bf16 %v695_v48, %v693_v47  ;;  %v5287_v59 = vpack.c.bf16 %v727_v50, %v725_v32  ;;  %v4229_v47 = vld [vmem:[#allocation7 + $0x324] ss:$28 sps:$4 sm:$0xff]  }
 0x1ae   : > { %v5289_v60 = vpack.c.bf16 %v696_v55, %v694_v51  ;;  %v580_v61 = vpop.f32.mrb[28].mxu0  ;;  %1915 = vmatpush1.bf16.msra.mxu1 %v4214_v44  ;;  %v5291_v62 = vpack.c.bf16 %v728_v56, %v726_v45  ;;  %v660_v63 = vpop.f32.mrb[28].mxu1 }
 0x1af   : > { %v581_v4 = vadd.f32 %v580_v61, %v5151_v9  ;;  %v582_v7 = vpop.f32.mrb[29].mxu0  ;;  %1916 = vmatprep.subr.bf16.mxu1 %v4221_v49  ;;  %v661_v16 = vadd.f32 %v660_v63, %v5151_v9  ;;  %v662_v17 = vpop.f32.mrb[29].mxu1  ;;  %v4227_v61 = vld [vmem:[#allocation7 + $0x320] ss:$28 sps:$4 sm:$0xff]  }
 0x1b0   : > { %v583_v19 = vadd.f32 %v582_v7, %v5155_v10  ;;  %v584_v20 = vpop.f32.mrb[30].mxu0  ;;  %1598 = vmatprep.mubr.bf16.mxu1 %v5289_v60  ;;  %1791 = vmatprep.mubr.bf16.mxu0 %v5289_v60  ;;  %v663_v24 = vadd.f32 %v662_v17, %v5155_v10  ;;  %v664_v25 = vpop.f32.mrb[30].mxu1 }
 0x1b1   : > { %v585_v27 = vadd.f32 %v584_v20, %v5151_v9  ;;  %v586_v28 = vpop.f32.mrb[31].mxu0  ;;  %1599 = vmatmul.mubr.bf16.gmra.mrb[56].mxu1 %v5285_v57  ;;  %1792 = vmatmul.mubr.bf16.gmra.mrb[56].mxu0 %v5285_v57  ;;  %v729_v29 = vmax.f32 %v661_v16, 0.0  ;;  %v665_v30 = vadd.f32 %v664_v25, %v5151_v9  ;;  %v666_v31 = vpop.f32.mrb[31].mxu1  ;;  %v697_v44 = vmax.f32 %v581_v4, 0.0 }
 0x1b2   : > { %v587_v32 = vadd.f32 %v586_v28, %v5155_v10  ;;  %1917 = vmatpush1.bf16.msra.mxu1 %v4219_v0  ;;  %v730_v40 = vmax.f32 %v663_v24, 0.0  ;;  %v667_v43 = vadd.f32 %v666_v31, %v5155_v10  ;;  %v698_v48 = vmax.f32 %v583_v19, 0.0  ;;  %v4232_v10 = vld [vmem:[#allocation7 + $0x35c] ss:$28 sps:$4 sm:$0xff]  }
 0x1b3   : > { %v699_v45 = vmax.f32 %v585_v27, 0.0  ;;  %1918 = vmatprep.subr.bf16.mxu1 %v4224_v15  ;;  %v731_v46 = vmax.f32 %v665_v30, 0.0  ;;  %v4230_v0 = vld [vmem:[#allocation7 + $0x358] ss:$28 sps:$4 sm:$0xff]  }
 0x1b4   : > { %v700_v49 = vmax.f32 %v587_v32, 0.0  ;;  %v732_v50 = vmax.f32 %v667_v43, 0.0 }
 0x1b5   : > { %v5305_v51 = vpack.c.bf16 %v699_v45, %v697_v44  ;;  %v5307_v55 = vpack.c.bf16 %v731_v46, %v729_v29 }
 0x1b6   : > { %v5309_v9 = vpack.c.bf16 %v700_v49, %v698_v48  ;;  %1919 = vmatpush1.bf16.msra.mxu1 %v4222_v39  ;;  %v5311_v56 = vpack.c.bf16 %v732_v50, %v730_v40 }
 0x1b7   : > { %1920 = vmatprep.subr.bf16.mxu1 %v4229_v47 }
 0x1b8   : > { %1608 = vmatprep.mubr.bf16.mxu1 %v5309_v9  ;;  %1801 = vmatprep.mubr.bf16.mxu0 %v5309_v9 }
 0x1b9   : > { %1609 = vmatmul.mubr.bf16.gmra.mrb[60].mxu1 %v5305_v51  ;;  %1802 = vmatmul.mubr.bf16.gmra.mrb[60].mxu0 %v5305_v51 }
 0x1ba   : > { %1618 = vmatprep.mubr.bf16.mxu1 %v5171_v41  ;;  %1811 = vmatprep.mubr.bf16.mxu0 %v5171_v41 }
 0x1bb   : > { %1921 = vmatpush1.bf16.msra.mxu1 %v4227_v61 }
 0x1bc   : > { %1922 = vmatprep.subr.bf16.mxu1 %v4232_v10 }
 0x1bf   : > { %1923 = vmatpush1.bf16.msra.mxu1 %v4230_v0 }
 0x1c1   : > { %1619 = vmatmul.mubr.bf16.gmra.mrb[64].mxu1 %v5167_v36  ;;  %1812 = vmatmul.mubr.bf16.gmra.mrb[64].mxu0 %v5167_v36 }
 0x1c2   : > { %1628 = vmatprep.mubr.bf16.mxu1 %v5191_v18  ;;  %1821 = vmatprep.mubr.bf16.mxu0 %v5191_v18 }
 0x1c9   : > { %1629 = vmatmul.mubr.bf16.gmra.mrb[68].mxu1 %v5187_v13  ;;  %1822 = vmatmul.mubr.bf16.gmra.mrb[68].mxu0 %v5187_v13 }
 0x1ca   : > { %1638 = vmatprep.mubr.bf16.mxu1 %v5211_v58  ;;  %1831 = vmatprep.mubr.bf16.mxu0 %v5211_v58 }
 0x1d1   : > { %1639 = vmatmul.mubr.bf16.gmra.mrb[72].mxu1 %v5207_v53  ;;  %1832 = vmatmul.mubr.bf16.gmra.mrb[72].mxu0 %v5207_v53 }
 0x1d2   : > { %1648 = vmatprep.mubr.bf16.mxu1 %v5231_v42  ;;  %1841 = vmatprep.mubr.bf16.mxu0 %v5231_v42 }
 0x1d9   : > { %1649 = vmatmul.mubr.bf16.gmra.mrb[76].mxu1 %v5227_v34  ;;  %1842 = vmatmul.mubr.bf16.gmra.mrb[76].mxu0 %v5227_v34 }
 0x1da   : > { %1658 = vmatprep.mubr.bf16.mxu1 %v5251_v26  ;;  %1851 = vmatprep.mubr.bf16.mxu0 %v5251_v26 }
 0x1e1   : > { %1659 = vmatmul.mubr.bf16.gmra.mrb[80].mxu1 %v5247_v22  ;;  %1852 = vmatmul.mubr.bf16.gmra.mrb[80].mxu0 %v5247_v22 }
 0x1e2   : > { %1668 = vmatprep.mubr.bf16.mxu1 %v5271_v11  ;;  %1861 = vmatprep.mubr.bf16.mxu0 %v5271_v11 }
 0x1e9   : > { %1669 = vmatmul.mubr.bf16.gmra.mrb[84].mxu1 %v5267_v2  ;;  %1862 = vmatmul.mubr.bf16.gmra.mrb[84].mxu0 %v5267_v2 }
 0x1ea   : > { %1678 = vmatprep.mubr.bf16.mxu1 %v5291_v62  ;;  %1871 = vmatprep.mubr.bf16.mxu0 %v5291_v62 }
 0x1f1   : > { %1679 = vmatmul.mubr.bf16.gmra.mrb[88].mxu1 %v5287_v59  ;;  %1872 = vmatmul.mubr.bf16.gmra.mrb[88].mxu0 %v5287_v59 }
 0x1f2   : > { %1688 = vmatprep.mubr.bf16.mxu1 %v5311_v56  ;;  %1881 = vmatprep.mubr.bf16.mxu0 %v5311_v56 }
 0x1f9   : > { %1689 = vmatmul.mubr.bf16.gmra.mrb[92].mxu1 %v5307_v55  ;;  %1882 = vmatmul.mubr.bf16.gmra.mrb[92].mxu0 %v5307_v55 }
 0x1fa   : > { %1924 = vmatprep.mubr.bf16.mxu1 %v5169_v37  ;;  %2117 = vmatprep.mubr.bf16.mxu0 %v5169_v37  ;;  %v909_v37 = vsub.s32 3, %v5145_v5 }
 0x201   : > { %1925 = vmatmul.mubr.bf16.vlgmr.msra.gmra.mrb[96].mxu1 %v5165_v35  ;;  %2118 = vmatmul.mubr.bf16.vlgmr.msra.gmra.mrb[96].mxu0 %v5165_v35  ;;  %v905_v35 = vsub.s32 2, %v5145_v5 }
 0x202   : > { %1934 = vmatprep.mubr.bf16.mxu1 %v5189_v14  ;;  %2125 = vmatprep.mubr.bf16.mxu0 %v5189_v14 }
 0x209   : > { %1935 = vmatmul.mubr.bf16.gmra.mrb[100].mxu1 %v5185_v12  ;;  %2126 = vmatmul.mubr.bf16.gmra.mrb[100].mxu0 %v5185_v12 }
 0x20a   : > { %1944 = vmatprep.mubr.bf16.mxu1 %v5209_v54  ;;  %2133 = vmatprep.mubr.bf16.mxu0 %v5209_v54 }
 0x211   : > { %1945 = vmatmul.mubr.bf16.gmra.mrb[104].mxu1 %v5205_v52  ;;  %2134 = vmatmul.mubr.bf16.gmra.mrb[104].mxu0 %v5205_v52 }
 0x212   : > { %1954 = vmatprep.mubr.bf16.mxu1 %v5229_v38  ;;  %2141 = vmatprep.mubr.bf16.mxu0 %v5229_v38 }
 0x219   : > { %1955 = vmatmul.mubr.bf16.gmra.mrb[108].mxu1 %v5225_v33  ;;  %2142 = vmatmul.mubr.bf16.gmra.mrb[108].mxu0 %v5225_v33 }
 0x21a   : > { %1964 = vmatprep.mubr.bf16.mxu1 %v5249_v23  ;;  %2149 = vmatprep.mubr.bf16.mxu0 %v5249_v23 }
 0x221   : > { %1965 = vmatmul.mubr.bf16.gmra.mrb[112].mxu1 %v5245_v21  ;;  %2150 = vmatmul.mubr.bf16.gmra.mrb[112].mxu0 %v5245_v21 }
 0x222   : > { %1974 = vmatprep.mubr.bf16.mxu1 %v5269_v3  ;;  %2157 = vmatprep.mubr.bf16.mxu0 %v5269_v3 }
 0x229   : > { %1975 = vmatmul.mubr.bf16.gmra.mrb[116].mxu1 %v5265_v1  ;;  %2158 = vmatmul.mubr.bf16.gmra.mrb[116].mxu0 %v5265_v1 }
 0x22a   : > { %1984 = vmatprep.mubr.bf16.mxu1 %v5289_v60  ;;  %2165 = vmatprep.mubr.bf16.mxu0 %v5289_v60 }
 0x231   : > { %1985 = vmatmul.mubr.bf16.gmra.mrb[120].mxu1 %v5285_v57  ;;  %2166 = vmatmul.mubr.bf16.gmra.mrb[120].mxu0 %v5285_v57 }
 0x232   : > { %1994 = vmatprep.mubr.bf16.mxu1 %v5309_v9  ;;  %2173 = vmatprep.mubr.bf16.mxu0 %v5309_v9 }
 0x239   : > { %1995 = vmatmul.mubr.bf16.gmra.mrb[124].mxu1 %v5305_v51  ;;  %2174 = vmatmul.mubr.bf16.gmra.mrb[124].mxu0 %v5305_v51 }
 0x23a   : > { %2004 = vmatprep.mubr.bf16.mxu1 %v5171_v41  ;;  %2181 = vmatprep.mubr.bf16.mxu0 %v5171_v41  ;;  %v893_v41 = vld [vmem:[#allocation8] sm:$0xff] }
 0x23b   : > { %v5399_v12 = vrot.slane %v893_v41, %v905_v35  ;;  %v5407_v14 = vrot.slane %v893_v41, %v909_v37 }
 0x241   : > { %2005 = vmatmul.mubr.bf16.gmra.mrb[128].mxu1 %v5167_v36  ;;  %2182 = vmatmul.mubr.bf16.gmra.mrb[128].mxu0 %v5167_v36  ;;  %v5397_v36 = vrot.slane %v893_v41, %v347_v6 }
 0x242   : > { %2014 = vmatprep.mubr.bf16.mxu1 %v5191_v18  ;;  %2189 = vmatprep.mubr.bf16.mxu0 %v5191_v18 }
 0x249   : > { %2015 = vmatmul.mubr.bf16.gmra.mrb[132].mxu1 %v5187_v13  ;;  %2190 = vmatmul.mubr.bf16.gmra.mrb[132].mxu0 %v5187_v13  ;;  %v5405_v13 = vrot.slane %v893_v41, %v351_v8 }
 0x24a   : > { %2024 = vmatprep.mubr.bf16.mxu1 %v5211_v58  ;;  %2197 = vmatprep.mubr.bf16.mxu0 %v5211_v58 }
 0x251   : > { %2025 = vmatmul.mubr.bf16.gmra.mrb[136].mxu1 %v5207_v53  ;;  %2198 = vmatmul.mubr.bf16.gmra.mrb[136].mxu0 %v5207_v53 }
 0x252   : > { %2034 = vmatprep.mubr.bf16.mxu1 %v5231_v42  ;;  %2205 = vmatprep.mubr.bf16.mxu0 %v5231_v42 }
 0x254   : > { %v1540_v18 = vpop.f32.mrb[32].mxu1  ;;  %v1733_v52 = vpop.f32.mrb[32].mxu0 }
 0x255   : > { %v1541_v53 = vadd.f32 %v1540_v18, %v5397_v36  ;;  %v1734_v54 = vadd.f32 %v1733_v52, %v5399_v12  ;;  %v1542_v6 = vpop.f32.mrb[33].mxu1  ;;  %v1735_v58 = vpop.f32.mrb[33].mxu0 }
 0x256   : > { %v1543_v33 = vadd.f32 %v1542_v6, %v5405_v13  ;;  %v1736_v38 = vadd.f32 %v1735_v58, %v5407_v14  ;;  %v1544_v21 = vpop.f32.mrb[34].mxu1  ;;  %v1737_v42 = vpop.f32.mrb[34].mxu0 }
 0x257   : > { %4233 = vtanh.f32 %v1541_v53  ;;  %v1545_v8 = vadd.f32 %v1544_v21, %v5397_v36  ;;  %v1546_v23 = vpop.f32.mrb[35].mxu1  ;;  %v1739_v1 = vpop.f32.mrb[35].mxu0  ;;  %v1738_v3 = vadd.f32 %v1737_v42, %v5399_v12 }
 0x258   : > { %4235 = vtanh.f32 %v1734_v54  ;;  %v1547_v57 = vadd.f32 %v1546_v23, %v5405_v13  ;;  %v1740_v60 = vadd.f32 %v1739_v1, %v5407_v14 }
 0x259   : > { %4237 = vtanh.f32 %v1543_v33  ;;  %2035 = vmatmul.mubr.bf16.gmra.mrb[140].mxu1 %v5227_v34  ;;  %2206 = vmatmul.mubr.bf16.gmra.mrb[140].mxu0 %v5227_v34 }
 0x25a   : > { %4239 = vtanh.f32 %v1736_v38  ;;  %2044 = vmatprep.mubr.bf16.mxu1 %v5251_v26  ;;  %2213 = vmatprep.mubr.bf16.mxu0 %v5251_v26 }
 0x25b   : > { %4241 = vtanh.f32 %v1545_v8 }
 0x25c   : > { %4243 = vtanh.f32 %v1738_v3  ;;  %v1550_v63 = vpop.f32.mrb[36].mxu1  ;;  %v1743_v4 = vpop.f32.mrb[36].mxu0 }
 0x25d   : > { %4245 = vtanh.f32 %v1547_v57  ;;  %v1551_v7 = vadd.f32 %v1550_v63, %v5397_v36  ;;  %v1744_v15 = vadd.f32 %v1743_v4, %v5399_v12  ;;  %v1552_v16 = vpop.f32.mrb[37].mxu1  ;;  %v1745_v34 = vpop.f32.mrb[37].mxu0 }
 0x25e   : > { %4247 = vtanh.f32 %v1740_v60  ;;  %v1553_v17 = vadd.f32 %v1552_v16, %v5405_v13  ;;  %v1746_v19 = vadd.f32 %v1745_v34, %v5407_v14  ;;  %v1554_v20 = vpop.f32.mrb[38].mxu1  ;;  %v1747_v26 = vpop.f32.mrb[38].mxu0 }
 0x25f   : > { %4249 = vtanh.f32 %v1551_v7  ;;  %v1555_v24 = vadd.f32 %v1554_v20, %v5397_v36  ;;  %v1556_v25 = vpop.f32.mrb[39].mxu1  ;;  %v1749_v27 = vpop.f32.mrb[39].mxu0  ;;  %v1748_v28 = vadd.f32 %v1747_v26, %v5399_v12 }
 0x260   : > { %4251 = vtanh.f32 %v1744_v15  ;;  %v1557_v30 = vadd.f32 %v1556_v25, %v5405_v13  ;;  %v1750_v32 = vadd.f32 %v1749_v27, %v5407_v14 }
 0x261   : > { %v4234_v29 = vpop.eup %4233  ;;  %4253 = vtanh.f32 %v1553_v17  ;;  %2045 = vmatmul.mubr.bf16.gmra.mrb[144].mxu1 %v5247_v22  ;;  %2214 = vmatmul.mubr.bf16.gmra.mrb[144].mxu0 %v5247_v22 }
 0x262   : > { %v4236_v31 = vpop.eup %4235  ;;  %4255 = vtanh.f32 %v1746_v19  ;;  %2054 = vmatprep.mubr.bf16.mxu1 %v5271_v11  ;;  %2221 = vmatprep.mubr.bf16.mxu0 %v5271_v11 }
 0x263   : > { %v4238_v39 = vpop.eup %4237  ;;  %4257 = vtanh.f32 %v1555_v24 }
 0x264   : > { %v4240_v40 = vpop.eup %4239  ;;  %v3710_v43 = vpack.c.bf16 %v4238_v39, %v4234_v29  ;;  %4259 = vtanh.f32 %v1748_v28  ;;  %v1560_v44 = vpop.f32.mrb[40].mxu1 }
 0x265   : > { %v1753_v45 = vpop.f32.mrb[40].mxu0  ;;  %v4242_v46 = vpop.eup %4241  ;;  %v3711_v47 = vpack.c.bf16 %v4240_v40, %v4236_v31  ;;  %4261 = vtanh.f32 %v1557_v30  ;;  %v1561_v22 = vadd.f32 %v1560_v44, %v5397_v36 }
 0x266   : > { %v1754_v48 = vadd.f32 %v1753_v45, %v5399_v12  ;;  %v1562_v49 = vpop.f32.mrb[41].mxu1  ;;  %v1755_v50 = vpop.f32.mrb[41].mxu0  ;;  %3174 = vst [vmem:[%s5441_s16] sm:$0xff] %v3710_v43  ;;  %4263 = vtanh.f32 %v1750_v32 }
 0x267   : > { %v4244_v51 = vpop.eup %4243  ;;  %v1563_v11 = vadd.f32 %v1562_v49, %v5405_v13  ;;  %v1756_v9 = vadd.f32 %v1755_v50, %v5407_v14  ;;  %v1564_v61 = vpop.f32.mrb[42].mxu1  ;;  %3175 = vst [vmem:[%s5441_s16 + $0x8] sm:$0xff] %v3711_v47  ;;  %4265 = vtanh.f32 %v1561_v22 }
 0x268   : > { %v1757_v10 = vpop.f32.mrb[42].mxu0  ;;  %v4246_v0 = vpop.eup %4245  ;;  %v1565_v35 = vadd.f32 %v1564_v61, %v5397_v36  ;;  %4267 = vtanh.f32 %v1754_v48 }
 0x269   : > { %v1566_v37 = vpop.f32.mrb[43].mxu1  ;;  %v1759_v41 = vpop.f32.mrb[43].mxu0  ;;  %v3714_v52 = vpack.c.bf16 %v4246_v0, %v4242_v46  ;;  %v1758_v53 = vadd.f32 %v1757_v10, %v5399_v12  ;;  %4269 = vtanh.f32 %v1563_v11  ;;  %2055 = vmatmul.mubr.bf16.gmra.mrb[148].mxu1 %v5267_v2  ;;  %2222 = vmatmul.mubr.bf16.gmra.mrb[148].mxu0 %v5267_v2 }
 0x26a   : > { %v4248_v18 = vpop.eup %4247  ;;  %v1567_v58 = vadd.f32 %v1566_v37, %v5405_v13  ;;  %4271 = vtanh.f32 %v1756_v9  ;;  %v1760_v38 = vadd.f32 %v1759_v41, %v5407_v14  ;;  %2064 = vmatprep.mubr.bf16.mxu1 %v5291_v62  ;;  %2229 = vmatprep.mubr.bf16.mxu0 %v5291_v62 }
 0x26b   : > { %v4250_v54 = vpop.eup %4249  ;;  %v3715_v6 = vpack.c.bf16 %v4248_v18, %v4244_v51  ;;  %3178 = vst [vmem:[%s5441_s16 + $0x1c] sm:$0xff] %v3714_v52  ;;  %4273 = vtanh.f32 %v1565_v35 }
 0x26c   : > { %v4252_v33 = vpop.eup %4251  ;;  %4275 = vtanh.f32 %v1758_v53  ;;  %v1570_v23 = vpop.f32.mrb[44].mxu1 }
 0x26d   : > { %v4254_v21 = vpop.eup %4253  ;;  %3179 = vst [vmem:[%s5441_s16 + $0x24] sm:$0xff] %v3715_v6  ;;  %v1763_v1 = vpop.f32.mrb[44].mxu0  ;;  %4277 = vtanh.f32 %v1567_v58  ;;  %v1571_v57 = vadd.f32 %v1570_v23, %v5397_v36 }
 0x26e   : > { %v4256_v42 = vpop.eup %4255  ;;  %v3718_v8 = vpack.c.bf16 %v4254_v21, %v4250_v54  ;;  %v1764_v60 = vadd.f32 %v1763_v1, %v5399_v12  ;;  %v1572_v63 = vpop.f32.mrb[45].mxu1  ;;  %4279 = vtanh.f32 %v1760_v38 }
 0x26f   : > { %v4258_v2 = vpop.eup %4257  ;;  %v3719_v3 = vpack.c.bf16 %v4256_v42, %v4252_v33  ;;  %v1765_v4 = vpop.f32.mrb[45].mxu0  ;;  %v1573_v7 = vadd.f32 %v1572_v63, %v5405_v13  ;;  %4281 = vtanh.f32 %v1571_v57 }
 0x270   : > { %v4260_v62 = vpop.eup %4259  ;;  %3182 = vst [vmem:[%s5441_s16 + $0x38] sm:$0xff] %v3718_v8  ;;  %v1766_v15 = vadd.f32 %v1765_v4, %v5407_v14  ;;  %v1574_v16 = vpop.f32.mrb[46].mxu1  ;;  %4283 = vtanh.f32 %v1764_v60 }
 0x271   : > { %v1767_v34 = vpop.f32.mrb[46].mxu0  ;;  %v4262_v17 = vpop.eup %4261  ;;  %3183 = vst [vmem:[%s5441_s16 + $0x40] sm:$0xff] %v3719_v3  ;;  %v1575_v19 = vadd.f32 %v1574_v16, %v5397_v36  ;;  %4285 = vtanh.f32 %v1573_v7  ;;  %2065 = vmatmul.mubr.bf16.gmra.mrb[152].mxu1 %v5287_v59  ;;  %2230 = vmatmul.mubr.bf16.gmra.mrb[152].mxu0 %v5287_v59 }
 0x272   : > { %v1576_v20 = vpop.f32.mrb[47].mxu1  ;;  %v1769_v26 = vpop.f32.mrb[47].mxu0  ;;  %v3722_v25 = vpack.c.bf16 %v4262_v17, %v4258_v2  ;;  %v1768_v27 = vadd.f32 %v1767_v34, %v5399_v12  ;;  %4287 = vtanh.f32 %v1766_v15  ;;  %2074 = vmatprep.mubr.bf16.mxu1 %v5311_v56  ;;  %2237 = vmatprep.mubr.bf16.mxu0 %v5311_v56 }
 0x273   : > { %v4264_v24 = vpop.eup %4263  ;;  %v1577_v30 = vadd.f32 %v1576_v20, %v5405_v13  ;;  %v1770_v32 = vadd.f32 %v1769_v26, %v5407_v14  ;;  %4289 = vtanh.f32 %v1575_v19 }
 0x274   : > { %v4266_v28 = vpop.eup %4265  ;;  %v3723_v29 = vpack.c.bf16 %v4264_v24, %v4260_v62  ;;  %3186 = vst [vmem:[%s5441_s16 + $0x54] sm:$0xff] %v3722_v25  ;;  %4291 = vtanh.f32 %v1768_v27  ;;  %v1580_v44 = vpop.f32.mrb[48].mxu1 }
 0x275   : > { %v4268_v31 = vpop.eup %4267  ;;  %v1773_v45 = vpop.f32.mrb[48].mxu0  ;;  %4293 = vtanh.f32 %v1577_v30  ;;  %v1581_v47 = vadd.f32 %v1580_v44, %v5397_v36 }
 0x276   : > { %v4270_v39 = vpop.eup %4269  ;;  %3187 = vst [vmem:[%s5441_s16 + $0x5c] sm:$0xff] %v3723_v29  ;;  %v1774_v22 = vadd.f32 %v1773_v45, %v5399_v12  ;;  %v1582_v48 = vpop.f32.mrb[49].mxu1  ;;  %4295 = vtanh.f32 %v1770_v32 }
 0x277   : > { %v4272_v40 = vpop.eup %4271  ;;  %v3726_v43 = vpack.c.bf16 %v4270_v39, %v4266_v28  ;;  %v1775_v49 = vpop.f32.mrb[49].mxu0  ;;  %v1583_v50 = vadd.f32 %v1582_v48, %v5405_v13  ;;  %4297 = vtanh.f32 %v1581_v47 }
 0x278   : > { %v4274_v59 = vpop.eup %4273  ;;  %v3727_v46 = vpack.c.bf16 %v4272_v40, %v4268_v31  ;;  %v1776_v51 = vadd.f32 %v1775_v49, %v5407_v14  ;;  %v1584_v11 = vpop.f32.mrb[50].mxu1  ;;  %4299 = vtanh.f32 %v1774_v22 }
 0x279   : > { %v4276_v56 = vpop.eup %4275  ;;  %3190 = vst [vmem:[%s5441_s16 + $0x70] sm:$0xff] %v3726_v43  ;;  %v1777_v9 = vpop.f32.mrb[50].mxu0  ;;  %v1585_v10 = vadd.f32 %v1584_v11, %v5397_v36  ;;  %4301 = vtanh.f32 %v1583_v50  ;;  %2075 = vmatmul.mubr.bf16.gmra.mrb[156].mxu1 %v5307_v55  ;;  %2238 = vmatmul.mubr.bf16.gmra.mrb[156].mxu0 %v5307_v55 }
 0x27a   : > { %v4278_v61 = vpop.eup %4277  ;;  %3191 = vst [vmem:[%s5441_s16 + $0x78] sm:$0xff] %v3727_v46  ;;  %v1586_v0 = vpop.f32.mrb[51].mxu1  ;;  %v1778_v18 = vadd.f32 %v1777_v9, %v5399_v12  ;;  %4303 = vtanh.f32 %v1776_v51 }
 0x27b   : > { %v1779_v35 = vpop.f32.mrb[51].mxu0  ;;  %v4280_v37 = vpop.eup %4279  ;;  %v3730_v41 = vpack.c.bf16 %v4278_v61, %v4274_v59  ;;  %v1587_v54 = vadd.f32 %v1586_v0, %v5405_v13  ;;  %4305 = vtanh.f32 %v1585_v10 }
 0x27c   : > { %v4282_v52 = vpop.eup %4281  ;;  %v3731_v53 = vpack.c.bf16 %v4280_v37, %v4276_v56  ;;  %v1780_v58 = vadd.f32 %v1779_v35, %v5407_v14  ;;  %4307 = vtanh.f32 %v1778_v18  ;;  %v1590_v42 = vpop.f32.mrb[52].mxu1 }
 0x27d   : > { %v4284_v6 = vpop.eup %4283  ;;  %3194 = vst [vmem:[%s5441_s16 + $0x8c] sm:$0xff] %v3730_v41  ;;  %v1783_v8 = vpop.f32.mrb[52].mxu0  ;;  %4309 = vtanh.f32 %v1587_v54  ;;  %v1591_v55 = vadd.f32 %v1590_v42, %v5397_v36 }
 0x27e   : > { %v4286_v33 = vpop.eup %4285  ;;  %3195 = vst [vmem:[%s5441_s16 + $0x94] sm:$0xff] %v3731_v53  ;;  %v1784_v2 = vadd.f32 %v1783_v8, %v5399_v12  ;;  %v1592_v3 = vpop.f32.mrb[53].mxu1  ;;  %4311 = vtanh.f32 %v1780_v58 }
 0x27f   : > { %v4288_v38 = vpop.eup %4287  ;;  %v3734_v21 = vpack.c.bf16 %v4286_v33, %v4282_v52  ;;  %v1785_v57 = vpop.f32.mrb[53].mxu0  ;;  %v1593_v63 = vadd.f32 %v1592_v3, %v5405_v13  ;;  %4313 = vtanh.f32 %v1591_v55 }
 0x280   : > { %v4290_v23 = vpop.eup %4289  ;;  %v3735_v1 = vpack.c.bf16 %v4288_v38, %v4284_v6  ;;  %v1786_v4 = vadd.f32 %v1785_v57, %v5407_v14  ;;  %v1594_v62 = vpop.f32.mrb[54].mxu1  ;;  %4315 = vtanh.f32 %v1784_v2 }
 0x281   : > { %v4292_v60 = vpop.eup %4291  ;;  %3198 = vst [vmem:[%s5441_s16 + $0xa8] sm:$0xff] %v3734_v21  ;;  %v1787_v7 = vpop.f32.mrb[54].mxu0  ;;  %v1595_v16 = vadd.f32 %v1594_v62, %v5397_v36  ;;  %4317 = vtanh.f32 %v1593_v63 }
 0x282   : > { %v4294_v15 = vpop.eup %4293  ;;  %3199 = vst [vmem:[%s5441_s16 + $0xb0] sm:$0xff] %v3735_v1  ;;  %v1596_v34 = vpop.f32.mrb[55].mxu1  ;;  %v1788_v26 = vadd.f32 %v1787_v7, %v5399_v12  ;;  %4319 = vtanh.f32 %v1786_v4 }
 0x283   : > { %v1789_v17 = vpop.f32.mrb[55].mxu0  ;;  %v4296_v19 = vpop.eup %4295  ;;  %v3738_v20 = vpack.c.bf16 %v4294_v15, %v4290_v23  ;;  %v1597_v27 = vadd.f32 %v1596_v34, %v5405_v13  ;;  %4321 = vtanh.f32 %v1595_v16 }
 0x284   : > { %v4298_v24 = vpop.eup %4297  ;;  %v3739_v25 = vpack.c.bf16 %v4296_v19, %v4292_v60  ;;  %v1790_v29 = vadd.f32 %v1789_v17, %v5407_v14  ;;  %4323 = vtanh.f32 %v1788_v26  ;;  %v1600_v39 = vpop.f32.mrb[56].mxu1 }
 0x285   : > { %v4300_v28 = vpop.eup %4299  ;;  %3202 = vst [vmem:[%s5441_s16 + $0xc4] sm:$0xff] %v3738_v20  ;;  %v1793_v40 = vpop.f32.mrb[56].mxu0  ;;  %4325 = vtanh.f32 %v1597_v27  ;;  %v1601_v45 = vadd.f32 %v1600_v39, %v5397_v36 }
 0x286   : > { %v4302_v30 = vpop.eup %4301  ;;  %3203 = vst [vmem:[%s5441_s16 + $0xcc] sm:$0xff] %v3739_v25  ;;  %v1794_v59 = vadd.f32 %v1793_v40, %v5399_v12  ;;  %v1602_v46 = vpop.f32.mrb[57].mxu1  ;;  %4327 = vtanh.f32 %v1790_v29 }
 0x287   : > { %v4304_v31 = vpop.eup %4303  ;;  %v3742_v32 = vpack.c.bf16 %v4302_v30, %v4298_v24  ;;  %v1795_v47 = vpop.f32.mrb[57].mxu0  ;;  %v1603_v48 = vadd.f32 %v1602_v46, %v5405_v13  ;;  %4329 = vtanh.f32 %v1601_v45 }
 0x288   : > { %v4306_v43 = vpop.eup %4305  ;;  %v3743_v44 = vpack.c.bf16 %v4304_v31, %v4300_v28  ;;  %v1796_v49 = vadd.f32 %v1795_v47, %v5407_v14  ;;  %v1604_v56 = vpop.f32.mrb[58].mxu1  ;;  %4331 = vtanh.f32 %v1794_v59 }
 0x289   : > { %v4308_v22 = vpop.eup %4307  ;;  %3206 = vst [vmem:[%s5441_s16 + $0xe0] sm:$0xff] %v3742_v32  ;;  %v1797_v50 = vpop.f32.mrb[58].mxu0  ;;  %v1605_v11 = vadd.f32 %v1604_v56, %v5397_v36  ;;  %4333 = vtanh.f32 %v1603_v48 }
 0x28a   : > { %v4310_v51 = vpop.eup %4309  ;;  %3207 = vst [vmem:[%s5441_s16 + $0xe8] sm:$0xff] %v3743_v44  ;;  %v1606_v9 = vpop.f32.mrb[59].mxu1  ;;  %v1798_v35 = vadd.f32 %v1797_v50, %v5399_v12  ;;  %4335 = vtanh.f32 %v1796_v49 }
 0x28b   : > { %v1799_v61 = vpop.f32.mrb[59].mxu0  ;;  %v4312_v10 = vpop.eup %4311  ;;  %v3746_v0 = vpack.c.bf16 %v4310_v51, %v4306_v43  ;;  %v1607_v18 = vadd.f32 %v1606_v9, %v5405_v13  ;;  %4337 = vtanh.f32 %v1605_v11 }
 0x28c   : > { %v4314_v37 = vpop.eup %4313  ;;  %v3747_v41 = vpack.c.bf16 %v4312_v10, %v4308_v22  ;;  %v1800_v53 = vadd.f32 %v1799_v61, %v5407_v14  ;;  %4339 = vtanh.f32 %v1798_v35  ;;  %v1610_v33 = vpop.f32.mrb[60].mxu1 }
 0x28d   : > { %v4316_v52 = vpop.eup %4315  ;;  %3210 = vst [vmem:[%s5441_s16 + $0xfc] sm:$0xff] %v3746_v0  ;;  %v1803_v38 = vpop.f32.mrb[60].mxu0  ;;  %4341 = vtanh.f32 %v1607_v18  ;;  %v1611_v8 = vadd.f32 %v1610_v33, %v5397_v36 }
 0x28e   : > { %v4318_v54 = vpop.eup %4317  ;;  %3211 = vst [vmem:[%s5441_s16 + $0x104] sm:$0xff] %v3747_v41  ;;  %v1804_v23 = vadd.f32 %v1803_v38, %v5399_v12  ;;  %v1612_v1 = vpop.f32.mrb[61].mxu1  ;;  %4343 = vtanh.f32 %v1800_v53 }
 0x28f   : > { %v4320_v6 = vpop.eup %4319  ;;  %v3750_v58 = vpack.c.bf16 %v4318_v54, %v4314_v37  ;;  %v1805_v55 = vpop.f32.mrb[61].mxu0  ;;  %v1613_v3 = vadd.f32 %v1612_v1, %v5405_v13  ;;  %4345 = vtanh.f32 %v1611_v8 }
 0x290   : > { %v4322_v21 = vpop.eup %4321  ;;  %v3751_v42 = vpack.c.bf16 %v4320_v6, %v4316_v52  ;;  %v1806_v57 = vadd.f32 %v1805_v55, %v5407_v14  ;;  %v1614_v60 = vpop.f32.mrb[62].mxu1  ;;  %4347 = vtanh.f32 %v1804_v23 }
 0x291   : > { %v4324_v2 = vpop.eup %4323  ;;  %3214 = vst [vmem:[%s5441_s16 + $0x118] sm:$0xff] %v3750_v58  ;;  %v1807_v63 = vpop.f32.mrb[62].mxu0  ;;  %v1615_v62 = vadd.f32 %v1614_v60, %v5397_v36  ;;  %4349 = vtanh.f32 %v1613_v3 }
 0x292   : > { %v4326_v4 = vpop.eup %4325  ;;  %3215 = vst [vmem:[%s5441_s16 + $0x120] sm:$0xff] %v3751_v42  ;;  %v1616_v7 = vpop.f32.mrb[63].mxu1  ;;  %v1808_v17 = vadd.f32 %v1807_v63, %v5399_v12  ;;  %4351 = vtanh.f32 %v1806_v57 }
 0x293   : > { %v1809_v15 = vpop.f32.mrb[63].mxu0  ;;  %v4328_v16 = vpop.eup %4327  ;;  %v3754_v34 = vpack.c.bf16 %v4326_v4, %v4322_v21  ;;  %v1617_v26 = vadd.f32 %v1616_v7, %v5405_v13  ;;  %4353 = vtanh.f32 %v1615_v62 }
 0x294   : > { %v4330_v19 = vpop.eup %4329  ;;  %v3755_v20 = vpack.c.bf16 %v4328_v16, %v4324_v2  ;;  %v1810_v25 = vadd.f32 %v1809_v15, %v5407_v14  ;;  %4355 = vtanh.f32 %v1808_v17  ;;  %v1620_v30 = vpop.f32.mrb[64].mxu1 }
 0x295   : > { %v4332_v24 = vpop.eup %4331  ;;  %3218 = vst [vmem:[%s5441_s16 + $0x134] sm:$0xff] %v3754_v34  ;;  %v1813_v31 = vpop.f32.mrb[64].mxu0  ;;  %4357 = vtanh.f32 %v1617_v26  ;;  %v1621_v40 = vadd.f32 %v1620_v30, %v5397_v36 }
 0x296   : > { %v4334_v27 = vpop.eup %4333  ;;  %3219 = vst [vmem:[%s5441_s16 + $0x13c] sm:$0xff] %v3755_v20  ;;  %v1814_v43 = vadd.f32 %v1813_v31, %v5399_v12  ;;  %v1622_v44 = vpop.f32.mrb[65].mxu1  ;;  %4359 = vtanh.f32 %v1810_v25 }
 0x297   : > { %v4336_v28 = vpop.eup %4335  ;;  %v3758_v29 = vpack.c.bf16 %v4334_v27, %v4330_v19  ;;  %v1815_v45 = vpop.f32.mrb[65].mxu0  ;;  %v1623_v46 = vadd.f32 %v1622_v44, %v5405_v13  ;;  %4361 = vtanh.f32 %v1621_v40 }
 0x298   : > { %v4338_v32 = vpop.eup %4337  ;;  %v3759_v39 = vpack.c.bf16 %v4336_v28, %v4332_v24  ;;  %v1816_v47 = vadd.f32 %v1815_v45, %v5407_v14  ;;  %v1624_v22 = vpop.f32.mrb[66].mxu1  ;;  %4363 = vtanh.f32 %v1814_v43 }
 0x299   : > { %v4340_v59 = vpop.eup %4339  ;;  %3222 = vst [vmem:[%s5441_s16 + $0x150] sm:$0xff] %v3758_v29  ;;  %v1817_v48 = vpop.f32.mrb[66].mxu0  ;;  %v1625_v56 = vadd.f32 %v1624_v22, %v5397_v36  ;;  %4365 = vtanh.f32 %v1623_v46 }
 0x29a   : > { %v4342_v49 = vpop.eup %4341  ;;  %3223 = vst [vmem:[%s5441_s16 + $0x158] sm:$0xff] %v3759_v39  ;;  %v1626_v50 = vpop.f32.mrb[67].mxu1  ;;  %v1818_v61 = vadd.f32 %v1817_v48, %v5399_v12  ;;  %4367 = vtanh.f32 %v1816_v47 }
 0x29b   : > { %v1819_v51 = vpop.f32.mrb[67].mxu0  ;;  %v4344_v11 = vpop.eup %4343  ;;  %v3762_v9 = vpack.c.bf16 %v4342_v49, %v4338_v32  ;;  %v1627_v35 = vadd.f32 %v1626_v50, %v5405_v13  ;;  %4369 = vtanh.f32 %v1625_v56 }
 0x29c   : > { %v4346_v10 = vpop.eup %4345  ;;  %v3763_v0 = vpack.c.bf16 %v4344_v11, %v4340_v59  ;;  %v1820_v41 = vadd.f32 %v1819_v51, %v5407_v14  ;;  %4371 = vtanh.f32 %v1818_v61  ;;  %v1630_v54 = vpop.f32.mrb[68].mxu1 }
 0x29d   : > { %v4348_v37 = vpop.eup %4347  ;;  %3226 = vst [vmem:[%s5441_s16 + $0x16c] sm:$0xff] %v3762_v9  ;;  %v1823_v6 = vpop.f32.mrb[68].mxu0  ;;  %4373 = vtanh.f32 %v1627_v35  ;;  %v1631_v38 = vadd.f32 %v1630_v54, %v5397_v36 }
 0x29e   : > { %v4350_v18 = vpop.eup %4349  ;;  %3227 = vst [vmem:[%s5441_s16 + $0x174] sm:$0xff] %v3763_v0  ;;  %v1824_v21 = vadd.f32 %v1823_v6, %v5399_v12  ;;  %v1632_v42 = vpop.f32.mrb[69].mxu1  ;;  %4375 = vtanh.f32 %v1820_v41 }
 0x29f   : > { %v4352_v52 = vpop.eup %4351  ;;  %v3766_v53 = vpack.c.bf16 %v4350_v18, %v4346_v10  ;;  %v1825_v8 = vpop.f32.mrb[69].mxu0  ;;  %v1633_v1 = vadd.f32 %v1632_v42, %v5405_v13  ;;  %4377 = vtanh.f32 %v1631_v38 }
 0x2a0   : > { %v4354_v58 = vpop.eup %4353  ;;  %v3767_v33 = vpack.c.bf16 %v4352_v52, %v4348_v37  ;;  %v1826_v55 = vadd.f32 %v1825_v8, %v5407_v14  ;;  %v1634_v2 = vpop.f32.mrb[70].mxu1  ;;  %4379 = vtanh.f32 %v1824_v21 }
 0x2a1   : > { %v4356_v23 = vpop.eup %4355  ;;  %3230 = vst [vmem:[%s5441_s16 + $0x188] sm:$0xff] %v3766_v53  ;;  %v1827_v3 = vpop.f32.mrb[70].mxu0  ;;  %v1635_v60 = vadd.f32 %v1634_v2, %v5397_v36  ;;  %4381 = vtanh.f32 %v1633_v1 }
 0x2a2   : > { %v4358_v57 = vpop.eup %4357  ;;  %3231 = vst [vmem:[%s5441_s16 + $0x190] sm:$0xff] %v3767_v33  ;;  %v1636_v63 = vpop.f32.mrb[71].mxu1  ;;  %v1828_v15 = vadd.f32 %v1827_v3, %v5399_v12  ;;  %4383 = vtanh.f32 %v1826_v55 }
 0x2a3   : > { %v1829_v4 = vpop.f32.mrb[71].mxu0  ;;  %v4360_v62 = vpop.eup %4359  ;;  %v3770_v7 = vpack.c.bf16 %v4358_v57, %v4354_v58  ;;  %v1637_v17 = vadd.f32 %v1636_v63, %v5405_v13  ;;  %4385 = vtanh.f32 %v1635_v60 }
 0x2a4   : > { %v4362_v16 = vpop.eup %4361  ;;  %v3771_v34 = vpack.c.bf16 %v4360_v62, %v4356_v23  ;;  %v1830_v20 = vadd.f32 %v1829_v4, %v5407_v14  ;;  %4387 = vtanh.f32 %v1828_v15  ;;  %v1640_v27 = vpop.f32.mrb[72].mxu1 }
 0x2a5   : > { %v4364_v19 = vpop.eup %4363  ;;  %3234 = vst [vmem:[%s5441_s16 + $0x1a4] sm:$0xff] %v3770_v7  ;;  %v1833_v28 = vpop.f32.mrb[72].mxu0  ;;  %4389 = vtanh.f32 %v1637_v17  ;;  %v1641_v31 = vadd.f32 %v1640_v27, %v5397_v36 }
 0x2a6   : > { %v4366_v26 = vpop.eup %4365  ;;  %3235 = vst [vmem:[%s5441_s16 + $0x1ac] sm:$0xff] %v3771_v34  ;;  %v1834_v32 = vadd.f32 %v1833_v28, %v5399_v12  ;;  %v1642_v39 = vpop.f32.mrb[73].mxu1  ;;  %4391 = vtanh.f32 %v1830_v20 }
 0x2a7   : > { %v4368_v24 = vpop.eup %4367  ;;  %v3774_v25 = vpack.c.bf16 %v4366_v26, %v4362_v16  ;;  %v1835_v40 = vpop.f32.mrb[73].mxu0  ;;  %v1643_v44 = vadd.f32 %v1642_v39, %v5405_v13  ;;  %4393 = vtanh.f32 %v1641_v31 }
 0x2a8   : > { %v4370_v29 = vpop.eup %4369  ;;  %v3775_v30 = vpack.c.bf16 %v4368_v24, %v4364_v19  ;;  %v1836_v45 = vadd.f32 %v1835_v40, %v5407_v14  ;;  %v1644_v59 = vpop.f32.mrb[74].mxu1  ;;  %4395 = vtanh.f32 %v1834_v32 }
 0x2a9   : > { %v4372_v43 = vpop.eup %4371  ;;  %3238 = vst [vmem:[%s5441_s16 + $0x1c0] sm:$0xff] %v3774_v25  ;;  %v1837_v46 = vpop.f32.mrb[74].mxu0  ;;  %v1645_v22 = vadd.f32 %v1644_v59, %v5397_v36  ;;  %4397 = vtanh.f32 %v1643_v44 }
 0x2aa   : > { %v4374_v47 = vpop.eup %4373  ;;  %3239 = vst [vmem:[%s5441_s16 + $0x1c8] sm:$0xff] %v3775_v30  ;;  %v1646_v48 = vpop.f32.mrb[75].mxu1  ;;  %v1838_v51 = vadd.f32 %v1837_v46, %v5399_v12  ;;  %4399 = vtanh.f32 %v1836_v45 }
 0x2ab   : > { %v1839_v49 = vpop.f32.mrb[75].mxu0  ;;  %v4376_v56 = vpop.eup %4375  ;;  %v3778_v50 = vpack.c.bf16 %v4374_v47, %v4370_v29  ;;  %v1647_v61 = vadd.f32 %v1646_v48, %v5405_v13  ;;  %4401 = vtanh.f32 %v1645_v22 }
 0x2ac   : > { %v4378_v11 = vpop.eup %4377  ;;  %v3779_v9 = vpack.c.bf16 %v4376_v56, %v4372_v43  ;;  %v1840_v0 = vadd.f32 %v1839_v49, %v5407_v14  ;;  %4403 = vtanh.f32 %v1838_v51  ;;  %v1650_v18 = vpop.f32.mrb[76].mxu1 }
 0x2ad   : > { %v4380_v10 = vpop.eup %4379  ;;  %3242 = vst [vmem:[%s5441_s16 + $0x1dc] sm:$0xff] %v3778_v50  ;;  %v1843_v52 = vpop.f32.mrb[76].mxu0  ;;  %4405 = vtanh.f32 %v1647_v61  ;;  %v1651_v6 = vadd.f32 %v1650_v18, %v5397_v36 }
 0x2ae   : > { %v4382_v35 = vpop.eup %4381  ;;  %3243 = vst [vmem:[%s5441_s16 + $0x1e4] sm:$0xff] %v3779_v9  ;;  %v1844_v58 = vadd.f32 %v1843_v52, %v5399_v12  ;;  %v1652_v33 = vpop.f32.mrb[77].mxu1  ;;  %4407 = vtanh.f32 %v1840_v0 }
 0x2af   : > { %v4384_v37 = vpop.eup %4383  ;;  %v3782_v41 = vpack.c.bf16 %v4382_v35, %v4378_v11  ;;  %v1845_v38 = vpop.f32.mrb[77].mxu0  ;;  %v1653_v42 = vadd.f32 %v1652_v33, %v5405_v13  ;;  %4409 = vtanh.f32 %v1651_v6 }
 0x2b0   : > { %v4386_v53 = vpop.eup %4385  ;;  %v3783_v54 = vpack.c.bf16 %v4384_v37, %v4380_v10  ;;  %v1846_v8 = vadd.f32 %v1845_v38, %v5407_v14  ;;  %v1654_v23 = vpop.f32.mrb[78].mxu1  ;;  %4411 = vtanh.f32 %v1844_v58 }
 0x2b1   : > { %v4388_v21 = vpop.eup %4387  ;;  %3246 = vst [vmem:[%s5441_s16 + $0x1f8] sm:$0xff] %v3782_v41  ;;  %v1847_v1 = vpop.f32.mrb[78].mxu0  ;;  %v1655_v2 = vadd.f32 %v1654_v23, %v5397_v36  ;;  %4413 = vtanh.f32 %v1653_v42 }
 0x2b2   : > { %v4390_v55 = vpop.eup %4389  ;;  %3247 = vst [vmem:[%s5441_s16 + $0x200] sm:$0xff] %v3783_v54  ;;  %v1656_v3 = vpop.f32.mrb[79].mxu1  ;;  %v1848_v4 = vadd.f32 %v1847_v1, %v5399_v12  ;;  %4415 = vtanh.f32 %v1846_v8 }
 0x2b3   : > { %v1849_v57 = vpop.f32.mrb[79].mxu0  ;;  %v4392_v60 = vpop.eup %4391  ;;  %v3786_v63 = vpack.c.bf16 %v4390_v55, %v4386_v53  ;;  %v1657_v15 = vadd.f32 %v1656_v3, %v5405_v13  ;;  %4417 = vtanh.f32 %v1655_v2 }
 0x2b4   : > { %v4394_v62 = vpop.eup %4393  ;;  %v3787_v7 = vpack.c.bf16 %v4392_v60, %v4388_v21  ;;  %v1850_v34 = vadd.f32 %v1849_v57, %v5407_v14  ;;  %4419 = vtanh.f32 %v1848_v4  ;;  %v1660_v26 = vpop.f32.mrb[80].mxu1 }
 0x2b5   : > { %v4396_v16 = vpop.eup %4395  ;;  %3250 = vst [vmem:[%s5441_s16 + $0x214] sm:$0xff] %v3786_v63  ;;  %v1853_v24 = vpop.f32.mrb[80].mxu0  ;;  %4421 = vtanh.f32 %v1657_v15  ;;  %v1661_v28 = vadd.f32 %v1660_v26, %v5397_v36 }
 0x2b6   : > { %v4398_v17 = vpop.eup %4397  ;;  %3251 = vst [vmem:[%s5441_s16 + $0x21c] sm:$0xff] %v3787_v7  ;;  %v1854_v29 = vadd.f32 %v1853_v24, %v5399_v12  ;;  %v1662_v30 = vpop.f32.mrb[81].mxu1  ;;  %4423 = vtanh.f32 %v1850_v34 }
 0x2b7   : > { %v4400_v19 = vpop.eup %4399  ;;  %v3790_v20 = vpack.c.bf16 %v4398_v17, %v4394_v62  ;;  %v1855_v31 = vpop.f32.mrb[81].mxu0  ;;  %v1663_v39 = vadd.f32 %v1662_v30, %v5405_v13  ;;  %4425 = vtanh.f32 %v1661_v28 }
 0x2b8   : > { %v4402_v25 = vpop.eup %4401  ;;  %v3791_v27 = vpack.c.bf16 %v4400_v19, %v4396_v16  ;;  %v1856_v40 = vadd.f32 %v1855_v31, %v5407_v14  ;;  %v1664_v43 = vpop.f32.mrb[82].mxu1  ;;  %4427 = vtanh.f32 %v1854_v29 }
 0x2b9   : > { %v4404_v32 = vpop.eup %4403  ;;  %3254 = vst [vmem:[%s5441_s16 + $0x230] sm:$0xff] %v3790_v20  ;;  %v1857_v44 = vpop.f32.mrb[82].mxu0  ;;  %v1665_v59 = vadd.f32 %v1664_v43, %v5397_v36  ;;  %4429 = vtanh.f32 %v1663_v39 }
 0x2ba   : > { %v4406_v45 = vpop.eup %4405  ;;  %3255 = vst [vmem:[%s5441_s16 + $0x238] sm:$0xff] %v3791_v27  ;;  %v1666_v46 = vpop.f32.mrb[83].mxu1  ;;  %v1858_v49 = vadd.f32 %v1857_v44, %v5399_v12  ;;  %4431 = vtanh.f32 %v1856_v40 }
 0x2bb   : > { %v1859_v47 = vpop.f32.mrb[83].mxu0  ;;  %v4408_v22 = vpop.eup %4407  ;;  %v3794_v48 = vpack.c.bf16 %v4406_v45, %v4402_v25  ;;  %v1667_v51 = vadd.f32 %v1666_v46, %v5405_v13  ;;  %4433 = vtanh.f32 %v1665_v59 }
 0x2bc   : > { %v4410_v56 = vpop.eup %4409  ;;  %v3795_v50 = vpack.c.bf16 %v4408_v22, %v4404_v32  ;;  %v1860_v9 = vadd.f32 %v1859_v47, %v5407_v14  ;;  %4435 = vtanh.f32 %v1858_v49  ;;  %v1670_v35 = vpop.f32.mrb[84].mxu1 }
 0x2bd   : > { %v4412_v11 = vpop.eup %4411  ;;  %3258 = vst [vmem:[%s5441_s16 + $0x24c] sm:$0xff] %v3794_v48  ;;  %v1863_v37 = vpop.f32.mrb[84].mxu0  ;;  %4437 = vtanh.f32 %v1667_v51  ;;  %v1671_v52 = vadd.f32 %v1670_v35, %v5397_v36 }
 0x2be   : > { %v4414_v61 = vpop.eup %4413  ;;  %3259 = vst [vmem:[%s5441_s16 + $0x254] sm:$0xff] %v3795_v50  ;;  %v1864_v53 = vadd.f32 %v1863_v37, %v5399_v12  ;;  %v1672_v54 = vpop.f32.mrb[85].mxu1  ;;  %4439 = vtanh.f32 %v1860_v9  ;;  %v913_v9 = vsub.s32 4, %v5145_v5 }
 0x2bf   : > { %v4416_v10 = vpop.eup %4415  ;;  %v3798_v0 = vpack.c.bf16 %v4414_v61, %v4410_v56  ;;  %v1865_v6 = vpop.f32.mrb[85].mxu0  ;;  %v1673_v33 = vadd.f32 %v1672_v54, %v5405_v13  ;;  %4441 = vtanh.f32 %v1671_v52 }
 0x2c0   : > { %v4418_v41 = vpop.eup %4417  ;;  %v3799_v18 = vpack.c.bf16 %v4416_v10, %v4412_v11  ;;  %v1866_v38 = vadd.f32 %v1865_v6, %v5407_v14  ;;  %v1674_v21 = vpop.f32.mrb[86].mxu1  ;;  %4443 = vtanh.f32 %v1864_v53  ;;  %v917_v6 = vsub.s32 5, %v5145_v5 }
 0x2c1   : > { %v4420_v58 = vpop.eup %4419  ;;  %3262 = vst [vmem:[%s5441_s16 + $0x268] sm:$0xff] %v3798_v0  ;;  %v1867_v42 = vpop.f32.mrb[86].mxu0  ;;  %v1675_v23 = vadd.f32 %v1674_v21, %v5397_v36  ;;  %4445 = vtanh.f32 %v1673_v33 }
 0x2c2   : > { %v4422_v8 = vpop.eup %4421  ;;  %3263 = vst [vmem:[%s5441_s16 + $0x270] sm:$0xff] %v3799_v18  ;;  %v1676_v1 = vpop.f32.mrb[87].mxu1  ;;  %v1868_v57 = vadd.f32 %v1867_v42, %v5399_v12  ;;  %4447 = vtanh.f32 %v1866_v38 }
 0x2c3   : > { %v1869_v55 = vpop.f32.mrb[87].mxu0  ;;  %v4424_v2 = vpop.eup %4423  ;;  %v3802_v3 = vpack.c.bf16 %v4422_v8, %v4418_v41  ;;  %v1677_v4 = vadd.f32 %v1676_v1, %v5405_v13  ;;  %4449 = vtanh.f32 %v1675_v23 }
 0x2c4   : > { %v4426_v60 = vpop.eup %4425  ;;  %v3803_v63 = vpack.c.bf16 %v4424_v2, %v4420_v58  ;;  %v1870_v7 = vadd.f32 %v1869_v55, %v5407_v14  ;;  %4451 = vtanh.f32 %v1868_v57  ;;  %v1680_v17 = vpop.f32.mrb[88].mxu1  ;;  %v921_v2 = vsub.s32 6, %v5145_v5 }
 0x2c5   : > { %v4428_v62 = vpop.eup %4427  ;;  %3266 = vst [vmem:[%s5441_s16 + $0x284] sm:$0xff] %v3802_v3  ;;  %v1873_v19 = vpop.f32.mrb[88].mxu0  ;;  %4453 = vtanh.f32 %v1677_v4  ;;  %v1681_v24 = vadd.f32 %v1680_v17, %v5397_v36 }
 0x2c6   : > { %v4430_v15 = vpop.eup %4429  ;;  %3267 = vst [vmem:[%s5441_s16 + $0x28c] sm:$0xff] %v3803_v63  ;;  %v1874_v25 = vadd.f32 %v1873_v19, %v5399_v12  ;;  %v1682_v27 = vpop.f32.mrb[89].mxu1  ;;  %4455 = vtanh.f32 %v1870_v7 }
 0x2c7   : > { %v4432_v16 = vpop.eup %4431  ;;  %v3806_v34 = vpack.c.bf16 %v4430_v15, %v4426_v60  ;;  %v1875_v28 = vpop.f32.mrb[89].mxu0  ;;  %v1683_v30 = vadd.f32 %v1682_v27, %v5405_v13  ;;  %4457 = vtanh.f32 %v1681_v24 }
 0x2c8   : > { %v4434_v20 = vpop.eup %4433  ;;  %v3807_v26 = vpack.c.bf16 %v4432_v16, %v4428_v62  ;;  %v1876_v31 = vadd.f32 %v1875_v28, %v5407_v14  ;;  %v1684_v32 = vpop.f32.mrb[90].mxu1  ;;  %4459 = vtanh.f32 %v1874_v25  ;;  %v4681_v62 = vld [vmem:[#allocation8] sm:$0xff] }
 0x2c9   : > { %v4436_v29 = vpop.eup %4435  ;;  %3270 = vst [vmem:[%s5441_s16 + $0x2a0] sm:$0xff] %v3806_v34  ;;  %v1877_v39 = vpop.f32.mrb[90].mxu0  ;;  %v1685_v43 = vadd.f32 %v1684_v32, %v5397_v36  ;;  %4461 = vtanh.f32 %v1683_v30  ;;  %v5619_v7 = vrot.slane %v4681_v62, %v913_v9  ;;  %v5623_v16 = vrot.slane %v4681_v62, %v917_v6 }
 0x2ca   : > { %v4438_v40 = vpop.eup %4437  ;;  %3271 = vst [vmem:[%s5441_s16 + $0x2a8] sm:$0xff] %v3807_v26  ;;  %v1686_v44 = vpop.f32.mrb[91].mxu1  ;;  %v1878_v47 = vadd.f32 %v1877_v39, %v5399_v12  ;;  %4463 = vtanh.f32 %v1876_v31 }
 0x2cb   : > { %v1879_v45 = vpop.f32.mrb[91].mxu0  ;;  %v4440_v59 = vpop.eup %4439  ;;  %v3810_v46 = vpack.c.bf16 %v4438_v40, %v4434_v20  ;;  %v1687_v49 = vadd.f32 %v1686_v44, %v5405_v13  ;;  %4465 = vtanh.f32 %v1685_v43 }
 0x2cc   : > { %v4442_v22 = vpop.eup %4441  ;;  %v3811_v48 = vpack.c.bf16 %v4440_v59, %v4436_v29  ;;  %v1880_v50 = vadd.f32 %v1879_v45, %v5407_v14  ;;  %4467 = vtanh.f32 %v1878_v47  ;;  %v1690_v10 = vpop.f32.mrb[92].mxu1 }
 0x2cd   : > { %v4444_v56 = vpop.eup %4443  ;;  %3274 = vst [vmem:[%s5441_s16 + $0x2bc] sm:$0xff] %v3810_v46  ;;  %v1883_v0 = vpop.f32.mrb[92].mxu0  ;;  %4469 = vtanh.f32 %v1687_v49  ;;  %v1691_v41 = vadd.f32 %v1690_v10, %v5397_v36 }
 0x2ce   : > { %v4446_v51 = vpop.eup %4445  ;;  %3275 = vst [vmem:[%s5441_s16 + $0x2c4] sm:$0xff] %v3811_v48  ;;  %v1884_v18 = vadd.f32 %v1883_v0, %v5399_v12  ;;  %v1692_v52 = vpop.f32.mrb[93].mxu1  ;;  %4471 = vtanh.f32 %v1880_v50 }
 0x2cf   : > { %v4448_v11 = vpop.eup %4447  ;;  %v3814_v61 = vpack.c.bf16 %v4446_v51, %v4442_v22  ;;  %v1885_v53 = vpop.f32.mrb[93].mxu0  ;;  %v1693_v58 = vadd.f32 %v1692_v52, %v5405_v13  ;;  %4473 = vtanh.f32 %v1691_v41 }
 0x2d0   : > { %v4450_v35 = vpop.eup %4449  ;;  %v3815_v37 = vpack.c.bf16 %v4448_v11, %v4444_v56  ;;  %v1886_v33 = vadd.f32 %v1885_v53, %v5407_v14  ;;  %v1694_v38 = vpop.f32.mrb[94].mxu1  ;;  %4475 = vtanh.f32 %v1884_v18 }
 0x2d1   : > { %v4452_v54 = vpop.eup %4451  ;;  %3278 = vst [vmem:[%s5441_s16 + $0x2d8] sm:$0xff] %v3814_v61  ;;  %v1887_v21 = vpop.f32.mrb[94].mxu0  ;;  %v1695_v8 = vadd.f32 %v1694_v38, %v5397_v36  ;;  %4477 = vtanh.f32 %v1693_v58 }
 0x2d2   : > { %v4454_v42 = vpop.eup %4453  ;;  %3279 = vst [vmem:[%s5441_s16 + $0x2e0] sm:$0xff] %v3815_v37  ;;  %v1696_v23 = vpop.f32.mrb[95].mxu1  ;;  %v1888_v57 = vadd.f32 %v1887_v21, %v5399_v12  ;;  %4479 = vtanh.f32 %v1886_v33 }
 0x2d3   : > { %v1889_v1 = vpop.f32.mrb[95].mxu0  ;;  %v4456_v55 = vpop.eup %4455  ;;  %v3818_v3 = vpack.c.bf16 %v4454_v42, %v4450_v35  ;;  %v1697_v4 = vadd.f32 %v1696_v23, %v5405_v13  ;;  %4481 = vtanh.f32 %v1695_v8  ;;  %v5626_v13 = vrot.slane %v4681_v62, %v921_v2 }
 0x2d4   : > { %v4458_v60 = vpop.eup %4457  ;;  %v3819_v63 = vpack.c.bf16 %v4456_v55, %v4452_v54  ;;  %v1890_v36 = vadd.f32 %v1889_v1, %v5407_v14  ;;  %4483 = vtanh.f32 %v1888_v57  ;;  %v1926_v17 = vpop.f32.mrb[96].mxu1 }
 0x2d5   : > { %v4460_v15 = vpop.eup %4459  ;;  %3282 = vst [vmem:[%s5441_s16 + $0x2f4] sm:$0xff] %v3818_v3  ;;  %v3854_v19 = vpop.f32.mrb[96].mxu0  ;;  %4485 = vtanh.f32 %v1697_v4  ;;  %v1927_v24 = vadd.f32 %v1926_v17, %v5619_v7 }
 0x2d6   : > { %v4462_v5 = vpop.eup %4461  ;;  %3283 = vst [vmem:[%s5441_s16 + $0x2fc] sm:$0xff] %v3819_v63  ;;  %v1928_v14 = vpop.f32.mrb[97].mxu1  ;;  %4487 = vtanh.f32 %v1890_v36 }
 0x2d7   : > { %v4464_v12 = vpop.eup %4463  ;;  %v3822_v34 = vpack.c.bf16 %v4462_v5, %v4458_v60  ;;  %v3855_v25 = vpop.f32.mrb[97].mxu0  ;;  %v1929_v28 = vadd.f32 %v1928_v14, %v5623_v16  ;;  %4489 = vtanh.f32 %v1927_v24 }
 0x2d8   : > { %v4466_v20 = vpop.eup %4465  ;;  %v3823_v26 = vpack.c.bf16 %v4464_v12, %v4460_v15  ;;  %v3856_v29 = vadd.f32 %v3855_v25, %v3854_v19  ;;  %v1930_v30 = vpop.f32.mrb[98].mxu1 }
 0x2d9   : > { %v4468_v27 = vpop.eup %4467  ;;  %3286 = vst [vmem:[%s5441_s16 + $0x310] sm:$0xff] %v3822_v34  ;;  %v3857_v31 = vpop.f32.mrb[98].mxu0  ;;  %v1931_v39 = vadd.f32 %v1930_v30, %v5619_v7  ;;  %4491 = vtanh.f32 %v1929_v28 }
 0x2da   : > { %v4470_v32 = vpop.eup %4469  ;;  %3287 = vst [vmem:[%s5441_s16 + $0x318] sm:$0xff] %v3823_v26  ;;  %v1932_v40 = vpop.f32.mrb[99].mxu1  ;;  %v2120_v59 = vadd.f32 %v3856_v29, %v5626_v13 }
 0x2db   : > { %v3858_v43 = vpop.f32.mrb[99].mxu0  ;;  %v4472_v44 = vpop.eup %4471  ;;  %v3826_v45 = vpack.c.bf16 %v4470_v32, %v4466_v20  ;;  %v1933_v46 = vadd.f32 %v1932_v40, %v5623_v16  ;;  %4493 = vtanh.f32 %v1931_v39 }
 0x2dc   : > { %v4474_v47 = vpop.eup %4473  ;;  %v3827_v22 = vpack.c.bf16 %v4472_v44, %v4468_v27  ;;  %v3859_v48 = vadd.f32 %v3858_v43, %v3857_v31  ;;  %4495 = vtanh.f32 %v2120_v59  ;;  %v1936_v9 = vpop.f32.mrb[100].mxu1 }
 0x2dd   : > { %v4476_v49 = vpop.eup %4475  ;;  %3290 = vst [vmem:[%s5441_s16 + $0x32c] sm:$0xff] %v3826_v45  ;;  %4497 = vtanh.f32 %v1933_v46  ;;  %v3860_v61 = vpop.f32.mrb[100].mxu0  ;;  %v1937_v35 = vadd.f32 %v1936_v9, %v5619_v7 }
 0x2de   : > { %v4478_v56 = vpop.eup %4477  ;;  %3291 = vst [vmem:[%s5441_s16 + $0x334] sm:$0xff] %v3827_v22  ;;  %v2123_v50 = vadd.f32 %v3859_v48, %v5626_v13  ;;  %v1938_v37 = vpop.f32.mrb[101].mxu1 }
 0x2df   : > { %v4480_v51 = vpop.eup %4479  ;;  %v3830_v11 = vpack.c.bf16 %v4478_v56, %v4474_v47  ;;  %v3861_v41 = vpop.f32.mrb[101].mxu0  ;;  %v1939_v52 = vadd.f32 %v1938_v37, %v5623_v16 }
 0x2e0   : > { %v4482_v10 = vpop.eup %4481  ;;  %v3831_v0 = vpack.c.bf16 %v4480_v51, %v4476_v49  ;;  %4499 = vtanh.f32 %v2123_v50  ;;  %v3862_v53 = vadd.f32 %v3861_v41, %v3860_v61  ;;  %v1940_v54 = vpop.f32.mrb[102].mxu1 }
 0x2e1   : > { %v4484_v18 = vpop.eup %4483  ;;  %3294 = vst [vmem:[%s5441_s16 + $0x348] sm:$0xff] %v3830_v11  ;;  %v3863_v6 = vpop.f32.mrb[102].mxu0  ;;  %4501 = vtanh.f32 %v1937_v35  ;;  %v1941_v33 = vadd.f32 %v1940_v54, %v5619_v7 }
 0x2e2   : > { %v4486_v58 = vpop.eup %4485  ;;  %3295 = vst [vmem:[%s5441_s16 + $0x350] sm:$0xff] %v3831_v0  ;;  %v1942_v38 = vpop.f32.mrb[103].mxu1  ;;  %4503 = vtanh.f32 %v1939_v52  ;;  %v2128_v23 = vadd.f32 %v3862_v53, %v5626_v13 }
 0x2e3   : > { %v3864_v21 = vpop.f32.mrb[103].mxu0  ;;  %v4488_v42 = vpop.eup %4487  ;;  %v3834_v8 = vpack.c.bf16 %v4486_v58, %v4482_v10  ;;  %v1943_v1 = vadd.f32 %v1942_v38, %v5623_v16  ;;  %4505 = vtanh.f32 %v1941_v33 }
 0x2e4   : > { %v4490_v55 = vpop.eup %4489  ;;  %v3835_v2 = vpack.c.bf16 %v4488_v42, %v4484_v18  ;;  %v3865_v3 = vadd.f32 %v3864_v21, %v3863_v6  ;;  %4507 = vtanh.f32 %v2128_v23  ;;  %v1946_v15 = vpop.f32.mrb[104].mxu1 }
 0x2e5   : > { %v4492_v57 = vpop.eup %4491  ;;  %3298 = vst [vmem:[%s5441_s16 + $0x364] sm:$0xff] %v3834_v8  ;;  %4509 = vtanh.f32 %v1943_v1  ;;  %v3866_v36 = vpop.f32.mrb[104].mxu0  ;;  %v1947_v34 = vadd.f32 %v1946_v15, %v5619_v7 }
 0x2e6   : > { %v4494_v60 = vpop.eup %4493  ;;  %3299 = vst [vmem:[%s5441_s16 + $0x36c] sm:$0xff] %v3835_v2  ;;  %v3712_v63 = vpack.c.bf16 %v4492_v57, %v4490_v55  ;;  %v2131_v4 = vadd.f32 %v3865_v3, %v5626_v13  ;;  %v1948_v17 = vpop.f32.mrb[105].mxu1 }
 0x2e7   : > { %v4496_v62 = vpop.eup %4495  ;;  %v3867_v19 = vpop.f32.mrb[105].mxu0  ;;  %v1949_v26 = vadd.f32 %v1948_v17, %v5623_v16 }
 0x2e8   : > { %v4498_v5 = vpop.eup %4497  ;;  %3176 = vst [vmem:[%s5441_s16 + $0x10] sm:$0xff] %v3712_v63  ;;  %v3713_v12 = vpack.c.bf16 %v4496_v62, %v4496_v62  ;;  %4511 = vtanh.f32 %v2131_v4  ;;  %v3868_v24 = vadd.f32 %v3867_v19, %v3866_v36  ;;  %v1950_v14 = vpop.f32.mrb[106].mxu1 }
 0x2e9   : > { %v3716_v20 = vpack.c.bf16 %v4498_v5, %v4494_v60  ;;  %v3869_v25 = vpop.f32.mrb[106].mxu0  ;;  %4513 = vtanh.f32 %v1947_v34  ;;  %v1951_v28 = vadd.f32 %v1950_v14, %v5619_v7  ;;  %v1952_v29 = vpop.f32.mrb[107].mxu1 }
 0x2ea   : > { %v4500_v27 = vpop.eup %4499  ;;  %3177 = vst [vmem:[%s5441_s16 + $0x18] sm:$0xf] %v3713_v12  ;;  %v3870_v30 = vpop.f32.mrb[107].mxu0  ;;  %4515 = vtanh.f32 %v1949_v26  ;;  %v2136_v32 = vadd.f32 %v3868_v24, %v5626_v13  ;;  %v1953_v39 = vadd.f32 %v1952_v29, %v5623_v16 }
 0x2eb   : > { %3180 = vst [vmem:[%s5441_s16 + $0x2c] sm:$0xff] %v3716_v20  ;;  %v3717_v31 = vpack.c.bf16 %v4500_v27, %v4500_v27  ;;  %v4502_v40 = vpop.eup %4501  ;;  %4517 = vtanh.f32 %v1951_v28  ;;  %v3871_v43 = vadd.f32 %v3870_v30, %v3869_v25 }
 0x2ec   : > { %v4504_v44 = vpop.eup %4503  ;;  %4519 = vtanh.f32 %v2136_v32  ;;  %v1956_v22 = vpop.f32.mrb[108].mxu1 }
 0x2ed   : > { %3181 = vst [vmem:[%s5441_s16 + $0x34] sm:$0xf] %v3717_v31  ;;  %v4506_v45 = vpop.eup %4505  ;;  %v3720_v59 = vpack.c.bf16 %v4504_v44, %v4502_v40  ;;  %4521 = vtanh.f32 %v1953_v39  ;;  %v2139_v46 = vadd.f32 %v3871_v43, %v5626_v13  ;;  %v3872_v48 = vpop.f32.mrb[108].mxu0  ;;  %v1957_v50 = vadd.f32 %v1956_v22, %v5619_v7 }
 0x2ee   : > { %v4508_v47 = vpop.eup %4507  ;;  %v1958_v51 = vpop.f32.mrb[109].mxu1 }
 0x2ef   : > { %v4510_v49 = vpop.eup %4509  ;;  %3184 = vst [vmem:[%s5441_s16 + $0x48] sm:$0xff] %v3720_v59  ;;  %v3721_v56 = vpack.c.bf16 %v4508_v47, %v4508_v47  ;;  %4523 = vtanh.f32 %v2139_v46  ;;  %v3873_v11 = vpop.f32.mrb[109].mxu0  ;;  %v1959_v61 = vadd.f32 %v1958_v51, %v5623_v16 }
 0x2f0   : > { %v3724_v9 = vpack.c.bf16 %v4510_v49, %v4506_v45  ;;  %v3874_v10 = vadd.f32 %v3873_v11, %v3872_v48  ;;  %v1960_v0 = vpop.f32.mrb[110].mxu1  ;;  %v3875_v35 = vpop.f32.mrb[110].mxu0  ;;  %4525 = vtanh.f32 %v1957_v50 }
 0x2f1   : > { %3185 = vst [vmem:[%s5441_s16 + $0x50] sm:$0xf] %v3721_v56  ;;  %v1961_v41 = vadd.f32 %v1960_v0, %v5619_v7  ;;  %v1962_v18 = vpop.f32.mrb[111].mxu1  ;;  %v3876_v52 = vpop.f32.mrb[111].mxu0  ;;  %4527 = vtanh.f32 %v1959_v61 }
 0x2f2   : > { %v4512_v37 = vpop.eup %4511  ;;  %3188 = vst [vmem:[%s5441_s16 + $0x64] sm:$0xff] %v3724_v9  ;;  %v2144_v54 = vadd.f32 %v3874_v10, %v5626_v13  ;;  %v1963_v6 = vadd.f32 %v1962_v18, %v5623_v16  ;;  %v3877_v33 = vadd.f32 %v3876_v52, %v3875_v35 }
 0x2f3   : > { %v3725_v53 = vpack.c.bf16 %v4512_v37, %v4512_v37  ;;  %v4514_v58 = vpop.eup %4513  ;;  %4529 = vtanh.f32 %v1961_v41 }
 0x2f4   : > { %v4516_v38 = vpop.eup %4515  ;;  %4531 = vtanh.f32 %v2144_v54  ;;  %v2147_v8 = vadd.f32 %v3877_v33, %v5626_v13  ;;  %v1966_v1 = vpop.f32.mrb[112].mxu1 }
 0x2f5   : > { %3189 = vst [vmem:[%s5441_s16 + $0x6c] sm:$0xf] %v3725_v53  ;;  %v4518_v21 = vpop.eup %4517  ;;  %v3728_v42 = vpack.c.bf16 %v4516_v38, %v4514_v58  ;;  %4533 = vtanh.f32 %v1963_v6  ;;  %v3878_v55 = vpop.f32.mrb[112].mxu0  ;;  %v1967_v57 = vadd.f32 %v1966_v1, %v5619_v7 }
 0x2f6   : > { %v4520_v23 = vpop.eup %4519  ;;  %4535 = vtanh.f32 %v2147_v8  ;;  %v1968_v60 = vpop.f32.mrb[113].mxu1 }
 0x2f7   : > { %v4522_v2 = vpop.eup %4521  ;;  %3192 = vst [vmem:[%s5441_s16 + $0x80] sm:$0xff] %v3728_v42  ;;  %v3729_v3 = vpack.c.bf16 %v4520_v23, %v4520_v23  ;;  %v3879_v63 = vpop.f32.mrb[113].mxu0  ;;  %v1969_v62 = vadd.f32 %v1968_v60, %v5623_v16  ;;  %4537 = vtanh.f32 %v1967_v57 }
 0x2f8   : > { %v3732_v4 = vpack.c.bf16 %v4522_v2, %v4518_v21  ;;  %v3880_v15 = vadd.f32 %v3879_v63, %v3878_v55  ;;  %v1970_v36 = vpop.f32.mrb[114].mxu1  ;;  %v3881_v5 = vpop.f32.mrb[114].mxu0 }
 0x2f9   : > { %v4524_v12 = vpop.eup %4523  ;;  %3193 = vst [vmem:[%s5441_s16 + $0x88] sm:$0xf] %v3729_v3  ;;  %v1971_v34 = vadd.f32 %v1970_v36, %v5619_v7  ;;  %v1972_v17 = vpop.f32.mrb[115].mxu1  ;;  %4539 = vtanh.f32 %v1969_v62 }
 0x2fa   : > { %v3882_v19 = vpop.f32.mrb[115].mxu0  ;;  %3196 = vst [vmem:[%s5441_s16 + $0x9c] sm:$0xff] %v3732_v4  ;;  %v3733_v20 = vpack.c.bf16 %v4524_v12, %v4524_v12  ;;  %v2152_v26 = vadd.f32 %v3880_v15, %v5626_v13  ;;  %v1973_v24 = vadd.f32 %v1972_v17, %v5623_v16  ;;  %v4526_v14 = vpop.eup %4525 }
 0x2fb   : > { %4541 = vtanh.f32 %v1971_v34  ;;  %v3883_v25 = vadd.f32 %v3882_v19, %v3881_v5  ;;  %v4528_v27 = vpop.eup %4527 }
 0x2fc   : > { %3197 = vst [vmem:[%s5441_s16 + $0xa4] sm:$0xf] %v3733_v20  ;;  %4543 = vtanh.f32 %v2152_v26  ;;  %v3736_v29 = vpack.c.bf16 %v4528_v27, %v4526_v14  ;;  %v1976_v32 = vpop.f32.mrb[116].mxu1  ;;  %v3884_v39 = vpop.f32.mrb[116].mxu0 }
 0x2fd   : > { %v4530_v28 = vpop.eup %4529  ;;  %4545 = vtanh.f32 %v1973_v24  ;;  %v2155_v30 = vadd.f32 %v3883_v25, %v5626_v13  ;;  %v1977_v44 = vadd.f32 %v1976_v32, %v5619_v7  ;;  %v1978_v45 = vpop.f32.mrb[117].mxu1 }
 0x2fe   : > { %v4532_v31 = vpop.eup %4531  ;;  %3200 = vst [vmem:[%s5441_s16 + $0xb8] sm:$0xff] %v3736_v29  ;;  %v3885_v59 = vpop.f32.mrb[117].mxu0  ;;  %v1979_v47 = vadd.f32 %v1978_v45, %v5623_v16 }
 0x2ff   : > { %v4534_v40 = vpop.eup %4533  ;;  %v3737_v43 = vpack.c.bf16 %v4532_v31, %v4532_v31  ;;  %4547 = vtanh.f32 %v2155_v30  ;;  %v3886_v22 = vadd.f32 %v3885_v59, %v3884_v39  ;;  %v1980_v48 = vpop.f32.mrb[118].mxu1 }
 0x300   : > { %v3740_v46 = vpack.c.bf16 %v4534_v40, %v4530_v28  ;;  %v3887_v49 = vpop.f32.mrb[118].mxu0  ;;  %v4536_v56 = vpop.eup %4535  ;;  %4549 = vtanh.f32 %v1977_v44  ;;  %v1981_v50 = vadd.f32 %v1980_v48, %v5619_v7 }
 0x301   : > { %3201 = vst [vmem:[%s5441_s16 + $0xc0] sm:$0xf] %v3737_v43  ;;  %v1982_v51 = vpop.f32.mrb[119].mxu1  ;;  %v3888_v11 = vpop.f32.mrb[119].mxu0  ;;  %v3741_v9 = vpack.c.bf16 %v4536_v56, %v4536_v56  ;;  %4551 = vtanh.f32 %v1979_v47  ;;  %v2160_v61 = vadd.f32 %v3886_v22, %v5626_v13 }
 0x302   : > { %3204 = vst [vmem:[%s5441_s16 + $0xd4] sm:$0xff] %v3740_v46  ;;  %v1983_v10 = vadd.f32 %v1982_v51, %v5623_v16  ;;  %v4538_v0 = vpop.eup %4537  ;;  %4553 = vtanh.f32 %v1981_v50  ;;  %v3889_v35 = vadd.f32 %v3888_v11, %v3887_v49 }
 0x303   : > { %v4540_v37 = vpop.eup %4539  ;;  %3205 = vst [vmem:[%s5441_s16 + $0xdc] sm:$0xf] %v3741_v9  ;;  %4555 = vtanh.f32 %v2160_v61 }
 0x304   : > { %v3744_v18 = vpack.c.bf16 %v4540_v37, %v4538_v0  ;;  %4557 = vtanh.f32 %v1983_v10  ;;  %v2163_v52 = vadd.f32 %v3889_v35, %v5626_v13  ;;  %v1986_v54 = vpop.f32.mrb[120].mxu1  ;;  %v3890_v6 = vpop.f32.mrb[120].mxu0 }
 0x305   : > { %v4542_v41 = vpop.eup %4541  ;;  %v1987_v38 = vadd.f32 %v1986_v54, %v5619_v7  ;;  %v1988_v21 = vpop.f32.mrb[121].mxu1 }
 0x306   : > { %v4544_v53 = vpop.eup %4543  ;;  %3208 = vst [vmem:[%s5441_s16 + $0xf0] sm:$0xff] %v3744_v18  ;;  %4559 = vtanh.f32 %v2163_v52  ;;  %v3891_v42 = vpop.f32.mrb[121].mxu0  ;;  %v1989_v23 = vadd.f32 %v1988_v21, %v5623_v16 }
 0x307   : > { %v4546_v58 = vpop.eup %4545  ;;  %v3745_v33 = vpack.c.bf16 %v4544_v53, %v4544_v53  ;;  %v3892_v1 = vadd.f32 %v3891_v42, %v3890_v6  ;;  %v1990_v55 = vpop.f32.mrb[122].mxu1  ;;  %4561 = vtanh.f32 %v1987_v38 }
 0x308   : > { %v3748_v8 = vpack.c.bf16 %v4546_v58, %v4542_v41  ;;  %v3893_v2 = vpop.f32.mrb[122].mxu0  ;;  %v1991_v57 = vadd.f32 %v1990_v55, %v5619_v7  ;;  %v1992_v60 = vpop.f32.mrb[123].mxu1  ;;  %4563 = vtanh.f32 %v1989_v23 }
 0x309   : > { %v4548_v3 = vpop.eup %4547  ;;  %3209 = vst [vmem:[%s5441_s16 + $0xf8] sm:$0xf] %v3745_v33  ;;  %v3894_v63 = vpop.f32.mrb[123].mxu0  ;;  %v2168_v62 = vadd.f32 %v3892_v1, %v5626_v13  ;;  %v1993_v15 = vadd.f32 %v1992_v60, %v5623_v16 }
 0x30a   : > { %3212 = vst [vmem:[%s5441_s16 + $0x10c] sm:$0xff] %v3748_v8  ;;  %v3749_v4 = vpack.c.bf16 %v4548_v3, %v4548_v3  ;;  %v4550_v36 = vpop.eup %4549  ;;  %4565 = vtanh.f32 %v1991_v57  ;;  %v3895_v5 = vadd.f32 %v3894_v63, %v3893_v2 }
 0x30b   : > { %v4552_v12 = vpop.eup %4551  ;;  %4567 = vtanh.f32 %v2168_v62 }
 0x30c   : > { %3213 = vst [vmem:[%s5441_s16 + $0x114] sm:$0xf] %v3749_v4  ;;  %v4554_v34 = vpop.eup %4553  ;;  %v3752_v17 = vpack.c.bf16 %v4552_v12, %v4550_v36  ;;  %4569 = vtanh.f32 %v1993_v15  ;;  %v2171_v19 = vadd.f32 %v3895_v5, %v5626_v13  ;;  %v1996_v26 = vpop.f32.mrb[124].mxu1 }
 0x30d   : > { %v4556_v20 = vpop.eup %4555  ;;  %v3896_v24 = vpop.f32.mrb[124].mxu0  ;;  %v1997_v27 = vadd.f32 %v1996_v26, %v5619_v7 }
 0x30e   : > { %v4558_v14 = vpop.eup %4557  ;;  %3216 = vst [vmem:[%s5441_s16 + $0x128] sm:$0xff] %v3752_v17  ;;  %v3753_v25 = vpack.c.bf16 %v4556_v20, %v4556_v20  ;;  %4571 = vtanh.f32 %v2171_v19  ;;  %v1998_v28 = vpop.f32.mrb[125].mxu1 }
 0x30f   : > { %v3897_v29 = vpop.f32.mrb[125].mxu0  ;;  %v3756_v30 = vpack.c.bf16 %v4558_v14, %v4554_v34  ;;  %v1999_v31 = vadd.f32 %v1998_v28, %v5623_v16  ;;  %v2000_v39 = vpop.f32.mrb[126].mxu1  ;;  %4573 = vtanh.f32 %v1997_v27 }
 0x310   : > { %v3898_v32 = vadd.f32 %v3897_v29, %v3896_v24  ;;  %v3899_v40 = vpop.f32.mrb[126].mxu0  ;;  %v4560_v43 = vpop.eup %4559  ;;  %3217 = vst [vmem:[%s5441_s16 + $0x130] sm:$0xf] %v3753_v25  ;;  %v2001_v44 = vadd.f32 %v2000_v39, %v5619_v7 }
 0x311   : > { %v2002_v45 = vpop.f32.mrb[127].mxu1  ;;  %v3900_v59 = vpop.f32.mrb[127].mxu0  ;;  %3220 = vst [vmem:[%s5441_s16 + $0x144] sm:$0xff] %v3756_v30  ;;  %v3757_v46 = vpack.c.bf16 %v4560_v43, %v4560_v43  ;;  %4575 = vtanh.f32 %v1999_v31 }
 0x312   : > { %v2176_v47 = vadd.f32 %v3898_v32, %v5626_v13  ;;  %v2003_v22 = vadd.f32 %v2002_v45, %v5623_v16  ;;  %v4562_v48 = vpop.eup %4561  ;;  %4577 = vtanh.f32 %v2001_v44  ;;  %v3901_v49 = vadd.f32 %v3900_v59, %v3899_v40 }
 0x313   : > { %v4564_v56 = vpop.eup %4563  ;;  %3221 = vst [vmem:[%s5441_s16 + $0x14c] sm:$0xf] %v3757_v46 }
 0x314   : > { %4579 = vtanh.f32 %v2176_v47  ;;  %v4566_v50 = vpop.eup %4565  ;;  %v3760_v51 = vpack.c.bf16 %v4564_v56, %v4562_v48  ;;  %v2179_v11 = vadd.f32 %v3901_v49, %v5626_v13  ;;  %v2006_v61 = vpop.f32.mrb[128].mxu1 }
 0x315   : > { %4581 = vtanh.f32 %v2003_v22  ;;  %v4568_v9 = vpop.eup %4567  ;;  %v3902_v10 = vpop.f32.mrb[128].mxu0  ;;  %v2007_v37 = vadd.f32 %v2006_v61, %v5619_v7 }
 0x316   : > { %v4570_v0 = vpop.eup %4569  ;;  %3224 = vst [vmem:[%s5441_s16 + $0x160] sm:$0xff] %v3760_v51  ;;  %v3761_v35 = vpack.c.bf16 %v4568_v9, %v4568_v9  ;;  %4583 = vtanh.f32 %v2179_v11  ;;  %v2008_v41 = vpop.f32.mrb[129].mxu1 }
 0x317   : > { %v3903_v18 = vpop.f32.mrb[129].mxu0  ;;  %v3764_v52 = vpack.c.bf16 %v4570_v0, %v4566_v50  ;;  %v2009_v53 = vadd.f32 %v2008_v41, %v5623_v16  ;;  %v2010_v6 = vpop.f32.mrb[130].mxu1  ;;  %4585 = vtanh.f32 %v2007_v37 }
 0x318   : > { %v3904_v54 = vadd.f32 %v3903_v18, %v3902_v10  ;;  %v3905_v58 = vpop.f32.mrb[130].mxu0  ;;  %v4572_v33 = vpop.eup %4571  ;;  %3225 = vst [vmem:[%s5441_s16 + $0x168] sm:$0xf] %v3761_v35  ;;  %v2011_v38 = vadd.f32 %v2010_v6, %v5619_v7 }
 0x319   : > { %v2012_v21 = vpop.f32.mrb[131].mxu1  ;;  %v3906_v42 = vpop.f32.mrb[131].mxu0  ;;  %3228 = vst [vmem:[%s5441_s16 + $0x17c] sm:$0xff] %v3764_v52  ;;  %v3765_v8 = vpack.c.bf16 %v4572_v33, %v4572_v33  ;;  %4587 = vtanh.f32 %v2009_v53 }
 0x31a   : > { %v2184_v23 = vadd.f32 %v3904_v54, %v5626_v13  ;;  %v2013_v1 = vadd.f32 %v2012_v21, %v5623_v16  ;;  %v4574_v55 = vpop.eup %4573  ;;  %4589 = vtanh.f32 %v2011_v38  ;;  %v3907_v2 = vadd.f32 %v3906_v42, %v3905_v58 }
 0x31b   : > { %v4576_v3 = vpop.eup %4575  ;;  %3229 = vst [vmem:[%s5441_s16 + $0x184] sm:$0xf] %v3765_v8 }
 0x31c   : > { %4591 = vtanh.f32 %v2184_v23  ;;  %v4578_v57 = vpop.eup %4577  ;;  %v3768_v60 = vpack.c.bf16 %v4576_v3, %v4574_v55  ;;  %v2187_v63 = vadd.f32 %v3907_v2, %v5626_v13  ;;  %v2016_v62 = vpop.f32.mrb[132].mxu1 }
 0x31d   : > { %4593 = vtanh.f32 %v2013_v1  ;;  %v3908_v15 = vpop.f32.mrb[132].mxu0  ;;  %v2017_v12 = vadd.f32 %v2016_v62, %v5619_v7  ;;  %v2018_v34 = vpop.f32.mrb[133].mxu1 }
 0x31e   : > { %v4580_v4 = vpop.eup %4579  ;;  %3232 = vst [vmem:[%s5441_s16 + $0x198] sm:$0xff] %v3768_v60  ;;  %4595 = vtanh.f32 %v2187_v63  ;;  %v3909_v17 = vpop.f32.mrb[133].mxu0  ;;  %v2019_v20 = vadd.f32 %v2018_v34, %v5623_v16 }
 0x31f   : > { %v4582_v36 = vpop.eup %4581  ;;  %v3769_v5 = vpack.c.bf16 %v4580_v4, %v4580_v4  ;;  %v3910_v26 = vadd.f32 %v3909_v17, %v3908_v15  ;;  %v2020_v24 = vpop.f32.mrb[134].mxu1  ;;  %4597 = vtanh.f32 %v2017_v12 }
 0x320   : > { %v3772_v19 = vpack.c.bf16 %v4582_v36, %v4578_v57  ;;  %v3911_v14 = vpop.f32.mrb[134].mxu0  ;;  %v4584_v25 = vpop.eup %4583  ;;  %v2021_v27 = vadd.f32 %v2020_v24, %v5619_v7  ;;  %4599 = vtanh.f32 %v2019_v20 }
 0x321   : > { %3233 = vst [vmem:[%s5441_s16 + $0x1a0] sm:$0xf] %v3769_v5  ;;  %v2022_v28 = vpop.f32.mrb[135].mxu1  ;;  %v3912_v29 = vpop.f32.mrb[135].mxu0  ;;  %v3773_v30 = vpack.c.bf16 %v4584_v25, %v4584_v25  ;;  %v2192_v31 = vadd.f32 %v3910_v26, %v5626_v13 }
 0x322   : > { %3236 = vst [vmem:[%s5441_s16 + $0x1b4] sm:$0xff] %v3772_v19  ;;  %v2023_v32 = vadd.f32 %v2022_v28, %v5623_v16  ;;  %v4586_v39 = vpop.eup %4585  ;;  %4601 = vtanh.f32 %v2021_v27  ;;  %v3913_v40 = vadd.f32 %v3912_v29, %v3911_v14 }
 0x323   : > { %v4588_v43 = vpop.eup %4587  ;;  %3237 = vst [vmem:[%s5441_s16 + $0x1bc] sm:$0xf] %v3773_v30  ;;  %4603 = vtanh.f32 %v2192_v31 }
 0x324   : > { %v4590_v44 = vpop.eup %4589  ;;  %v3776_v45 = vpack.c.bf16 %v4588_v43, %v4586_v39  ;;  %4605 = vtanh.f32 %v2023_v32  ;;  %v2195_v59 = vadd.f32 %v3913_v40, %v5626_v13  ;;  %v2026_v47 = vpop.f32.mrb[136].mxu1 }
 0x325   : > { %v3914_v22 = vpop.f32.mrb[136].mxu0  ;;  %v2027_v56 = vadd.f32 %v2026_v47, %v5619_v7  ;;  %v2028_v50 = vpop.f32.mrb[137].mxu1 }
 0x326   : > { %v4592_v46 = vpop.eup %4591  ;;  %3240 = vst [vmem:[%s5441_s16 + $0x1d0] sm:$0xff] %v3776_v45  ;;  %4607 = vtanh.f32 %v2195_v59  ;;  %v3915_v51 = vpop.f32.mrb[137].mxu0  ;;  %v2029_v9 = vadd.f32 %v2028_v50, %v5623_v16 }
 0x327   : > { %v4594_v48 = vpop.eup %4593  ;;  %v3777_v49 = vpack.c.bf16 %v4592_v46, %v4592_v46  ;;  %v3916_v61 = vadd.f32 %v3915_v51, %v3914_v22  ;;  %v2030_v10 = vpop.f32.mrb[138].mxu1  ;;  %4609 = vtanh.f32 %v2027_v56 }
 0x328   : > { %v3780_v11 = vpack.c.bf16 %v4594_v48, %v4590_v44  ;;  %v3917_v0 = vpop.f32.mrb[138].mxu0  ;;  %v4596_v35 = vpop.eup %4595  ;;  %v2031_v37 = vadd.f32 %v2030_v10, %v5619_v7  ;;  %4611 = vtanh.f32 %v2029_v9 }
 0x329   : > { %3241 = vst [vmem:[%s5441_s16 + $0x1d8] sm:$0xf] %v3777_v49  ;;  %v2032_v41 = vpop.f32.mrb[139].mxu1  ;;  %v3918_v18 = vpop.f32.mrb[139].mxu0  ;;  %v3781_v52 = vpack.c.bf16 %v4596_v35, %v4596_v35  ;;  %v2200_v53 = vadd.f32 %v3916_v61, %v5626_v13 }
 0x32a   : > { %3244 = vst [vmem:[%s5441_s16 + $0x1ec] sm:$0xff] %v3780_v11  ;;  %v2033_v54 = vadd.f32 %v2032_v41, %v5623_v16  ;;  %v4598_v6 = vpop.eup %4597  ;;  %4613 = vtanh.f32 %v2031_v37  ;;  %v3919_v58 = vadd.f32 %v3918_v18, %v3917_v0 }
 0x32b   : > { %v4600_v33 = vpop.eup %4599  ;;  %3245 = vst [vmem:[%s5441_s16 + $0x1f4] sm:$0xf] %v3781_v52  ;;  %4615 = vtanh.f32 %v2200_v53 }
 0x32c   : > { %v4602_v38 = vpop.eup %4601  ;;  %v3784_v21 = vpack.c.bf16 %v4600_v33, %v4598_v6  ;;  %4617 = vtanh.f32 %v2033_v54  ;;  %v2203_v42 = vadd.f32 %v3919_v58, %v5626_v13  ;;  %v2036_v23 = vpop.f32.mrb[140].mxu1 }
 0x32d   : > { %v4604_v8 = vpop.eup %4603  ;;  %v3920_v1 = vpop.f32.mrb[140].mxu0  ;;  %v2037_v3 = vadd.f32 %v2036_v23, %v5619_v7 }
 0x32e   : > { %v4606_v55 = vpop.eup %4605  ;;  %3248 = vst [vmem:[%s5441_s16 + $0x208] sm:$0xff] %v3784_v21  ;;  %v3785_v2 = vpack.c.bf16 %v4604_v8, %v4604_v8  ;;  %4619 = vtanh.f32 %v2203_v42  ;;  %v2038_v57 = vpop.f32.mrb[141].mxu1 }
 0x32f   : > { %v3921_v60 = vpop.f32.mrb[141].mxu0  ;;  %v3788_v63 = vpack.c.bf16 %v4606_v55, %v4602_v38  ;;  %v2039_v4 = vadd.f32 %v2038_v57, %v5623_v16  ;;  %v2040_v15 = vpop.f32.mrb[142].mxu1  ;;  %4621 = vtanh.f32 %v2037_v3 }
 0x330   : > { %v3922_v62 = vadd.f32 %v3921_v60, %v3920_v1  ;;  %v3923_v36 = vpop.f32.mrb[142].mxu0  ;;  %v4608_v5 = vpop.eup %4607  ;;  %3249 = vst [vmem:[%s5441_s16 + $0x210] sm:$0xf] %v3785_v2  ;;  %v2041_v12 = vadd.f32 %v2040_v15, %v5619_v7 }
 0x331   : > { %v2042_v34 = vpop.f32.mrb[143].mxu1  ;;  %v3924_v17 = vpop.f32.mrb[143].mxu0  ;;  %3252 = vst [vmem:[%s5441_s16 + $0x224] sm:$0xff] %v3788_v63  ;;  %v3789_v19 = vpack.c.bf16 %v4608_v5, %v4608_v5  ;;  %4623 = vtanh.f32 %v2039_v4 }
 0x332   : > { %v2208_v20 = vadd.f32 %v3922_v62, %v5626_v13  ;;  %v2043_v26 = vadd.f32 %v2042_v34, %v5623_v16  ;;  %v4610_v24 = vpop.eup %4609  ;;  %4625 = vtanh.f32 %v2041_v12  ;;  %v3925_v14 = vadd.f32 %v3924_v17, %v3923_v36 }
 0x333   : > { %v4612_v25 = vpop.eup %4611  ;;  %3253 = vst [vmem:[%s5441_s16 + $0x22c] sm:$0xf] %v3789_v19 }
 0x334   : > { %4627 = vtanh.f32 %v2208_v20  ;;  %v4614_v27 = vpop.eup %4613  ;;  %v3792_v28 = vpack.c.bf16 %v4612_v25, %v4610_v24  ;;  %v2211_v29 = vadd.f32 %v3925_v14, %v5626_v13  ;;  %v2046_v31 = vpop.f32.mrb[144].mxu1 }
 0x335   : > { %4629 = vtanh.f32 %v2043_v26  ;;  %v4616_v30 = vpop.eup %4615  ;;  %v3926_v32 = vpop.f32.mrb[144].mxu0  ;;  %v2047_v43 = vadd.f32 %v2046_v31, %v5619_v7 }
 0x336   : > { %v4618_v39 = vpop.eup %4617  ;;  %3256 = vst [vmem:[%s5441_s16 + $0x240] sm:$0xff] %v3792_v28  ;;  %v3793_v40 = vpack.c.bf16 %v4616_v30, %v4616_v30  ;;  %4631 = vtanh.f32 %v2211_v29  ;;  %v2048_v44 = vpop.f32.mrb[145].mxu1 }
 0x337   : > { %v3927_v45 = vpop.f32.mrb[145].mxu0  ;;  %v3796_v59 = vpack.c.bf16 %v4618_v39, %v4614_v27  ;;  %v2049_v46 = vadd.f32 %v2048_v44, %v5623_v16  ;;  %v2050_v22 = vpop.f32.mrb[146].mxu1  ;;  %4633 = vtanh.f32 %v2047_v43 }
 0x338   : > { %v3928_v47 = vadd.f32 %v3927_v45, %v3926_v32  ;;  %v3929_v48 = vpop.f32.mrb[146].mxu0  ;;  %v4620_v49 = vpop.eup %4619  ;;  %3257 = vst [vmem:[%s5441_s16 + $0x248] sm:$0xf] %v3793_v40  ;;  %v2051_v56 = vadd.f32 %v2050_v22, %v5619_v7 }
 0x339   : > { %v2052_v50 = vpop.f32.mrb[147].mxu1  ;;  %v3930_v51 = vpop.f32.mrb[147].mxu0  ;;  %3260 = vst [vmem:[%s5441_s16 + $0x25c] sm:$0xff] %v3796_v59  ;;  %v3797_v11 = vpack.c.bf16 %v4620_v49, %v4620_v49  ;;  %4635 = vtanh.f32 %v2049_v46 }
 0x33a   : > { %v2216_v9 = vadd.f32 %v3928_v47, %v5626_v13  ;;  %v2053_v61 = vadd.f32 %v2052_v50, %v5623_v16  ;;  %v4622_v10 = vpop.eup %4621  ;;  %4637 = vtanh.f32 %v2051_v56  ;;  %v3931_v0 = vadd.f32 %v3930_v51, %v3929_v48 }
 0x33b   : > { %v4624_v35 = vpop.eup %4623  ;;  %3261 = vst [vmem:[%s5441_s16 + $0x264] sm:$0xf] %v3797_v11 }
 0x33c   : > { %4639 = vtanh.f32 %v2216_v9  ;;  %v4626_v37 = vpop.eup %4625  ;;  %v3800_v41 = vpack.c.bf16 %v4624_v35, %v4622_v10  ;;  %v2219_v18 = vadd.f32 %v3931_v0, %v5626_v13  ;;  %v2056_v53 = vpop.f32.mrb[148].mxu1 }
 0x33d   : > { %4641 = vtanh.f32 %v2053_v61  ;;  %v3932_v54 = vpop.f32.mrb[148].mxu0  ;;  %v2057_v33 = vadd.f32 %v2056_v53, %v5619_v7  ;;  %v2058_v38 = vpop.f32.mrb[149].mxu1 }
 0x33e   : > { %v4628_v52 = vpop.eup %4627  ;;  %3264 = vst [vmem:[%s5441_s16 + $0x278] sm:$0xff] %v3800_v41  ;;  %4643 = vtanh.f32 %v2219_v18  ;;  %v3933_v21 = vpop.f32.mrb[149].mxu0  ;;  %v2059_v8 = vadd.f32 %v2058_v38, %v5623_v16 }
 0x33f   : > { %v4630_v6 = vpop.eup %4629  ;;  %v3801_v58 = vpack.c.bf16 %v4628_v52, %v4628_v52  ;;  %v3934_v23 = vadd.f32 %v3933_v21, %v3932_v54  ;;  %v2060_v1 = vpop.f32.mrb[150].mxu1  ;;  %4645 = vtanh.f32 %v2057_v33 }
 0x340   : > { %v3804_v42 = vpack.c.bf16 %v4630_v6, %v4626_v37  ;;  %v3935_v55 = vpop.f32.mrb[150].mxu0  ;;  %v4632_v2 = vpop.eup %4631  ;;  %v2061_v3 = vadd.f32 %v2060_v1, %v5619_v7  ;;  %4647 = vtanh.f32 %v2059_v8 }
 0x341   : > { %3265 = vst [vmem:[%s5441_s16 + $0x280] sm:$0xf] %v3801_v58  ;;  %v2062_v57 = vpop.f32.mrb[151].mxu1  ;;  %v3936_v60 = vpop.f32.mrb[151].mxu0  ;;  %v3805_v63 = vpack.c.bf16 %v4632_v2, %v4632_v2  ;;  %v2224_v4 = vadd.f32 %v3934_v23, %v5626_v13 }
 0x342   : > { %3268 = vst [vmem:[%s5441_s16 + $0x294] sm:$0xff] %v3804_v42  ;;  %v2063_v62 = vadd.f32 %v2062_v57, %v5623_v16  ;;  %v4634_v15 = vpop.eup %4633  ;;  %4649 = vtanh.f32 %v2061_v3  ;;  %v3937_v36 = vadd.f32 %v3936_v60, %v3935_v55 }
 0x343   : > { %v4636_v5 = vpop.eup %4635  ;;  %3269 = vst [vmem:[%s5441_s16 + $0x29c] sm:$0xf] %v3805_v63  ;;  %4651 = vtanh.f32 %v2224_v4 }
 0x344   : > { %v4638_v12 = vpop.eup %4637  ;;  %v3808_v34 = vpack.c.bf16 %v4636_v5, %v4634_v15  ;;  %4653 = vtanh.f32 %v2063_v62  ;;  %v2227_v17 = vadd.f32 %v3937_v36, %v5626_v13  ;;  %v2066_v20 = vpop.f32.mrb[152].mxu1 }
 0x345   : > { %v3938_v26 = vpop.f32.mrb[152].mxu0  ;;  %v2067_v25 = vadd.f32 %v2066_v20, %v5619_v7  ;;  %v2068_v27 = vpop.f32.mrb[153].mxu1 }
 0x346   : > { %v4640_v19 = vpop.eup %4639  ;;  %3272 = vst [vmem:[%s5441_s16 + $0x2b0] sm:$0xff] %v3808_v34  ;;  %4655 = vtanh.f32 %v2227_v17  ;;  %v3939_v28 = vpop.f32.mrb[153].mxu0  ;;  %v2069_v30 = vadd.f32 %v2068_v27, %v5623_v16 }
 0x347   : > { %v4642_v24 = vpop.eup %4641  ;;  %v3809_v14 = vpack.c.bf16 %v4640_v19, %v4640_v19  ;;  %v3940_v31 = vadd.f32 %v3939_v28, %v3938_v26  ;;  %v2070_v32 = vpop.f32.mrb[154].mxu1  ;;  %4657 = vtanh.f32 %v2067_v25 }
 0x348   : > { %v3812_v29 = vpack.c.bf16 %v4642_v24, %v4638_v12  ;;  %v3941_v39 = vpop.f32.mrb[154].mxu0  ;;  %v4644_v40 = vpop.eup %4643  ;;  %v2071_v43 = vadd.f32 %v2070_v32, %v5619_v7  ;;  %4659 = vtanh.f32 %v2069_v30 }
 0x349   : > { %3273 = vst [vmem:[%s5441_s16 + $0x2b8] sm:$0xf] %v3809_v14  ;;  %v2072_v44 = vpop.f32.mrb[155].mxu1  ;;  %v3942_v45 = vpop.f32.mrb[155].mxu0  ;;  %v3813_v59 = vpack.c.bf16 %v4644_v40, %v4644_v40  ;;  %v2232_v46 = vadd.f32 %v3940_v31, %v5626_v13 }
 0x34a   : > { %3276 = vst [vmem:[%s5441_s16 + $0x2cc] sm:$0xff] %v3812_v29  ;;  %v2073_v47 = vadd.f32 %v2072_v44, %v5623_v16  ;;  %v4646_v22 = vpop.eup %4645  ;;  %4661 = vtanh.f32 %v2071_v43  ;;  %v3943_v48 = vadd.f32 %v3942_v45, %v3941_v39 }
 0x34b   : > { %v4648_v49 = vpop.eup %4647  ;;  %3277 = vst [vmem:[%s5441_s16 + $0x2d4] sm:$0xf] %v3813_v59  ;;  %4663 = vtanh.f32 %v2232_v46 }
 0x34c   : > { %v4650_v56 = vpop.eup %4649  ;;  %v3816_v50 = vpack.c.bf16 %v4648_v49, %v4646_v22  ;;  %4665 = vtanh.f32 %v2073_v47  ;;  %v2235_v51 = vadd.f32 %v3943_v48, %v5626_v13  ;;  %v2076_v9 = vpop.f32.mrb[156].mxu1 }
 0x34d   : > { %v4652_v11 = vpop.eup %4651  ;;  %v3944_v61 = vpop.f32.mrb[156].mxu0  ;;  %v2077_v35 = vadd.f32 %v2076_v9, %v5619_v7 }
 0x34e   : > { %v4654_v10 = vpop.eup %4653  ;;  %3280 = vst [vmem:[%s5441_s16 + $0x2e8] sm:$0xff] %v3816_v50  ;;  %v3817_v0 = vpack.c.bf16 %v4652_v11, %v4652_v11  ;;  %4667 = vtanh.f32 %v2235_v51  ;;  %v2078_v37 = vpop.f32.mrb[157].mxu1 }
 0x34f   : > { %v3945_v41 = vpop.f32.mrb[157].mxu0  ;;  %v3820_v18 = vpack.c.bf16 %v4654_v10, %v4650_v56  ;;  %v2079_v52 = vadd.f32 %v2078_v37, %v5623_v16  ;;  %v2080_v54 = vpop.f32.mrb[158].mxu1  ;;  %4669 = vtanh.f32 %v2077_v35 }
 0x350   : > { %v3946_v53 = vadd.f32 %v3945_v41, %v3944_v61  ;;  %v3947_v6 = vpop.f32.mrb[158].mxu0  ;;  %v4656_v58 = vpop.eup %4655  ;;  %3281 = vst [vmem:[%s5441_s16 + $0x2f0] sm:$0xf] %v3817_v0  ;;  %v2081_v33 = vadd.f32 %v2080_v54, %v5619_v7 }
 0x351   : > { %v2082_v38 = vpop.f32.mrb[159].mxu1  ;;  %v3948_v21 = vpop.f32.mrb[159].mxu0  ;;  %3284 = vst [vmem:[%s5441_s16 + $0x304] sm:$0xff] %v3820_v18  ;;  %v3821_v42 = vpack.c.bf16 %v4656_v58, %v4656_v58  ;;  %4671 = vtanh.f32 %v2079_v52 }
 0x352   : > { %v2240_v8 = vadd.f32 %v3946_v53, %v5626_v13  ;;  %v2083_v23 = vadd.f32 %v2082_v38, %v5623_v16  ;;  %v4658_v1 = vpop.eup %4657  ;;  %4673 = vtanh.f32 %v2081_v33  ;;  %v3949_v55 = vadd.f32 %v3948_v21, %v3947_v6 }
 0x353   : > { %v4660_v2 = vpop.eup %4659  ;;  %3285 = vst [vmem:[%s5441_s16 + $0x30c] sm:$0xf] %v3821_v42 }
 0x354   : > { %4675 = vtanh.f32 %v2240_v8  ;;  %v4662_v3 = vpop.eup %4661  ;;  %v3824_v7 = vpack.c.bf16 %v4660_v2, %v4658_v1  ;;  %v2243_v57 = vadd.f32 %v3949_v55, %v5626_v13 }
 0x355   : > { %4677 = vtanh.f32 %v2083_v23  ;;  %v4664_v60 = vpop.eup %4663 }
 0x356   : > { %v4666_v63 = vpop.eup %4665  ;;  %3288 = vst [vmem:[%s5441_s16 + $0x320] sm:$0xff] %v3824_v7  ;;  %v3825_v16 = vpack.c.bf16 %v4664_v60, %v4664_v60  ;;  %4679 = vtanh.f32 %v2243_v57 }
 0x357   : > { %v3828_v4 = vpack.c.bf16 %v4666_v63, %v4662_v3 }
 0x358   : > { %v4668_v62 = vpop.eup %4667  ;;  %3289 = vst [vmem:[%s5441_s16 + $0x328] sm:$0xf] %v3825_v16 }
 0x359   : > { %3292 = vst [vmem:[%s5441_s16 + $0x33c] sm:$0xff] %v3828_v4  ;;  %v3829_v15 = vpack.c.bf16 %v4668_v62, %v4668_v62  ;;  %v4670_v36 = vpop.eup %4669 }
 0x35b   : > { %v4672_v5 = vpop.eup %4671  ;;  %3293 = vst [vmem:[%s5441_s16 + $0x344] sm:$0xf] %v3829_v15 }
 0x35c   : > { %v4674_v13 = vpop.eup %4673  ;;  %v3832_v12 = vpack.c.bf16 %v4672_v5, %v4670_v36 }
 0x35e   : > { %v4676_v34 = vpop.eup %4675  ;;  %3296 = vst [vmem:[%s5441_s16 + $0x358] sm:$0xff] %v3832_v12 }
 0x35f   : > { %v4678_v17 = vpop.eup %4677  ;;  %v3833_v19 = vpack.c.bf16 %v4676_v34, %v4676_v34 }
 0x360   : > { %v3836_v20 = vpack.c.bf16 %v4678_v17, %v4674_v13  ;;  %v4680_v26 = vpop.eup %4679 }
 0x361   : > { %3297 = vst [vmem:[%s5441_s16 + $0x360] sm:$0xf] %v3833_v19  ;;  %v3837_v24 = vpack.c.bf16 %v4680_v26, %v4680_v26 }
 0x362   : > { %3300 = vst [vmem:[%s5441_s16 + $0x374] sm:$0xff] %v3836_v20 }
 0x363   : > { %3301 = vst [vmem:[%s5441_s16 + $0x37c] sm:$0xf] %v3837_v24 }
 0x364   : > { %4807 = shalt.err (!%p4804_p1)
}
 0x365   : > { %s4808_s1 = scalar_lea.hbm %s5799_s11, 14336  ;;  %s4812_s23 = scalar_lea.hbm %s5853_s5, 57344 }
 0x366   : > { %p4809_p0 = scmp.ne.s32.totalorder %s5799_s11, %s4808_s1  ;;  %p4813_p9 = scmp.lt.u32.totalorder %s5799_s11, %s5853_s5 }
 0x367   : > { %p4814_p12 = scmp.lt.u32.totalorder %s4812_s23, %s4808_s1  ;;  %p4816_p2 = scmp.lt.u32.totalorder %s4808_s1, %s5799_s11 }
 0x368   : > { %p4810_p6 = pnand %p4809_p0, %p5871_p3 }
 0x369   : > { %p4815_p10 = por %p4814_p12, %p4813_p9 }
 0x36a   : > { %p4811_p5 = pneg %p4810_p6 }
 0x36b   : > { %p4817_p4 = por %p4816_p2, %p4815_p10 }
 0x36d   : > { %p4818_p7 = pnand %p4817_p4, %p4811_p5 }
 0x36f   : > { %4821 = shalt.err (!%p4818_p7)
}
 0x370   : > { %s4880_s15 = smov 448   ;;  %s4881_s16 = smov 28  }
 0x371   : > { %3982 = dma.vmem_to_hbm [thread:$0]  (%p5871_p3), %s5802_s25, 14336, %s5799_s11, %s5807_s22, %s4880_s15, %s4880_s15, %s4881_s16  }
 0x372 PF: > { %p4009_p8 = scmp.ge.s32.totalorder %s4868_s21, 2  ;;  %s3332_s17 = sand.u32 1, %s4856_s18  }
 0x373   : > { %p5872_p11 = scmp.ne.s32.totalorder %s5859_s29, 0  ;;  %s3333_s26 = scalar_lea.sflag [#allocation4], %s3332_s17 }
 0x375   : > { %p3998_p13 = pnand %p4009_p8, %p5872_p11 }
 0x377   : > { %4851 = dma.done.wait (!%p3998_p13), %s3333_s26, 14336  }
 0x378   : > { %4853 = vsyncadd (!%p3998_p13), %s3333_s26, 4294952960  ;;  %p18_p1 = scmp.ge.s32.totalorder %s4937_s24, 6   ;;  %s5873_s18 = smov %s4860_s19 }
 0x379   : > { %s5874_s19 = smov %s4864_s20  ;;  %s5875_s20 = smov %s4948_s27 }
 0x37a   : > { %s5876_s21 = smov %s4937_s24  ;;  %20 = sbr.rel (!%p18_p1) target bundleno = 8 (0x8), region = 92 }
 0x381   :  { %3338 = vsyncpa [#allocation3], 1 }
 0x382   :  { %3340 = vsyncpa [#allocation3 + $0x1], 1 }
 0x383   :  { %3341 = vsyncpa [#allocation6], 1 }
 0x384   :  { %3342 = vsyncpa [#allocation9], 1 }
 0x385   :  { %3343 = vsyncpa [#allocation4], 1 }
 0x386   :  { %3345 = vsyncpa [#allocation4 + $0x1], 1 }

// kernel: tpu_custom_call.1
= control target key start
LH: loop header
LB: loop body
LE: loop exit
PB: predicated region body
PF: predicated region fallthrough
CT: control target
= control target key end

     0   :  { %s5848_s0 = inlined_call_operand.vmem [shape: f32[1024,100], index: 0, kind: input, shape index: {}]   ;;  %s5849_s1 = inlined_call_operand.hbm [shape: bf16[100,256], index: 1, kind: input, shape index: {}]   ;;  %s5850_s2 = inlined_call_operand.hbm [shape: f32[1,256], index: 2, kind: input, shape index: {}]   ;;  %s5851_s3 = inlined_call_operand.hbm [shape: bf16[256,896], index: 3, kind: input, shape index: {}]   ;;  %s5852_s4 = inlined_call_operand.hbm [shape: f32[1,896], index: 4, kind: input, shape index: {}]   ;;  %s5853_s5 = inlined_call_operand.hbm [shape: bf16[1024,896], index: 5, kind: output, shape index: {}]  }
   0x1   :  { %5857 = sst [smem:[#allocation15_spill]] %s5849_s1 }
   0x2   :  { %10 = vsyncpa [#allocation3], 0 }
   0x3   :  { %11 = vsyncpa [#allocation6], 0 }
   0x4   :  { %12 = vsyncpa [#allocation9], 0 }
   0x5   :  { %13 = vsyncpa [#allocation4], 0 }
   0x6   :  { %15 = vsyncpa [#allocation4 + $0x1], 0  ;;  %s4912_s18 = smov 0   ;;  %s4914_s19 = smov 0  }
   0x7   :  { %s4916_s20 = smov 0   ;;  %s4918_s21 = smov 0  }
   0x8 LB: > { %s4933_s22 = sadd.s32 4294967295, %s4868_s21   ;;  %s3420_s23 = sadd.s32 4294967294, %s4868_s21   ;;  %s4868_s21 = sphi %s4918_s21, %s5876_s21   ;;  %s4864_s20 = sphi %s4916_s20, %s5875_s20   ;;  %s4860_s19 = sphi %s4914_s19, %s5874_s19   ;;  %s4856_s18 = sphi %s4912_s18, %s5873_s18  }
   0x9   : > { %s4937_s24 = sadd.s32 1, %s4868_s21   ;;  %s138_s25 = sadd.s32 1, %s4864_s20 }
   0xa   : > { %s135_s26 = ssub.s32 %s4868_s21, %s4937_s24  ;;  %p148_p0 = scmp.ne.s32.totalorder %s4864_s20, %s4860_s19 }
   0xb   : > { %p136_p1 = scmp.eq.s32.totalorder %s135_s26, 0  ;;  %p149_p2 = scmp.eq.s32.totalorder %s4933_s22, 3 }
   0xc   : > { %p154_p3 = scmp.ne.s32.totalorder %s4860_s19, %s4856_s18  ;;  %p155_p4 = scmp.eq.s32.totalorder %s3420_s23, 3 }
   0xd   : > { %s4948_s27 = scalar_select %p136_p1, %s4864_s20, %s138_s25  }
   0xe   : > { %p4950_p5 = por %p149_p2, %p148_p0  ;;  %p4954_p6 = por %p155_p4, %p154_p3 }
   0xf   : > { %p3421_p7 = scmp.ge.s32.totalorder %s4868_s21, 1  ;;  %p162_p8 = scmp.lt.s32.totalorder %s4868_s21, 5 }
  0x10   : > { %s5858_s28 = scalar_select %p4950_p5, 1, 0 }
  0x11   : > { %s5859_s29 = scalar_select %p4954_p6, 1, 0 }
  0x12   : > { %p5854_p9 = scmp.eq.s32.totalorder %s4933_s22, 0  ;;  %p4961_p10 = pnand %p3421_p7, %p162_p8 }
  0x13   : > { %s4870_s6 = smov [#allocation5]   ;;  %s4871_s8 = smov [#allocation2]  }
  0x14   : > { %s5860_s30 = scalar_select %p4961_p10, 1, 0 }
  0x15   : > { %s188_s7 = sshll.u32 %s4870_s6, 4  ;;  %p3984_p11 = pneg %p4961_p10  ;;  %s189_s7 = int_to_ptr.vmem [resolvable:$true] %s188_s7 }
  0x16   : > { %s174_s9 = sshll.u32 %s4871_s8, 4  ;;  %s4872_s11 = smov [#allocation7]   ;;  %s4973_s9 = int_to_ptr.vmem [resolvable:$true] %s174_s9 }
  0x17   : > { %p4969_p12 = pnand %p5854_p9, %p3984_p11  ;;  %s4975_s12 = sshll.u32 %s4872_s11, 4  ;;  %s199_s12 = int_to_ptr.vmem [resolvable:$true] %s4975_s12 }
  0x18   : > { %s4682_s15 = scalar_lea.hbm %s5850_s2, 32 }
  0x19   : > { %p4683_p13 = scmp.ne.s32.totalorder %s5850_s2, %s4682_s15  ;;  %p4985_p0 = pneg %p4969_p12 }
  0x1a   : > { %p4689_p3 = scmp.lt.u32.totalorder %s4682_s15, %s5850_s2 }
  0x1b   : > { %p4685_p1 = pnand %p4985_p0, %p4683_p13 }
  0x1d   : > { %p4686_p2 = pneg %p4685_p1 }
  0x1f   : > { %p4691_p4 = pnand %p4689_p3, %p4686_p2 }
  0x21   : > { %4694 = shalt.err (!%p4691_p4)
}
  0x22   : > { %s4695_s6 = scalar_lea.vmem %s189_s7, 32  ;;  %p4703_p9 = scmp.lt.s32.totalorder %s189_s7, %s189_s7 }
  0x23   : > { %p4696_p7 = scmp.ne.s32.totalorder %s189_s7, %s4695_s6  ;;  %p4704_p6 = scmp.lt.s32.totalorder %s4695_s6, %s4695_s6 }
  0x25   : > { %p4698_p8 = pnand %p4696_p7, %p4985_p0  ;;  %p4705_p5 = por %p4704_p6, %p4703_p9 }
  0x27   : > { %p4699_p11 = pneg %p4698_p8 }
  0x29   : > { %p4706_p10 = pnand %p4705_p5, %p4699_p11 }
  0x2b   : > { %4709 = shalt.err (!%p4706_p10)
}
  0x2c   : > { %3990 = dma.hbm_to_vmem [thread:$0]  (!%p4969_p12), %s5850_s2, 32, %s189_s7, [#allocation6]  }
  0x2d   : > { %s5863_s1 = sld [smem:[#allocation15_spill]] }
  0x33   : > { %s4710_s15 = scalar_lea.hbm %s5863_s1, 1664 }
  0x34   : > { %p4711_p13 = scmp.ne.s32.totalorder %s5863_s1, %s4710_s15  ;;  %p4717_p5 = scmp.lt.u32.totalorder %s4710_s15, %s5863_s1 }
  0x36   : > { %p4713_p1 = pnand %p4711_p13, %p4985_p0 }
  0x38   : > { %p4714_p6 = pneg %p4713_p1 }
  0x3a   : > { %p4719_p9 = pnand %p4717_p5, %p4714_p6 }
  0x3c   : > { %4722 = shalt.err (!%p4719_p9)
}
  0x3d   : > { %s4723_s7 = scalar_lea.vmem %s4973_s9, 1664  ;;  %p4731_p4 = scmp.lt.s32.totalorder %s4973_s9, %s4973_s9 }
  0x3e   : > { %p4724_p10 = scmp.ne.s32.totalorder %s4973_s9, %s4723_s7  ;;  %p4732_p7 = scmp.lt.s32.totalorder %s4723_s7, %s4723_s7 }
  0x40   : > { %p4726_p2 = pnand %p4724_p10, %p4985_p0  ;;  %p4733_p8 = por %p4732_p7, %p4731_p4 }
  0x42   : > { %p4727_p3 = pneg %p4726_p2 }
  0x44   : > { %p4734_p11 = pnand %p4733_p8, %p4727_p3 }
  0x46   : > { %4737 = shalt.err (!%p4734_p11)
}
  0x47   : > { %s4873_s6 = smov 128   ;;  %s4874_s8 = smov 8  }
  0x48   : > { %3987 = dma.hbm_to_vmem [thread:$0]  (!%p4969_p12), %s5863_s1, 1664, %s4973_s9, [#allocation3], %s4873_s6, %s4873_s6, %s4874_s8  }
  0x49   : > { %s4738_s16 = scalar_lea.hbm %s5851_s3, 14336 }
  0x4a   : > { %p4739_p13 = scmp.ne.s32.totalorder %s5851_s3, %s4738_s16  ;;  %p4745_p5 = scmp.lt.u32.totalorder %s4738_s16, %s5851_s3 }
  0x4c   : > { %p4741_p1 = pnand %p4739_p13, %p4985_p0 }
  0x4e   : > { %p4742_p6 = pneg %p4741_p1 }
  0x50   : > { %p4747_p9 = pnand %p4745_p5, %p4742_p6 }
  0x52   : > { %4750 = shalt.err (!%p4747_p9)
}
  0x53   : > { %s4751_s11 = scalar_lea.vmem %s199_s12, 14336  ;;  %p4759_p4 = scmp.lt.s32.totalorder %s199_s12, %s199_s12 }
  0x54   : > { %p4752_p10 = scmp.ne.s32.totalorder %s199_s12, %s4751_s11  ;;  %p4760_p7 = scmp.lt.s32.totalorder %s4751_s11, %s4751_s11 }
  0x56   : > { %p4754_p2 = pnand %p4752_p10, %p4985_p0  ;;  %p4761_p8 = por %p4760_p7, %p4759_p4 }
  0x58   : > { %p4755_p3 = pneg %p4754_p2 }
  0x5a   : > { %p4762_p11 = pnand %p4761_p8, %p4755_p3 }
  0x5c   : > { %4765 = shalt.err (!%p4762_p11)
}
  0x5d   : > { %s4875_s9 = smov 448   ;;  %s4876_s6 = smov 28  }
  0x5e   : > { %3993 = dma.hbm_to_vmem [thread:$0]  (!%p4969_p12), %s5851_s3, 14336, %s199_s12, [#allocation6], %s4875_s9, %s4875_s9, %s4876_s6  }
  0x5f   : > { %s4877_s14 = smov [#allocation8]   ;;  %s4766_s25 = scalar_lea.hbm %s5852_s4, 112 }
  0x60   : > { %s212_s15 = sshll.u32 %s4877_s14, 4  ;;  %p4767_p13 = scmp.ne.s32.totalorder %s5852_s4, %s4766_s25  ;;  %s213_s15 = int_to_ptr.vmem [resolvable:$true] %s212_s15 }
  0x61   : > { %p4773_p5 = scmp.lt.u32.totalorder %s4766_s25, %s5852_s4 }
  0x62   : > { %p4769_p1 = pnand %p4767_p13, %p4985_p0 }
  0x64   : > { %p4770_p6 = pneg %p4769_p1 }
  0x66   : > { %p4775_p9 = pnand %p4773_p5, %p4770_p6 }
  0x68   : > { %4778 = shalt.err (!%p4775_p9)
}
  0x69   : > { %s4779_s12 = scalar_lea.vmem %s213_s15, 112  ;;  %s4786_s9 = scalar_lea.vmem %s213_s15, 128 }
  0x6a   : > { %p4780_p10 = scmp.ne.s32.totalorder %s213_s15, %s4779_s12  ;;  %p4787_p4 = scmp.lt.s32.totalorder %s213_s15, %s213_s15 }
  0x6b   : > { %p4788_p7 = scmp.lt.s32.totalorder %s4786_s9, %s4779_s12 }
  0x6c   : > { %p4782_p2 = pnand %p4780_p10, %p4985_p0 }
  0x6d   : > { %p4789_p8 = por %p4788_p7, %p4787_p4 }
  0x6e   : > { %p4783_p3 = pneg %p4782_p2 }
  0x70   : > { %p4790_p11 = pnand %p4789_p8, %p4783_p3 }
  0x72   : > { %4793 = shalt.err (!%p4790_p11)
}
  0x73   : > { %3996 = dma.hbm_to_vmem [thread:$0]  (!%p4969_p12), %s5852_s4, 112, %s213_s15, [#allocation9]  }
  0x74   : > { %p5864_p13 = scmp.ne.s32.totalorder %s5860_s30, 0 }
  0x75   : > { %p5865_p1 = scmp.eq.s32.totalorder (!%p5864_p13), %s4933_s22, 0 }
  0x76   : > { %234 = sbr.rel (%p5864_p13) target bundleno = 882 (0x372), region = 40 }
  0x7d   : > { %4839 = dma.done.wait (%p5865_p1), [#allocation3], 1664   ;;  %p5866_p0 = pmov %p5865_p1 }
  0x7f   : > { %4841 = vsyncadd (%p5866_p0), [#allocation3], 4294965632  ;;  %p5867_p6 = pmov %p5866_p0 }
  0x80   : > { %p5868_p5 = pmov %p5866_p0 }
  0x81   : > { %4843 = dma.done.wait (%p5867_p6), [#allocation6], 14368  }
  0x82   : > { %4845 = vsyncadd (%p5868_p5), [#allocation6], 4294952928  ;;  %p5869_p9 = pmov %p5866_p0 }
  0x83   : > { %p5870_p12 = pmov %p5866_p0 }
  0x84   : > { %4847 = dma.done.wait (%p5869_p9), [#allocation9], 112  }
  0x85   : > { %4849 = vsyncadd (%p5870_p12), [#allocation9], 4294967184  ;;  %v4878_v0 = vmov 0   ;;  %v4053_v1 = vld [vmem:[#allocation2 + $0x4] ss:$8 sps:$4 sm:$0xff]   ;;  %s3432_s1 = sshll.u32 %s4933_s22, 5 }
  0x86   : > { %508 = vmatprep.mubr.bf16.mxu0 %v4878_v0  ;;  %588 = vmatprep.mubr.bf16.mxu1 %v4878_v0  ;;  %v4055_v2 = vld [vmem:[#allocation2] ss:$8 sps:$4 sm:$0xff]   ;;  %v4056_v3 = vld [vmem:[#allocation2 + $0x14] ss:$8 sps:$4 sm:$0xff]   ;;  %v4058_v4 = vld [vmem:[#allocation2 + $0x10] ss:$8 sps:$4 sm:$0xff]  }
  0x87   : > { %476 = vmatprep.subr.bf16.mxu0 %v4053_v1  ;;  %3950 = vmatprep.subr.bf16.mxu1 %v4053_v1  ;;  %v4059_v5 = vld [vmem:[#allocation2 + $0x24] ss:$8 sps:$4 sm:$0xff]   ;;  %v4061_v6 = vld [vmem:[#allocation2 + $0x20] ss:$8 sps:$4 sm:$0xff]   ;;  %p275_p10 = scmp.lt.s32.totalorder %s3432_s1, 127  ;;  %vm469_vm0 = vcmask 1041408  }
  0x88   : > { %477 = vmatpush1.bf16.msra.mxu0 %v4055_v2  ;;  %3957 = vmatpush1.bf16.msra.mxu1 %v4055_v2  ;;  %v4062_v7 = vld [vmem:[#allocation2 + $0x34] ss:$8 sps:$4 sm:$0xff]   ;;  %v4064_v8 = vld [vmem:[#allocation2 + $0x30] ss:$8 sps:$4 sm:$0xff]   ;;  %v4065_v9 = vld [vmem:[#allocation2 + $0x44] ss:$8 sps:$4 sm:$0xff]  }
  0x89   : > { %478 = vmatprep.subr.bf16.mxu0 %v4056_v3  ;;  %3951 = vmatprep.subr.bf16.mxu1 %v4056_v3  ;;  %s5878_s1 = smov (!%p275_p10, %s3432_s1), 127  ;;  %v4067_v10 = vld [vmem:[#allocation2 + $0x40] ss:$8 sps:$4 sm:$0xff]   ;;  %v4068_v11 = vld [vmem:[#allocation2 + $0x54] ss:$8 sps:$4 sm:$0xff]   ;;  %vm420_vm1 = vcmask 818176  }
  0x8a   : > { %s3433_s30 = sshll.u32 %s5878_s1, 3  ;;  %v342_v12 = vld [vmem:[#allocation2 + $0x60] sm:$0x33]  ;;  %v4070_v13 = vld [vmem:[#allocation2 + $0x50] ss:$8 sps:$4 sm:$0xff]   ;;  %s271_s14 = sand.u32 1, %s4860_s19  }
  0x8b   : > { %s5081_s13 = scalar_lea.vmem %s5848_s0, %s3433_s30  ;;  %v3447_v14 = vcombine.high %v342_v12, %v342_v12  ;;  %v3446_v15 = vcombine.low %v342_v12, %v342_v12  ;;  %v4075_v20 = vld [vmem:[#allocation7 + $0xc] ss:$28 sps:$4 sm:$0xff]   ;;  %v4078_v22 = vld [vmem:[#allocation7 + $0x4] ss:$28 sps:$4 sm:$0xff]   ;;  %v4084_v30 = vld [vmem:[#allocation7 + $0x3c] ss:$28 sps:$4 sm:$0xff]  }
  0x8c   : > { %479 = vmatpush1.bf16.msra.mxu0 %v4058_v4  ;;  %3958 = vmatpush1.bf16.msra.mxu1 %v4058_v4  ;;  %v282_v16 = vld [vmem:[%s5081_s13] sm:$0xff]  ;;  %v283_v17 = vld [vmem:[%s5081_s13 + $0x8] sm:$0xff]  ;;  %v284_v27 = vld [vmem:[%s5081_s13 + $0x10] sm:$0xff]  ;;  %s5428_s15 = smul.u32 896, %s271_s14  ;;  %p5871_p3 = scmp.ne.s32.totalorder %s5858_s28, 0 }
  0x8d   : > { %480 = vmatprep.subr.bf16.mxu0 %v4059_v5  ;;  %3952 = vmatprep.subr.bf16.mxu1 %v4059_v5  ;;  %v298_v18 = vld [vmem:[%s5081_s13 + $0x80] sm:$0xff]  ;;  %v299_v19 = vld [vmem:[%s5081_s13 + $0x88] sm:$0xff]  ;;  %v471_v21 = vsel %vm469_vm0, %v3446_v15, 0  ;;  %v314_v23 = vpack.c.bf16 %v283_v17, %v282_v16  ;;  %v285_v28 = vld [vmem:[%s5081_s13 + $0x18] sm:$0xff]  ;;  %s3965_s17 = smul.u32 14336, %s4933_s22  ;;  %s5807_s22 = scalar_lea.sflag [#allocation4], %s271_s14 }
  0x8e   : > { %v322_v24 = vpack.c.bf16 %v299_v19, %v298_v18  ;;  %v4073_v25 = vld [vmem:[#allocation7 + $0x8] ss:$28 sps:$4 sm:$0xff]   ;;  %v4076_v26 = vld [vmem:[#allocation7] ss:$28 sps:$4 sm:$0xff]   ;;  %v301_v32 = vld [vmem:[%s5081_s13 + $0x98] sm:$0xff]  ;;  %v315_v37 = vpack.c.bf16 %v285_v28, %v284_v27  ;;  %s5441_s16 = scalar_lea.vmem [#allocation10], %s5428_s15 }
  0x8f   : > { %v4081_v29 = vld [vmem:[#allocation7 + $0x44] ss:$28 sps:$4 sm:$0xff]   ;;  %v4082_v34 = vld [vmem:[#allocation7 + $0x38] ss:$28 sps:$4 sm:$0xff]   ;;  %v4088_v40 = vld [vmem:[#allocation7 + $0x70] ss:$28 sps:$4 sm:$0xff]   ;;  %s5799_s11 = scalar_lea.hbm %s5853_s5, %s3965_s17 }
  0x90   : > { %481 = vmatpush1.bf16.msra.mxu0 %v4061_v6  ;;  %3959 = vmatpush1.bf16.msra.mxu1 %v4061_v6  ;;  %v300_v31 = vld [vmem:[%s5081_s13 + $0x90] sm:$0xff]  ;;  %v4079_v33 = vld [vmem:[#allocation7 + $0x40] ss:$28 sps:$4 sm:$0xff]   ;;  %v4090_v36 = vld [vmem:[#allocation7 + $0x74] ss:$28 sps:$4 sm:$0xff]   ;;  %s3317_s25 = sshll.u32 %s5441_s16, 4  ;;  %s5802_s25 = int_to_ptr.vmem [resolvable:$true] %s3317_s25 }
  0x91   : > { %482 = vmatprep.subr.bf16.mxu0 %v4062_v7  ;;  %3953 = vmatprep.subr.bf16.mxu1 %v4062_v7  ;;  %v4087_v35 = vld [vmem:[#allocation7 + $0x7c] ss:$28 sps:$4 sm:$0xff]   ;;  %v323_v38 = vpack.c.bf16 %v301_v32, %v300_v31  ;;  %v4093_v43 = vld [vmem:[#allocation7 + $0xb4] ss:$28 sps:$4 sm:$0xff]   ;;  %v4096_v44 = vld [vmem:[#allocation7 + $0xac] ss:$28 sps:$4 sm:$0xff]  }
  0x92   : > { %v4085_v39 = vld [vmem:[#allocation7 + $0x78] ss:$28 sps:$4 sm:$0xff]   ;;  %v287_v42 = vld [vmem:[%s5081_s13 + $0x28] sm:$0xff]  ;;  %v4091_v47 = vld [vmem:[#allocation7 + $0xb0] ss:$28 sps:$4 sm:$0xff]   ;;  %s4794_s12 = scalar_lea.vmem %s5802_s25, 14336 }
  0x93   : > { %v286_v41 = vld [vmem:[%s5081_s13 + $0x20] sm:$0xff]  ;;  %v303_v46 = vld [vmem:[%s5081_s13 + $0xa8] sm:$0xff]  ;;  %v4099_v49 = vld [vmem:[#allocation7 + $0xec] ss:$28 sps:$4 sm:$0xff]   ;;  %p4795_p2 = scmp.ne.s32.totalorder %s5802_s25, %s4794_s12  ;;  %s4879_s9 = smov [#allocation10]  }
  0x94   : > { %483 = vmatpush1.bf16.msra.mxu0 %v4064_v8  ;;  %3960 = vmatpush1.bf16.msra.mxu1 %v4064_v8  ;;  %v302_v45 = vld [vmem:[%s5081_s13 + $0xa0] sm:$0xff]  ;;  %v4094_v48 = vld [vmem:[#allocation7 + $0xa8] ss:$28 sps:$4 sm:$0xff]   ;;  %v316_v51 = vpack.c.bf16 %v287_v42, %v286_v41  ;;  %v289_v56 = vld [vmem:[%s5081_s13 + $0x38] sm:$0xff]  ;;  %s4798_s6 = sshll.u32 %s4879_s9, 4  ;;  %s4799_s6 = int_to_ptr.vmem [resolvable:$false] %s4798_s6 }
  0x95   : > { %484 = vmatprep.subr.bf16.mxu0 %v4065_v9  ;;  %3954 = vmatprep.subr.bf16.mxu1 %v4065_v9  ;;  %v4102_v50 = vld [vmem:[#allocation7 + $0xe4] ss:$28 sps:$4 sm:$0xff]   ;;  %v324_v52 = vpack.c.bf16 %v303_v46, %v302_v45  ;;  %v4108_v58 = vld [vmem:[#allocation7 + $0x11c] ss:$28 sps:$4 sm:$0xff]   ;;  %v305_v60 = vld [vmem:[%s5081_s13 + $0xb8] sm:$0xff]  ;;  %p4796_p4 = pnand %p4795_p2, %p5871_p3  ;;  %s4800_s8 = scalar_lea.vmem %s4799_s6, 28672 }
  0x96   : > { %v4097_v53 = vld [vmem:[#allocation7 + $0xe8] ss:$28 sps:$4 sm:$0xff]   ;;  %v4100_v54 = vld [vmem:[#allocation7 + $0xe0] ss:$28 sps:$4 sm:$0xff]   ;;  %v4106_v62 = vld [vmem:[#allocation7 + $0x118] ss:$28 sps:$4 sm:$0xff]   ;;  %p4801_p8 = scmp.lt.s32.totalorder %s5802_s25, %s4799_s6  ;;  %p4802_p11 = scmp.lt.s32.totalorder %s4800_s8, %s4794_s12 }
  0x97   : > { %v288_v55 = vld [vmem:[%s5081_s13 + $0x30] sm:$0xff]  ;;  %v4103_v61 = vld [vmem:[#allocation7 + $0x120] ss:$28 sps:$4 sm:$0xff]   ;;  %v4114_v1 = vld [vmem:[#allocation7 + $0x154] ss:$28 sps:$4 sm:$0xff]   ;;  %p4797_p7 = pneg %p4796_p4 }
  0x98   : > { %485 = vmatpush1.bf16.msra.mxu0 %v4067_v10  ;;  %3961 = vmatpush1.bf16.msra.mxu1 %v4067_v10  ;;  %v4105_v57 = vld [vmem:[#allocation7 + $0x124] ss:$28 sps:$4 sm:$0xff]   ;;  %v4111_v63 = vld [vmem:[#allocation7 + $0x15c] ss:$28 sps:$4 sm:$0xff]   ;;  %v317_v2 = vpack.c.bf16 %v289_v56, %v288_v55  ;;  %v4112_v5 = vld [vmem:[#allocation7 + $0x150] ss:$28 sps:$4 sm:$0xff]   ;;  %p4803_p13 = por %p4802_p11, %p4801_p8 }
  0x99   : > { %486 = vmatprep.subr.bf16.mxu0 %v4068_v11  ;;  %3955 = vmatprep.subr.bf16.mxu1 %v4068_v11  ;;  %v304_v59 = vld [vmem:[%s5081_s13 + $0xb0] sm:$0xff]  ;;  %v4109_v4 = vld [vmem:[#allocation7 + $0x158] ss:$28 sps:$4 sm:$0xff]   ;;  %v291_v7 = vld [vmem:[%s5081_s13 + $0x48] sm:$0xff] }
  0x9a   : > { %v325_v3 = vpack.c.bf16 %v305_v60, %v304_v59  ;;  %v290_v6 = vld [vmem:[%s5081_s13 + $0x40] sm:$0xff]  ;;  %v4120_v10 = vld [vmem:[#allocation7 + $0x18c] ss:$28 sps:$4 sm:$0xff]   ;;  %v307_v11 = vld [vmem:[%s5081_s13 + $0xc8] sm:$0xff]  ;;  %p4804_p1 = pnand %p4803_p13, %p4797_p7 }
  0x9b   : > { %v306_v8 = vld [vmem:[%s5081_s13 + $0xc0] sm:$0xff]  ;;  %v4115_v12 = vld [vmem:[#allocation7 + $0x190] ss:$28 sps:$4 sm:$0xff]   ;;  %v4126_v15 = vld [vmem:[#allocation7 + $0x1c4] ss:$28 sps:$4 sm:$0xff]   ;;  %v318_v16 = vpack.c.bf16 %v291_v7, %v290_v6 }
  0x9c   : > { %487 = vmatpush1.bf16.msra.mxu0 %v4070_v13  ;;  %3962 = vmatpush1.bf16.msra.mxu1 %v4070_v13  ;;  %v4117_v9 = vld [vmem:[#allocation7 + $0x194] ss:$28 sps:$4 sm:$0xff]   ;;  %v4118_v13 = vld [vmem:[#allocation7 + $0x188] ss:$28 sps:$4 sm:$0xff]   ;;  %v326_v17 = vpack.c.bf16 %v307_v11, %v306_v8  ;;  %v4124_v19 = vld [vmem:[#allocation7 + $0x1c0] ss:$28 sps:$4 sm:$0xff]  }
  0x9d   : > { %3448 = vmatprep.subr.msk.bf16.mxu0 %vm469_vm0, %v3447_v14  ;;  %3956 = vmatprep.subr.msk.bf16.mxu1 %vm469_vm0, %v3447_v14  ;;  %v4123_v14 = vld [vmem:[#allocation7 + $0x1cc] ss:$28 sps:$4 sm:$0xff]   ;;  %v4130_v27 = vld [vmem:[#allocation7 + $0x1f8] ss:$28 sps:$4 sm:$0xff]   ;;  %v343_v7 = vld [vmem:[#allocation5] sm:$0x3] }
  0x9e   : > { %v4121_v18 = vld [vmem:[#allocation7 + $0x1c8] ss:$28 sps:$4 sm:$0xff]   ;;  %v4135_v28 = vld [vmem:[#allocation7 + $0x23c] ss:$28 sps:$4 sm:$0xff]   ;;  %v4162_v59 = vld [vmem:[#allocation7 + $0x314] ss:$28 sps:$4 sm:$0xff]  }
  0x9f   : > { %v4133_v32 = vld [vmem:[#allocation7 + $0x238] ss:$28 sps:$4 sm:$0xff]   ;;  %v4142_v41 = vld [vmem:[#allocation7 + $0x268] ss:$28 sps:$4 sm:$0xff]  }
  0xa0   : > { %489 = vmatpush1.bf16.msra.mxu0 %v471_v21  ;;  %3963 = vmatpush1.bf16.msra.mxu1 %v471_v21  ;;  %v4132_v21 = vld [vmem:[#allocation7 + $0x1fc] ss:$28 sps:$4 sm:$0xff]   ;;  %v4147_v42 = vld [vmem:[#allocation7 + $0x2ac] ss:$28 sps:$4 sm:$0xff]  }
  0xa1   : > { %1699 = vmatprep.subr.bf16.mxu0 %v4075_v20  ;;  %1506 = vmatprep.subr.bf16.mxu1 %v4078_v22  ;;  %v4129_v20 = vld [vmem:[#allocation7 + $0x204] ss:$28 sps:$4 sm:$0xff]   ;;  %v4154_v55 = vld [vmem:[#allocation7 + $0x2d8] ss:$28 sps:$4 sm:$0xff]  }
  0xa2   : > { %v292_v22 = vld [vmem:[%s5081_s13 + $0x50] sm:$0xff]  ;;  %v4157_v60 = vld [vmem:[#allocation7 + $0x318] ss:$28 sps:$4 sm:$0xff]  }
  0xa3   : > { %3449 = vmatmul.mubr.msk.bf16.vlgmr.msra.gmra.mrb[0].mxu0 %vm420_vm1, %v314_v23  ;;  %3457 = vmatmul.mubr.msk.bf16.vlgmr.msra.gmra.mrb[0].mxu1 %vm420_vm1, %v322_v24  ;;  %v293_v23 = vld [vmem:[%s5081_s13 + $0x58] sm:$0xff]  ;;  %v308_v24 = vld [vmem:[%s5081_s13 + $0xd0] sm:$0xff] }
  0xa4   : > { %518 = vmatprep.mubr.bf16.mxu0 %v4878_v0  ;;  %598 = vmatprep.mubr.bf16.mxu1 %v4878_v0  ;;  %v4145_v46 = vld [vmem:[#allocation7 + $0x2a8] ss:$28 sps:$4 sm:$0xff]  }
  0xa5   : > { %1700 = vmatpush1.bf16.msra.mxu0 %v4073_v25  ;;  %1507 = vmatpush1.bf16.msra.mxu1 %v4076_v26  ;;  %v309_v25 = vld [vmem:[%s5081_s13 + $0xd8] sm:$0xff]  ;;  %v4127_v26 = vld [vmem:[#allocation7 + $0x200] ss:$28 sps:$4 sm:$0xff]  }
  0xa6   : > { %1701 = vmatprep.subr.bf16.mxu0 %v4081_v29  ;;  %1508 = vmatprep.subr.bf16.mxu1 %v4084_v30  ;;  %v4138_v29 = vld [vmem:[#allocation7 + $0x234] ss:$28 sps:$4 sm:$0xff]   ;;  %v319_v30 = vpack.c.bf16 %v293_v23, %v292_v22  ;;  %v327_v31 = vpack.c.bf16 %v309_v25, %v308_v24 }
  0xa9   : > { %1702 = vmatpush1.bf16.msra.mxu0 %v4079_v33  ;;  %1509 = vmatpush1.bf16.msra.mxu1 %v4082_v34  ;;  %v4136_v33 = vld [vmem:[#allocation7 + $0x230] ss:$28 sps:$4 sm:$0xff]  }
  0xaa   : > { %1703 = vmatprep.subr.bf16.mxu0 %v4087_v35  ;;  %1510 = vmatprep.subr.bf16.mxu1 %v4090_v36  ;;  %v4141_v34 = vld [vmem:[#allocation7 + $0x274] ss:$28 sps:$4 sm:$0xff]   ;;  %v4144_v35 = vld [vmem:[#allocation7 + $0x26c] ss:$28 sps:$4 sm:$0xff]  }
  0xab   : > { %3450 = vmatmul.mubr.msk.bf16.gmra.mrb[4].mxu0 %vm420_vm1, %v315_v37  ;;  %3458 = vmatmul.mubr.msk.bf16.gmra.mrb[4].mxu1 %vm420_vm1, %v323_v38  ;;  %v294_v36 = vld [vmem:[%s5081_s13 + $0x60] sm:$0xff]  ;;  %v295_v37 = vld [vmem:[%s5081_s13 + $0x68] sm:$0xff] }
  0xac   : > { %528 = vmatprep.mubr.bf16.mxu0 %v4878_v0  ;;  %608 = vmatprep.mubr.bf16.mxu1 %v4878_v0  ;;  %v310_v38 = vld [vmem:[%s5081_s13 + $0xe0] sm:$0xff] }
  0xad   : > { %1704 = vmatpush1.bf16.msra.mxu0 %v4085_v39  ;;  %1511 = vmatpush1.bf16.msra.mxu1 %v4088_v40  ;;  %v311_v39 = vld [vmem:[%s5081_s13 + $0xe8] sm:$0xff]  ;;  %v4139_v40 = vld [vmem:[#allocation7 + $0x270] ss:$28 sps:$4 sm:$0xff]  }
  0xae   : > { %1705 = vmatprep.subr.bf16.mxu0 %v4093_v43  ;;  %1512 = vmatprep.subr.bf16.mxu1 %v4096_v44  ;;  %v4150_v43 = vld [vmem:[#allocation7 + $0x2a4] ss:$28 sps:$4 sm:$0xff]   ;;  %v320_v44 = vpack.c.bf16 %v295_v37, %v294_v36  ;;  %v328_v45 = vpack.c.bf16 %v311_v39, %v310_v38  ;;  %v4170_v39 = vld [vmem:[#allocation7 + $0x18] ss:$28 sps:$4 sm:$0xff]  }
  0xb1   : > { %1706 = vmatpush1.bf16.msra.mxu0 %v4091_v47  ;;  %1513 = vmatpush1.bf16.msra.mxu1 %v4094_v48  ;;  %v4148_v47 = vld [vmem:[#allocation7 + $0x2a0] ss:$28 sps:$4 sm:$0xff]  }
  0xb2   : > { %1707 = vmatprep.subr.bf16.mxu0 %v4099_v49  ;;  %1514 = vmatprep.subr.bf16.mxu1 %v4102_v50  ;;  %v4153_v48 = vld [vmem:[#allocation7 + $0x2e4] ss:$28 sps:$4 sm:$0xff]   ;;  %v4156_v49 = vld [vmem:[#allocation7 + $0x2dc] ss:$28 sps:$4 sm:$0xff]  }
  0xb3   : > { %3451 = vmatmul.mubr.msk.bf16.gmra.mrb[8].mxu0 %vm420_vm1, %v316_v51  ;;  %3459 = vmatmul.mubr.msk.bf16.gmra.mrb[8].mxu1 %vm420_vm1, %v324_v52  ;;  %v296_v50 = vld [vmem:[%s5081_s13 + $0x70] sm:$0xff]  ;;  %v297_v51 = vld [vmem:[%s5081_s13 + $0x78] sm:$0xff] }
  0xb4   : > { %538 = vmatprep.mubr.bf16.mxu0 %v4878_v0  ;;  %618 = vmatprep.mubr.bf16.mxu1 %v4878_v0  ;;  %v312_v52 = vld [vmem:[%s5081_s13 + $0xf0] sm:$0xff]  ;;  %v321_v56 = vpack.c.bf16 %v297_v51, %v296_v50 }
  0xb5   : > { %1708 = vmatpush1.bf16.msra.mxu0 %v4097_v53  ;;  %1515 = vmatpush1.bf16.msra.mxu1 %v4100_v54  ;;  %v313_v53 = vld [vmem:[%s5081_s13 + $0xf8] sm:$0xff]  ;;  %v4151_v54 = vld [vmem:[#allocation7 + $0x2e0] ss:$28 sps:$4 sm:$0xff]  }
  0xb6   : > { %1709 = vmatprep.subr.bf16.mxu0 %v4105_v57  ;;  %1516 = vmatprep.subr.bf16.mxu1 %v4108_v58  ;;  %v329_v57 = vpack.c.bf16 %v313_v53, %v312_v52  ;;  %v4159_v58 = vld [vmem:[#allocation7 + $0x31c] ss:$28 sps:$4 sm:$0xff]  }
  0xb9   : > { %1710 = vmatpush1.bf16.msra.mxu0 %v4103_v61  ;;  %1517 = vmatpush1.bf16.msra.mxu1 %v4106_v62  ;;  %v4160_v61 = vld [vmem:[#allocation7 + $0x310] ss:$28 sps:$4 sm:$0xff]  }
  0xba   : > { %1711 = vmatprep.subr.bf16.mxu0 %v4111_v63  ;;  %1518 = vmatprep.subr.bf16.mxu1 %v4114_v1  ;;  %v4168_v62 = vld [vmem:[#allocation7 + $0x34c] ss:$28 sps:$4 sm:$0xff]  }
  0xbb   : > { %3452 = vmatmul.mubr.msk.bf16.gmra.mrb[12].mxu0 %vm420_vm1, %v317_v2  ;;  %3460 = vmatmul.mubr.msk.bf16.gmra.mrb[12].mxu1 %vm420_vm1, %v325_v3  ;;  %v4163_v63 = vld [vmem:[#allocation7 + $0x350] ss:$28 sps:$4 sm:$0xff]   ;;  %v4166_v1 = vld [vmem:[#allocation7 + $0x348] ss:$28 sps:$4 sm:$0xff]   ;;  %v4169_v2 = vld [vmem:[#allocation7 + $0x1d8] ss:$28 sps:$4 sm:$0xff]  }
  0xbc   : > { %548 = vmatprep.mubr.bf16.mxu0 %v4878_v0  ;;  %628 = vmatprep.mubr.bf16.mxu1 %v4878_v0  ;;  %v4173_v3 = vld [vmem:[#allocation7 + $0x14] ss:$28 sps:$4 sm:$0xff]  }
  0xbd   : > { %1712 = vmatpush1.bf16.msra.mxu0 %v4109_v4  ;;  %1519 = vmatpush1.bf16.msra.mxu1 %v4112_v5  ;;  %v345_v4 = vlaneseq }
  0xbe   : > { %1713 = vmatprep.subr.bf16.mxu0 %v4117_v9  ;;  %1520 = vmatprep.subr.bf16.mxu1 %v4120_v10 }
  0xbf   : > { %v5145_v5 = vshrl.u32 %v345_v4, 7 }
  0xc1   : > { %1714 = vmatpush1.bf16.msra.mxu0 %v4115_v12  ;;  %1521 = vmatpush1.bf16.msra.mxu1 %v4118_v13  ;;  %v347_v6 = vsub.s32 0, %v5145_v5  ;;  %v351_v8 = vsub.s32 1, %v5145_v5 }
  0xc2   : > { %1715 = vmatprep.subr.bf16.mxu0 %v4123_v14  ;;  %1522 = vmatprep.subr.bf16.mxu1 %v4126_v15 }
  0xc3   : > { %3453 = vmatmul.mubr.msk.bf16.gmra.mrb[16].mxu0 %vm420_vm1, %v318_v16  ;;  %3461 = vmatmul.mubr.msk.bf16.gmra.mrb[16].mxu1 %vm420_vm1, %v326_v17  ;;  %v5151_v9 = vrot.slane %v343_v7, %v347_v6  ;;  %v5155_v10 = vrot.slane %v343_v7, %v351_v8 }
  0xc4   : > { %558 = vmatprep.mubr.bf16.mxu0 %v4878_v0  ;;  %638 = vmatprep.mubr.bf16.mxu1 %v4878_v0 }
  0xc5   : > { %1716 = vmatpush1.bf16.msra.mxu0 %v4121_v18  ;;  %1523 = vmatpush1.bf16.msra.mxu1 %v4124_v19 }
  0xc6   : > { %1717 = vmatprep.subr.bf16.mxu0 %v4129_v20  ;;  %1524 = vmatprep.subr.bf16.mxu1 %v4132_v21 }
  0xc9   : > { %1718 = vmatpush1.bf16.msra.mxu0 %v4127_v26  ;;  %1525 = vmatpush1.bf16.msra.mxu1 %v4130_v27 }
  0xca   : > { %1719 = vmatprep.subr.bf16.mxu0 %v4135_v28  ;;  %1526 = vmatprep.subr.bf16.mxu1 %v4138_v29 }
  0xcb   : > { %3454 = vmatmul.mubr.msk.bf16.gmra.mrb[20].mxu0 %vm420_vm1, %v319_v30  ;;  %3462 = vmatmul.mubr.msk.bf16.gmra.mrb[20].mxu1 %vm420_vm1, %v327_v31 }
  0xcc   : > { %568 = vmatprep.mubr.bf16.mxu0 %v4878_v0  ;;  %648 = vmatprep.mubr.bf16.mxu1 %v4878_v0 }
  0xcd   : > { %1720 = vmatpush1.bf16.msra.mxu0 %v4133_v32  ;;  %1527 = vmatpush1.bf16.msra.mxu1 %v4136_v33 }
  0xce   : > { %1721 = vmatprep.subr.bf16.mxu0 %v4141_v34  ;;  %1528 = vmatprep.subr.bf16.mxu1 %v4144_v35 }
  0xd1   : > { %1722 = vmatpush1.bf16.msra.mxu0 %v4139_v40  ;;  %1529 = vmatpush1.bf16.msra.mxu1 %v4142_v41  ;;  %v4171_v40 = vld [vmem:[#allocation7 + $0x10] ss:$28 sps:$4 sm:$0xff]  }
  0xd2   : > { %1723 = vmatprep.subr.bf16.mxu0 %v4147_v42  ;;  %1530 = vmatprep.subr.bf16.mxu1 %v4150_v43 }
  0xd3   : > { %3455 = vmatmul.mubr.msk.bf16.gmra.mrb[24].mxu0 %vm420_vm1, %v320_v44  ;;  %3463 = vmatmul.mubr.msk.bf16.gmra.mrb[24].mxu1 %vm420_vm1, %v328_v45  ;;  %v4176_v45 = vld [vmem:[#allocation7 + $0x4c] ss:$28 sps:$4 sm:$0xff]  }
  0xd4   : > { %578 = vmatprep.mubr.bf16.mxu0 %v4878_v0  ;;  %658 = vmatprep.mubr.bf16.mxu1 %v4878_v0  ;;  %v4165_v0 = vld [vmem:[#allocation7 + $0x354] ss:$28 sps:$4 sm:$0xff]  }
  0xd5   : > { %1724 = vmatpush1.bf16.msra.mxu0 %v4145_v46  ;;  %1531 = vmatpush1.bf16.msra.mxu1 %v4148_v47  ;;  %v4177_v46 = vld [vmem:[#allocation7 + $0x210] ss:$28 sps:$4 sm:$0xff]  }
  0xd6   : > { %1725 = vmatprep.subr.bf16.mxu0 %v4153_v48  ;;  %1532 = vmatprep.subr.bf16.mxu1 %v4156_v49 }
  0xd9   : > { %1726 = vmatpush1.bf16.msra.mxu0 %v4151_v54  ;;  %1533 = vmatpush1.bf16.msra.mxu1 %v4154_v55  ;;  %v4174_v55 = vld [vmem:[#allocation7 + $0x48] ss:$28 sps:$4 sm:$0xff]  }
  0xda   : > { %1727 = vmatprep.subr.bf16.mxu0 %v4159_v58  ;;  %1534 = vmatprep.subr.bf16.mxu1 %v4162_v59 }
  0xdb   : > { %3456 = vmatmul.mubr.msk.bf16.gmra.mrb[28].mxu0 %vm420_vm1, %v321_v56  ;;  %3464 = vmatmul.mubr.msk.bf16.gmra.mrb[28].mxu1 %vm420_vm1, %v329_v57 }
  0xdd   : > { %1728 = vmatpush1.bf16.msra.mxu0 %v4157_v60  ;;  %1535 = vmatpush1.bf16.msra.mxu1 %v4160_v61  ;;  %v4178_v60 = vld [vmem:[#allocation7 + $0x50] ss:$28 sps:$4 sm:$0xff]   ;;  %v4181_v61 = vld [vmem:[#allocation7 + $0x84] ss:$28 sps:$4 sm:$0xff]  }
  0xde   : > { %1729 = vmatprep.subr.bf16.mxu0 %v4165_v0  ;;  %1536 = vmatprep.subr.bf16.mxu1 %v4168_v62 }
  0xe1   : > { %1730 = vmatpush1.bf16.msra.mxu0 %v4163_v63  ;;  %1537 = vmatpush1.bf16.msra.mxu1 %v4166_v1 }
  0xe2   : > { %3838 = vmatprep.subr.bf16.mxu0 %v4169_v2  ;;  %1892 = vmatprep.subr.bf16.mxu1 %v4173_v3  ;;  %v4185_v2 = vld [vmem:[#allocation7 + $0x248] ss:$28 sps:$4 sm:$0xff]  }
 0x176   : > { %v510_v11 = vpop.f32.mrb[0].mxu0  ;;  %v590_v12 = vpop.f32.mrb[0].mxu1 }
 0x177   : > { %v511_v13 = vadd.f32 %v510_v11, %v5151_v9  ;;  %v512_v14 = vpop.f32.mrb[1].mxu0  ;;  %v591_v15 = vadd.f32 %v590_v12, %v5151_v9  ;;  %v592_v16 = vpop.f32.mrb[1].mxu1 }
 0x178   : > { %v513_v17 = vadd.f32 %v512_v14, %v5155_v10  ;;  %v514_v18 = vpop.f32.mrb[2].mxu0  ;;  %v593_v19 = vadd.f32 %v592_v16, %v5155_v10  ;;  %v594_v20 = vpop.f32.mrb[2].mxu1  ;;  %v4179_v16 = vld [vmem:[#allocation7 + $0x80] ss:$28 sps:$4 sm:$0xff]  }
 0x179   : > { %v515_v21 = vadd.f32 %v514_v18, %v5151_v9  ;;  %v516_v22 = vpop.f32.mrb[3].mxu0  ;;  %v701_v23 = vmax.f32 %v591_v15, 0.0  ;;  %v595_v24 = vadd.f32 %v594_v20, %v5151_v9  ;;  %v596_v25 = vpop.f32.mrb[3].mxu1  ;;  %v669_v29 = vmax.f32 %v511_v13, 0.0 }
 0x17a   : > { %v517_v26 = vadd.f32 %v516_v22, %v5155_v10  ;;  %v702_v27 = vmax.f32 %v593_v19, 0.0  ;;  %v597_v28 = vadd.f32 %v596_v25, %v5155_v10  ;;  %v670_v32 = vmax.f32 %v513_v17, 0.0  ;;  %v4186_v17 = vld [vmem:[#allocation7 + $0x88] ss:$28 sps:$4 sm:$0xff]   ;;  %v4184_v22 = vld [vmem:[#allocation7 + $0xbc] ss:$28 sps:$4 sm:$0xff]  }
 0x17b   : > { %v671_v30 = vmax.f32 %v515_v21, 0.0  ;;  %v703_v31 = vmax.f32 %v595_v24, 0.0 }
 0x17c   : > { %v672_v33 = vmax.f32 %v517_v26, 0.0  ;;  %v704_v34 = vmax.f32 %v597_v28, 0.0 }
 0x17d   : > { %v5165_v35 = vpack.c.bf16 %v671_v30, %v669_v29  ;;  %v5167_v36 = vpack.c.bf16 %v703_v31, %v701_v23  ;;  %v4193_v23 = vld [vmem:[#allocation7 + $0x280] ss:$28 sps:$4 sm:$0xff]  }
 0x17e   : > { %v5169_v37 = vpack.c.bf16 %v672_v33, %v670_v32  ;;  %v520_v38 = vpop.f32.mrb[4].mxu0  ;;  %v5171_v41 = vpack.c.bf16 %v704_v34, %v702_v27  ;;  %v600_v42 = vpop.f32.mrb[4].mxu1  ;;  %v4182_v32 = vld [vmem:[#allocation7 + $0xb8] ss:$28 sps:$4 sm:$0xff]  }
 0x17f   : > { %v521_v43 = vadd.f32 %v520_v38, %v5151_v9  ;;  %v522_v44 = vpop.f32.mrb[5].mxu0  ;;  %v601_v47 = vadd.f32 %v600_v42, %v5151_v9  ;;  %v602_v48 = vpop.f32.mrb[5].mxu1  ;;  %v4194_v42 = vld [vmem:[#allocation7 + $0xc0] ss:$28 sps:$4 sm:$0xff]  }
 0x180   : > { %v523_v49 = vadd.f32 %v522_v44, %v5155_v10  ;;  %v524_v50 = vpop.f32.mrb[6].mxu0  ;;  %1538 = vmatprep.mubr.bf16.mxu1 %v5169_v37  ;;  %1731 = vmatprep.mubr.bf16.mxu0 %v5169_v37  ;;  %v603_v51 = vadd.f32 %v602_v48, %v5155_v10  ;;  %v604_v52 = vpop.f32.mrb[6].mxu1 }
 0x181   : > { %v525_v53 = vadd.f32 %v524_v50, %v5151_v9  ;;  %v526_v54 = vpop.f32.mrb[7].mxu0  ;;  %1539 = vmatmul.mubr.bf16.vlgmr.msra.gmra.mrb[32].mxu1 %v5165_v35  ;;  %1732 = vmatmul.mubr.bf16.vlgmr.msra.gmra.mrb[32].mxu0 %v5165_v35  ;;  %v705_v56 = vmax.f32 %v601_v47, 0.0  ;;  %v605_v57 = vadd.f32 %v604_v52, %v5151_v9  ;;  %v606_v58 = vpop.f32.mrb[7].mxu1  ;;  %v673_v63 = vmax.f32 %v521_v43, 0.0  ;;  %v4201_v47 = vld [vmem:[#allocation7 + $0x2b8] ss:$28 sps:$4 sm:$0xff]  }
 0x182   : > { %v527_v59 = vadd.f32 %v526_v54, %v5155_v10  ;;  %3839 = vmatpush3.bf16.msra.mxu0 %v4170_v39  ;;  %1893 = vmatpush1.bf16.msra.mxu1 %v4171_v40  ;;  %v706_v0 = vmax.f32 %v603_v51, 0.0  ;;  %v607_v62 = vadd.f32 %v606_v58, %v5155_v10  ;;  %v674_v4 = vmax.f32 %v523_v49, 0.0  ;;  %v4189_v40 = vld [vmem:[#allocation7 + $0xf4] ss:$28 sps:$4 sm:$0xff]  }
 0x183   : > { %v675_v1 = vmax.f32 %v525_v53, 0.0  ;;  %1894 = vmatprep.subr.bf16.mxu1 %v4176_v45  ;;  %3840 = vmatprep.subr.bf16.mxu0 %v4177_v46  ;;  %v707_v3 = vmax.f32 %v605_v57, 0.0  ;;  %v4202_v57 = vld [vmem:[#allocation7 + $0xf8] ss:$28 sps:$4 sm:$0xff]  }
 0x184   : > { %v676_v7 = vmax.f32 %v527_v59, 0.0  ;;  %v708_v11 = vmax.f32 %v607_v62, 0.0 }
 0x185   : > { %v5185_v12 = vpack.c.bf16 %v675_v1, %v673_v63  ;;  %v5187_v13 = vpack.c.bf16 %v707_v3, %v705_v56  ;;  %v4187_v56 = vld [vmem:[#allocation7 + $0xf0] ss:$28 sps:$4 sm:$0xff]  }
 0x186   : > { %v5189_v14 = vpack.c.bf16 %v676_v7, %v674_v4  ;;  %v530_v15 = vpop.f32.mrb[8].mxu0  ;;  %1895 = vmatpush1.bf16.msra.mxu1 %v4174_v55  ;;  %3841 = vmatpush3.bf16.msra.mxu0 %v4178_v60  ;;  %v5191_v18 = vpack.c.bf16 %v708_v11, %v706_v0  ;;  %v610_v19 = vpop.f32.mrb[8].mxu1  ;;  %v4192_v0 = vld [vmem:[#allocation7 + $0x12c] ss:$28 sps:$4 sm:$0xff]  }
 0x187   : > { %v531_v20 = vadd.f32 %v530_v15, %v5151_v9  ;;  %v532_v21 = vpop.f32.mrb[9].mxu0  ;;  %1896 = vmatprep.subr.bf16.mxu1 %v4181_v61  ;;  %3842 = vmatprep.subr.bf16.mxu0 %v4185_v2  ;;  %v611_v24 = vadd.f32 %v610_v19, %v5151_v9  ;;  %v612_v25 = vpop.f32.mrb[9].mxu1  ;;  %v4209_v1 = vld [vmem:[#allocation7 + $0x2f0] ss:$28 sps:$4 sm:$0xff]  }
 0x188   : > { %v533_v26 = vadd.f32 %v532_v21, %v5155_v10  ;;  %v534_v27 = vpop.f32.mrb[10].mxu0  ;;  %1548 = vmatprep.mubr.bf16.mxu1 %v5189_v14  ;;  %1741 = vmatprep.mubr.bf16.mxu0 %v5189_v14  ;;  %v613_v28 = vadd.f32 %v612_v25, %v5155_v10  ;;  %v614_v29 = vpop.f32.mrb[10].mxu1  ;;  %v4210_v25 = vld [vmem:[#allocation7 + $0x130] ss:$28 sps:$4 sm:$0xff]  }
 0x189   : > { %v535_v30 = vadd.f32 %v534_v27, %v5151_v9  ;;  %v536_v31 = vpop.f32.mrb[11].mxu0  ;;  %1549 = vmatmul.mubr.bf16.gmra.mrb[36].mxu1 %v5185_v12  ;;  %1742 = vmatmul.mubr.bf16.gmra.mrb[36].mxu0 %v5185_v12  ;;  %v709_v33 = vmax.f32 %v611_v24, 0.0  ;;  %v615_v34 = vadd.f32 %v614_v29, %v5151_v9  ;;  %v616_v38 = vpop.f32.mrb[11].mxu1  ;;  %v677_v45 = vmax.f32 %v531_v20, 0.0  ;;  %v4217_v29 = vld [vmem:[#allocation7 + $0x328] ss:$28 sps:$4 sm:$0xff]  }
 0x18a   : > { %v537_v39 = vadd.f32 %v536_v31, %v5155_v10  ;;  %1897 = vmatpush1.bf16.msra.mxu1 %v4179_v16  ;;  %3843 = vmatpush3.bf16.msra.mxu0 %v4186_v17  ;;  %v710_v43 = vmax.f32 %v613_v28, 0.0  ;;  %v617_v44 = vadd.f32 %v616_v38, %v5155_v10  ;;  %v678_v49 = vmax.f32 %v533_v26, 0.0  ;;  %v4190_v16 = vld [vmem:[#allocation7 + $0x128] ss:$28 sps:$4 sm:$0xff]  }
 0x18b   : > { %v679_v46 = vmax.f32 %v535_v30, 0.0  ;;  %1898 = vmatprep.subr.bf16.mxu1 %v4184_v22  ;;  %3844 = vmatprep.subr.bf16.mxu0 %v4193_v23  ;;  %v711_v48 = vmax.f32 %v615_v34, 0.0  ;;  %v4197_v22 = vld [vmem:[#allocation7 + $0x164] ss:$28 sps:$4 sm:$0xff]  }
 0x18c   : > { %v680_v50 = vmax.f32 %v537_v39, 0.0  ;;  %v712_v51 = vmax.f32 %v617_v44, 0.0  ;;  %v4218_v44 = vld [vmem:[#allocation7 + $0x168] ss:$28 sps:$4 sm:$0xff]  }
 0x18d   : > { %v5205_v52 = vpack.c.bf16 %v679_v46, %v677_v45  ;;  %v5207_v53 = vpack.c.bf16 %v711_v48, %v709_v33 }
 0x18e   : > { %v5209_v54 = vpack.c.bf16 %v680_v50, %v678_v49  ;;  %v540_v55 = vpop.f32.mrb[12].mxu0  ;;  %1899 = vmatpush1.bf16.msra.mxu1 %v4182_v32  ;;  %3845 = vmatpush3.bf16.msra.mxu0 %v4194_v42  ;;  %v5211_v58 = vpack.c.bf16 %v712_v51, %v710_v43  ;;  %v620_v59 = vpop.f32.mrb[12].mxu1  ;;  %v4225_v50 = vld [vmem:[#allocation7 + $0x360] ss:$28 sps:$4 sm:$0xff]  }
 0x18f   : > { %v541_v60 = vadd.f32 %v540_v55, %v5151_v9  ;;  %v542_v61 = vpop.f32.mrb[13].mxu0  ;;  %1900 = vmatprep.subr.bf16.mxu1 %v4189_v40  ;;  %3846 = vmatprep.subr.bf16.mxu0 %v4201_v47  ;;  %v621_v62 = vadd.f32 %v620_v59, %v5151_v9  ;;  %v622_v63 = vpop.f32.mrb[13].mxu1  ;;  %v4195_v40 = vld [vmem:[#allocation7 + $0x160] ss:$28 sps:$4 sm:$0xff]  }
 0x190   : > { %v543_v2 = vadd.f32 %v542_v61, %v5155_v10  ;;  %v544_v3 = vpop.f32.mrb[14].mxu0  ;;  %1558 = vmatprep.mubr.bf16.mxu1 %v5209_v54  ;;  %1751 = vmatprep.mubr.bf16.mxu0 %v5209_v54  ;;  %v623_v4 = vadd.f32 %v622_v63, %v5155_v10  ;;  %v624_v7 = vpop.f32.mrb[14].mxu1  ;;  %v4200_v47 = vld [vmem:[#allocation7 + $0x19c] ss:$28 sps:$4 sm:$0xff]  }
 0x191   : > { %v545_v11 = vadd.f32 %v544_v3, %v5151_v9  ;;  %v546_v15 = vpop.f32.mrb[15].mxu0  ;;  %1559 = vmatmul.mubr.bf16.gmra.mrb[40].mxu1 %v5205_v52  ;;  %1752 = vmatmul.mubr.bf16.gmra.mrb[40].mxu0 %v5205_v52  ;;  %v713_v17 = vmax.f32 %v621_v62, 0.0  ;;  %v625_v19 = vadd.f32 %v624_v7, %v5151_v9  ;;  %v626_v20 = vpop.f32.mrb[15].mxu1  ;;  %v681_v26 = vmax.f32 %v541_v60, 0.0 }
 0x192   : > { %v547_v21 = vadd.f32 %v546_v15, %v5155_v10  ;;  %1901 = vmatpush1.bf16.msra.mxu1 %v4187_v56  ;;  %3847 = vmatpush3.bf16.msra.mxu0 %v4202_v57  ;;  %v714_v23 = vmax.f32 %v623_v4, 0.0  ;;  %v627_v24 = vadd.f32 %v626_v20, %v5155_v10  ;;  %v682_v30 = vmax.f32 %v543_v2, 0.0  ;;  %v4226_v4 = vld [vmem:[#allocation7 + $0x1a0] ss:$28 sps:$4 sm:$0xff]   ;;  %v4205_v15 = vld [vmem:[#allocation7 + $0x1d4] ss:$28 sps:$4 sm:$0xff]  }
 0x193   : > { %v683_v27 = vmax.f32 %v545_v11, 0.0  ;;  %1902 = vmatprep.subr.bf16.mxu1 %v4192_v0  ;;  %v715_v28 = vmax.f32 %v625_v19, 0.0  ;;  %3848 = vmatprep.subr.bf16.mxu0 %v4209_v1  ;;  %v4198_v1 = vld [vmem:[#allocation7 + $0x198] ss:$28 sps:$4 sm:$0xff]  }
 0x194   : > { %v684_v31 = vmax.f32 %v547_v21, 0.0  ;;  %v716_v32 = vmax.f32 %v627_v24, 0.0 }
 0x195   : > { %v5225_v33 = vpack.c.bf16 %v683_v27, %v681_v26  ;;  %v5227_v34 = vpack.c.bf16 %v715_v28, %v713_v17 }
 0x196   : > { %v5229_v38 = vpack.c.bf16 %v684_v31, %v682_v30  ;;  %v550_v39 = vpop.f32.mrb[16].mxu0  ;;  %1903 = vmatpush1.bf16.msra.mxu1 %v4190_v16  ;;  %v5231_v42 = vpack.c.bf16 %v716_v32, %v714_v23  ;;  %3849 = vmatpush3.bf16.msra.mxu0 %v4210_v25  ;;  %v630_v43 = vpop.f32.mrb[16].mxu1  ;;  %v4203_v25 = vld [vmem:[#allocation7 + $0x1d0] ss:$28 sps:$4 sm:$0xff]  }
 0x197   : > { %v551_v45 = vadd.f32 %v550_v39, %v5151_v9  ;;  %v552_v46 = vpop.f32.mrb[17].mxu0  ;;  %1904 = vmatprep.subr.bf16.mxu1 %v4197_v22  ;;  %v631_v48 = vadd.f32 %v630_v43, %v5151_v9  ;;  %v632_v49 = vpop.f32.mrb[17].mxu1  ;;  %3850 = vmatprep.subr.bf16.mxu0 %v4217_v29  ;;  %v4208_v30 = vld [vmem:[#allocation7 + $0x20c] ss:$28 sps:$4 sm:$0xff]  }
 0x198   : > { %v553_v51 = vadd.f32 %v552_v46, %v5155_v10  ;;  %v554_v55 = vpop.f32.mrb[18].mxu0  ;;  %1568 = vmatprep.mubr.bf16.mxu1 %v5229_v38  ;;  %1761 = vmatprep.mubr.bf16.mxu0 %v5229_v38  ;;  %v633_v56 = vadd.f32 %v632_v49, %v5155_v10  ;;  %v634_v57 = vpop.f32.mrb[18].mxu1 }
 0x199   : > { %v555_v59 = vadd.f32 %v554_v55, %v5151_v9  ;;  %v556_v60 = vpop.f32.mrb[19].mxu0  ;;  %1569 = vmatmul.mubr.bf16.gmra.mrb[44].mxu1 %v5225_v33  ;;  %1762 = vmatmul.mubr.bf16.gmra.mrb[44].mxu0 %v5225_v33  ;;  %v717_v61 = vmax.f32 %v631_v48, 0.0  ;;  %v635_v0 = vadd.f32 %v634_v57, %v5151_v9  ;;  %v636_v62 = vpop.f32.mrb[19].mxu1  ;;  %v685_v7 = vmax.f32 %v551_v45, 0.0 }
 0x19a   : > { %v557_v63 = vadd.f32 %v556_v60, %v5155_v10  ;;  %1905 = vmatpush1.bf16.msra.mxu1 %v4195_v40  ;;  %v718_v2 = vmax.f32 %v633_v56, 0.0  ;;  %v637_v3 = vadd.f32 %v636_v62, %v5155_v10  ;;  %3851 = vmatpush3.bf16.msra.mxu0 %v4218_v44  ;;  %v686_v17 = vmax.f32 %v553_v51, 0.0  ;;  %v4206_v51 = vld [vmem:[#allocation7 + $0x208] ss:$28 sps:$4 sm:$0xff]  }
 0x19b   : > { %v687_v11 = vmax.f32 %v555_v59, 0.0  ;;  %1906 = vmatprep.subr.bf16.mxu1 %v4200_v47  ;;  %v719_v16 = vmax.f32 %v635_v0, 0.0  ;;  %3852 = vmatprep.subr.bf16.mxu0 %v4225_v50  ;;  %v4213_v60 = vld [vmem:[#allocation7 + $0x244] ss:$28 sps:$4 sm:$0xff]  }
 0x19c   : > { %v688_v19 = vmax.f32 %v557_v63, 0.0  ;;  %v720_v20 = vmax.f32 %v637_v3, 0.0 }
 0x19d   : > { %v5245_v21 = vpack.c.bf16 %v687_v11, %v685_v7  ;;  %v5247_v22 = vpack.c.bf16 %v719_v16, %v717_v61  ;;  %v4211_v7 = vld [vmem:[#allocation7 + $0x240] ss:$28 sps:$4 sm:$0xff]  }
 0x19e   : > { %v5249_v23 = vpack.c.bf16 %v688_v19, %v686_v17  ;;  %v560_v24 = vpop.f32.mrb[20].mxu0  ;;  %1907 = vmatpush1.bf16.msra.mxu1 %v4198_v1  ;;  %v5251_v26 = vpack.c.bf16 %v720_v20, %v718_v2  ;;  %v640_v27 = vpop.f32.mrb[20].mxu1  ;;  %3853 = vmatpush3.bf16.msra.mxu0 %v4226_v4  ;;  %v4216_v19 = vld [vmem:[#allocation7 + $0x27c] ss:$28 sps:$4 sm:$0xff]  }
 0x19f   : > { %v561_v28 = vadd.f32 %v560_v24, %v5151_v9  ;;  %v562_v29 = vpop.f32.mrb[21].mxu0  ;;  %1908 = vmatprep.subr.bf16.mxu1 %v4205_v15  ;;  %v641_v31 = vadd.f32 %v640_v27, %v5151_v9  ;;  %v642_v32 = vpop.f32.mrb[21].mxu1 }
 0x1a0   : > { %v563_v39 = vadd.f32 %v562_v29, %v5155_v10  ;;  %v564_v40 = vpop.f32.mrb[22].mxu0  ;;  %1578 = vmatprep.mubr.bf16.mxu1 %v5249_v23  ;;  %1771 = vmatprep.mubr.bf16.mxu0 %v5249_v23  ;;  %v643_v43 = vadd.f32 %v642_v32, %v5155_v10  ;;  %v644_v44 = vpop.f32.mrb[22].mxu1 }
 0x1a1   : > { %v565_v45 = vadd.f32 %v564_v40, %v5151_v9  ;;  %v566_v46 = vpop.f32.mrb[23].mxu0  ;;  %1579 = vmatmul.mubr.bf16.gmra.mrb[48].mxu1 %v5245_v21  ;;  %1772 = vmatmul.mubr.bf16.gmra.mrb[48].mxu0 %v5245_v21  ;;  %v721_v47 = vmax.f32 %v641_v31, 0.0  ;;  %v645_v48 = vadd.f32 %v644_v44, %v5151_v9  ;;  %v646_v49 = vpop.f32.mrb[23].mxu1  ;;  %v689_v57 = vmax.f32 %v561_v28, 0.0  ;;  %v4214_v44 = vld [vmem:[#allocation7 + $0x278] ss:$28 sps:$4 sm:$0xff]  }
 0x1a2   : > { %v567_v50 = vadd.f32 %v566_v46, %v5155_v10  ;;  %1909 = vmatpush1.bf16.msra.mxu1 %v4203_v25  ;;  %v722_v55 = vmax.f32 %v643_v43, 0.0  ;;  %v647_v56 = vadd.f32 %v646_v49, %v5155_v10  ;;  %v690_v0 = vmax.f32 %v563_v39, 0.0  ;;  %v4221_v49 = vld [vmem:[#allocation7 + $0x2b4] ss:$28 sps:$4 sm:$0xff]  }
 0x1a3   : > { %v691_v59 = vmax.f32 %v565_v45, 0.0  ;;  %1910 = vmatprep.subr.bf16.mxu1 %v4208_v30  ;;  %v723_v61 = vmax.f32 %v645_v48, 0.0 }
 0x1a4   : > { %v692_v62 = vmax.f32 %v567_v50, 0.0  ;;  %v724_v63 = vmax.f32 %v647_v56, 0.0 }
 0x1a5   : > { %v5265_v1 = vpack.c.bf16 %v691_v59, %v689_v57  ;;  %v5267_v2 = vpack.c.bf16 %v723_v61, %v721_v47 }
 0x1a6   : > { %v5269_v3 = vpack.c.bf16 %v692_v62, %v690_v0  ;;  %v570_v4 = vpop.f32.mrb[24].mxu0  ;;  %1911 = vmatpush1.bf16.msra.mxu1 %v4206_v51  ;;  %v5271_v11 = vpack.c.bf16 %v724_v63, %v722_v55  ;;  %v650_v15 = vpop.f32.mrb[24].mxu1  ;;  %v4219_v0 = vld [vmem:[#allocation7 + $0x2b0] ss:$28 sps:$4 sm:$0xff]  }
 0x1a7   : > { %v571_v16 = vadd.f32 %v570_v4, %v5151_v9  ;;  %v572_v17 = vpop.f32.mrb[25].mxu0  ;;  %1912 = vmatprep.subr.bf16.mxu1 %v4213_v60  ;;  %v651_v20 = vadd.f32 %v650_v15, %v5151_v9  ;;  %v652_v24 = vpop.f32.mrb[25].mxu1  ;;  %v4224_v15 = vld [vmem:[#allocation7 + $0x2ec] ss:$28 sps:$4 sm:$0xff]  }
 0x1a8   : > { %v573_v25 = vadd.f32 %v572_v17, %v5155_v10  ;;  %v574_v27 = vpop.f32.mrb[26].mxu0  ;;  %1588 = vmatprep.mubr.bf16.mxu1 %v5269_v3  ;;  %1781 = vmatprep.mubr.bf16.mxu0 %v5269_v3  ;;  %v653_v28 = vadd.f32 %v652_v24, %v5155_v10  ;;  %v654_v29 = vpop.f32.mrb[26].mxu1 }
 0x1a9   : > { %v575_v30 = vadd.f32 %v574_v27, %v5151_v9  ;;  %v576_v31 = vpop.f32.mrb[27].mxu0  ;;  %1589 = vmatmul.mubr.bf16.gmra.mrb[52].mxu1 %v5265_v1  ;;  %1782 = vmatmul.mubr.bf16.gmra.mrb[52].mxu0 %v5265_v1  ;;  %v725_v32 = vmax.f32 %v651_v20, 0.0  ;;  %v655_v39 = vadd.f32 %v654_v29, %v5151_v9  ;;  %v656_v40 = vpop.f32.mrb[27].mxu1  ;;  %v693_v47 = vmax.f32 %v571_v16, 0.0 }
 0x1aa   : > { %v577_v43 = vadd.f32 %v576_v31, %v5155_v10  ;;  %1913 = vmatpush1.bf16.msra.mxu1 %v4211_v7  ;;  %v726_v45 = vmax.f32 %v653_v28, 0.0  ;;  %v657_v46 = vadd.f32 %v656_v40, %v5155_v10  ;;  %v694_v51 = vmax.f32 %v573_v25, 0.0 }
 0x1ab   : > { %v695_v48 = vmax.f32 %v575_v30, 0.0  ;;  %1914 = vmatprep.subr.bf16.mxu1 %v4216_v19  ;;  %v727_v50 = vmax.f32 %v655_v39, 0.0  ;;  %v4222_v39 = vld [vmem:[#allocation7 + $0x2e8] ss:$28 sps:$4 sm:$0xff]  }
 0x1ac   : > { %v696_v55 = vmax.f32 %v577_v43, 0.0  ;;  %v728_v56 = vmax.f32 %v657_v46, 0.0 }
 0x1ad   : > { %v5285_v57 = vpack.c.bf16 %v695_v48, %v693_v47  ;;  %v5287_v59 = vpack.c.bf16 %v727_v50, %v725_v32  ;;  %v4229_v47 = vld [vmem:[#allocation7 + $0x324] ss:$28 sps:$4 sm:$0xff]  }
 0x1ae   : > { %v5289_v60 = vpack.c.bf16 %v696_v55, %v694_v51  ;;  %v580_v61 = vpop.f32.mrb[28].mxu0  ;;  %1915 = vmatpush1.bf16.msra.mxu1 %v4214_v44  ;;  %v5291_v62 = vpack.c.bf16 %v728_v56, %v726_v45  ;;  %v660_v63 = vpop.f32.mrb[28].mxu1 }
 0x1af   : > { %v581_v4 = vadd.f32 %v580_v61, %v5151_v9  ;;  %v582_v7 = vpop.f32.mrb[29].mxu0  ;;  %1916 = vmatprep.subr.bf16.mxu1 %v4221_v49  ;;  %v661_v16 = vadd.f32 %v660_v63, %v5151_v9  ;;  %v662_v17 = vpop.f32.mrb[29].mxu1  ;;  %v4227_v61 = vld [vmem:[#allocation7 + $0x320] ss:$28 sps:$4 sm:$0xff]  }
 0x1b0   : > { %v583_v19 = vadd.f32 %v582_v7, %v5155_v10  ;;  %v584_v20 = vpop.f32.mrb[30].mxu0  ;;  %1598 = vmatprep.mubr.bf16.mxu1 %v5289_v60  ;;  %1791 = vmatprep.mubr.bf16.mxu0 %v5289_v60  ;;  %v663_v24 = vadd.f32 %v662_v17, %v5155_v10  ;;  %v664_v25 = vpop.f32.mrb[30].mxu1 }
 0x1b1   : > { %v585_v27 = vadd.f32 %v584_v20, %v5151_v9  ;;  %v586_v28 = vpop.f32.mrb[31].mxu0  ;;  %1599 = vmatmul.mubr.bf16.gmra.mrb[56].mxu1 %v5285_v57  ;;  %1792 = vmatmul.mubr.bf16.gmra.mrb[56].mxu0 %v5285_v57  ;;  %v729_v29 = vmax.f32 %v661_v16, 0.0  ;;  %v665_v30 = vadd.f32 %v664_v25, %v5151_v9  ;;  %v666_v31 = vpop.f32.mrb[31].mxu1  ;;  %v697_v44 = vmax.f32 %v581_v4, 0.0 }
 0x1b2   : > { %v587_v32 = vadd.f32 %v586_v28, %v5155_v10  ;;  %1917 = vmatpush1.bf16.msra.mxu1 %v4219_v0  ;;  %v730_v40 = vmax.f32 %v663_v24, 0.0  ;;  %v667_v43 = vadd.f32 %v666_v31, %v5155_v10  ;;  %v698_v48 = vmax.f32 %v583_v19, 0.0  ;;  %v4232_v10 = vld [vmem:[#allocation7 + $0x35c] ss:$28 sps:$4 sm:$0xff]  }
 0x1b3   : > { %v699_v45 = vmax.f32 %v585_v27, 0.0  ;;  %1918 = vmatprep.subr.bf16.mxu1 %v4224_v15  ;;  %v731_v46 = vmax.f32 %v665_v30, 0.0  ;;  %v4230_v0 = vld [vmem:[#allocation7 + $0x358] ss:$28 sps:$4 sm:$0xff]  }
 0x1b4   : > { %v700_v49 = vmax.f32 %v587_v32, 0.0  ;;  %v732_v50 = vmax.f32 %v667_v43, 0.0 }
 0x1b5   : > { %v5305_v51 = vpack.c.bf16 %v699_v45, %v697_v44  ;;  %v5307_v55 = vpack.c.bf16 %v731_v46, %v729_v29 }
 0x1b6   : > { %v5309_v9 = vpack.c.bf16 %v700_v49, %v698_v48  ;;  %1919 = vmatpush1.bf16.msra.mxu1 %v4222_v39  ;;  %v5311_v56 = vpack.c.bf16 %v732_v50, %v730_v40 }
 0x1b7   : > { %1920 = vmatprep.subr.bf16.mxu1 %v4229_v47 }
 0x1b8   : > { %1608 = vmatprep.mubr.bf16.mxu1 %v5309_v9  ;;  %1801 = vmatprep.mubr.bf16.mxu0 %v5309_v9 }
 0x1b9   : > { %1609 = vmatmul.mubr.bf16.gmra.mrb[60].mxu1 %v5305_v51  ;;  %1802 = vmatmul.mubr.bf16.gmra.mrb[60].mxu0 %v5305_v51 }
 0x1ba   : > { %1618 = vmatprep.mubr.bf16.mxu1 %v5171_v41  ;;  %1811 = vmatprep.mubr.bf16.mxu0 %v5171_v41 }
 0x1bb   : > { %1921 = vmatpush1.bf16.msra.mxu1 %v4227_v61 }
 0x1bc   : > { %1922 = vmatprep.subr.bf16.mxu1 %v4232_v10 }
 0x1bf   : > { %1923 = vmatpush1.bf16.msra.mxu1 %v4230_v0 }
 0x1c1   : > { %1619 = vmatmul.mubr.bf16.gmra.mrb[64].mxu1 %v5167_v36  ;;  %1812 = vmatmul.mubr.bf16.gmra.mrb[64].mxu0 %v5167_v36 }
 0x1c2   : > { %1628 = vmatprep.mubr.bf16.mxu1 %v5191_v18  ;;  %1821 = vmatprep.mubr.bf16.mxu0 %v5191_v18 }
 0x1c9   : > { %1629 = vmatmul.mubr.bf16.gmra.mrb[68].mxu1 %v5187_v13  ;;  %1822 = vmatmul.mubr.bf16.gmra.mrb[68].mxu0 %v5187_v13 }
 0x1ca   : > { %1638 = vmatprep.mubr.bf16.mxu1 %v5211_v58  ;;  %1831 = vmatprep.mubr.bf16.mxu0 %v5211_v58 }
 0x1d1   : > { %1639 = vmatmul.mubr.bf16.gmra.mrb[72].mxu1 %v5207_v53  ;;  %1832 = vmatmul.mubr.bf16.gmra.mrb[72].mxu0 %v5207_v53 }
 0x1d2   : > { %1648 = vmatprep.mubr.bf16.mxu1 %v5231_v42  ;;  %1841 = vmatprep.mubr.bf16.mxu0 %v5231_v42 }
 0x1d9   : > { %1649 = vmatmul.mubr.bf16.gmra.mrb[76].mxu1 %v5227_v34  ;;  %1842 = vmatmul.mubr.bf16.gmra.mrb[76].mxu0 %v5227_v34 }
 0x1da   : > { %1658 = vmatprep.mubr.bf16.mxu1 %v5251_v26  ;;  %1851 = vmatprep.mubr.bf16.mxu0 %v5251_v26 }
 0x1e1   : > { %1659 = vmatmul.mubr.bf16.gmra.mrb[80].mxu1 %v5247_v22  ;;  %1852 = vmatmul.mubr.bf16.gmra.mrb[80].mxu0 %v5247_v22 }
 0x1e2   : > { %1668 = vmatprep.mubr.bf16.mxu1 %v5271_v11  ;;  %1861 = vmatprep.mubr.bf16.mxu0 %v5271_v11 }
 0x1e9   : > { %1669 = vmatmul.mubr.bf16.gmra.mrb[84].mxu1 %v5267_v2  ;;  %1862 = vmatmul.mubr.bf16.gmra.mrb[84].mxu0 %v5267_v2 }
 0x1ea   : > { %1678 = vmatprep.mubr.bf16.mxu1 %v5291_v62  ;;  %1871 = vmatprep.mubr.bf16.mxu0 %v5291_v62 }
 0x1f1   : > { %1679 = vmatmul.mubr.bf16.gmra.mrb[88].mxu1 %v5287_v59  ;;  %1872 = vmatmul.mubr.bf16.gmra.mrb[88].mxu0 %v5287_v59 }
 0x1f2   : > { %1688 = vmatprep.mubr.bf16.mxu1 %v5311_v56  ;;  %1881 = vmatprep.mubr.bf16.mxu0 %v5311_v56 }
 0x1f9   : > { %1689 = vmatmul.mubr.bf16.gmra.mrb[92].mxu1 %v5307_v55  ;;  %1882 = vmatmul.mubr.bf16.gmra.mrb[92].mxu0 %v5307_v55 }
 0x1fa   : > { %1924 = vmatprep.mubr.bf16.mxu1 %v5169_v37  ;;  %2117 = vmatprep.mubr.bf16.mxu0 %v5169_v37  ;;  %v909_v37 = vsub.s32 3, %v5145_v5 }
 0x201   : > { %1925 = vmatmul.mubr.bf16.vlgmr.msra.gmra.mrb[96].mxu1 %v5165_v35  ;;  %2118 = vmatmul.mubr.bf16.vlgmr.msra.gmra.mrb[96].mxu0 %v5165_v35  ;;  %v905_v35 = vsub.s32 2, %v5145_v5 }
 0x202   : > { %1934 = vmatprep.mubr.bf16.mxu1 %v5189_v14  ;;  %2125 = vmatprep.mubr.bf16.mxu0 %v5189_v14 }
 0x209   : > { %1935 = vmatmul.mubr.bf16.gmra.mrb[100].mxu1 %v5185_v12  ;;  %2126 = vmatmul.mubr.bf16.gmra.mrb[100].mxu0 %v5185_v12 }
 0x20a   : > { %1944 = vmatprep.mubr.bf16.mxu1 %v5209_v54  ;;  %2133 = vmatprep.mubr.bf16.mxu0 %v5209_v54 }
 0x211   : > { %1945 = vmatmul.mubr.bf16.gmra.mrb[104].mxu1 %v5205_v52  ;;  %2134 = vmatmul.mubr.bf16.gmra.mrb[104].mxu0 %v5205_v52 }
 0x212   : > { %1954 = vmatprep.mubr.bf16.mxu1 %v5229_v38  ;;  %2141 = vmatprep.mubr.bf16.mxu0 %v5229_v38 }
 0x219   : > { %1955 = vmatmul.mubr.bf16.gmra.mrb[108].mxu1 %v5225_v33  ;;  %2142 = vmatmul.mubr.bf16.gmra.mrb[108].mxu0 %v5225_v33 }
 0x21a   : > { %1964 = vmatprep.mubr.bf16.mxu1 %v5249_v23  ;;  %2149 = vmatprep.mubr.bf16.mxu0 %v5249_v23 }
 0x221   : > { %1965 = vmatmul.mubr.bf16.gmra.mrb[112].mxu1 %v5245_v21  ;;  %2150 = vmatmul.mubr.bf16.gmra.mrb[112].mxu0 %v5245_v21 }
 0x222   : > { %1974 = vmatprep.mubr.bf16.mxu1 %v5269_v3  ;;  %2157 = vmatprep.mubr.bf16.mxu0 %v5269_v3 }
 0x229   : > { %1975 = vmatmul.mubr.bf16.gmra.mrb[116].mxu1 %v5265_v1  ;;  %2158 = vmatmul.mubr.bf16.gmra.mrb[116].mxu0 %v5265_v1 }
 0x22a   : > { %1984 = vmatprep.mubr.bf16.mxu1 %v5289_v60  ;;  %2165 = vmatprep.mubr.bf16.mxu0 %v5289_v60 }
 0x231   : > { %1985 = vmatmul.mubr.bf16.gmra.mrb[120].mxu1 %v5285_v57  ;;  %2166 = vmatmul.mubr.bf16.gmra.mrb[120].mxu0 %v5285_v57 }
 0x232   : > { %1994 = vmatprep.mubr.bf16.mxu1 %v5309_v9  ;;  %2173 = vmatprep.mubr.bf16.mxu0 %v5309_v9 }
 0x239   : > { %1995 = vmatmul.mubr.bf16.gmra.mrb[124].mxu1 %v5305_v51  ;;  %2174 = vmatmul.mubr.bf16.gmra.mrb[124].mxu0 %v5305_v51 }
 0x23a   : > { %2004 = vmatprep.mubr.bf16.mxu1 %v5171_v41  ;;  %2181 = vmatprep.mubr.bf16.mxu0 %v5171_v41  ;;  %v893_v41 = vld [vmem:[#allocation8] sm:$0xff] }
 0x23b   : > { %v5399_v12 = vrot.slane %v893_v41, %v905_v35  ;;  %v5407_v14 = vrot.slane %v893_v41, %v909_v37 }
 0x241   : > { %2005 = vmatmul.mubr.bf16.gmra.mrb[128].mxu1 %v5167_v36  ;;  %2182 = vmatmul.mubr.bf16.gmra.mrb[128].mxu0 %v5167_v36  ;;  %v5397_v36 = vrot.slane %v893_v41, %v347_v6 }
 0x242   : > { %2014 = vmatprep.mubr.bf16.mxu1 %v5191_v18  ;;  %2189 = vmatprep.mubr.bf16.mxu0 %v5191_v18 }
 0x249   : > { %2015 = vmatmul.mubr.bf16.gmra.mrb[132].mxu1 %v5187_v13  ;;  %2190 = vmatmul.mubr.bf16.gmra.mrb[132].mxu0 %v5187_v13  ;;  %v5405_v13 = vrot.slane %v893_v41, %v351_v8 }
 0x24a   : > { %2024 = vmatprep.mubr.bf16.mxu1 %v5211_v58  ;;  %2197 = vmatprep.mubr.bf16.mxu0 %v5211_v58 }
 0x251   : > { %2025 = vmatmul.mubr.bf16.gmra.mrb[136].mxu1 %v5207_v53  ;;  %2198 = vmatmul.mubr.bf16.gmra.mrb[136].mxu0 %v5207_v53 }
 0x252   : > { %2034 = vmatprep.mubr.bf16.mxu1 %v5231_v42  ;;  %2205 = vmatprep.mubr.bf16.mxu0 %v5231_v42 }
 0x254   : > { %v1540_v18 = vpop.f32.mrb[32].mxu1  ;;  %v1733_v52 = vpop.f32.mrb[32].mxu0 }
 0x255   : > { %v1541_v53 = vadd.f32 %v1540_v18, %v5397_v36  ;;  %v1734_v54 = vadd.f32 %v1733_v52, %v5399_v12  ;;  %v1542_v6 = vpop.f32.mrb[33].mxu1  ;;  %v1735_v58 = vpop.f32.mrb[33].mxu0 }
 0x256   : > { %v1543_v33 = vadd.f32 %v1542_v6, %v5405_v13  ;;  %v1736_v38 = vadd.f32 %v1735_v58, %v5407_v14  ;;  %v1544_v21 = vpop.f32.mrb[34].mxu1  ;;  %v1737_v42 = vpop.f32.mrb[34].mxu0 }
 0x257   : > { %4233 = vtanh.f32 %v1541_v53  ;;  %v1545_v8 = vadd.f32 %v1544_v21, %v5397_v36  ;;  %v1546_v23 = vpop.f32.mrb[35].mxu1  ;;  %v1739_v1 = vpop.f32.mrb[35].mxu0  ;;  %v1738_v3 = vadd.f32 %v1737_v42, %v5399_v12 }
 0x258   : > { %4235 = vtanh.f32 %v1734_v54  ;;  %v1547_v57 = vadd.f32 %v1546_v23, %v5405_v13  ;;  %v1740_v60 = vadd.f32 %v1739_v1, %v5407_v14 }
 0x259   : > { %4237 = vtanh.f32 %v1543_v33  ;;  %2035 = vmatmul.mubr.bf16.gmra.mrb[140].mxu1 %v5227_v34  ;;  %2206 = vmatmul.mubr.bf16.gmra.mrb[140].mxu0 %v5227_v34 }
 0x25a   : > { %4239 = vtanh.f32 %v1736_v38  ;;  %2044 = vmatprep.mubr.bf16.mxu1 %v5251_v26  ;;  %2213 = vmatprep.mubr.bf16.mxu0 %v5251_v26 }
 0x25b   : > { %4241 = vtanh.f32 %v1545_v8 }
 0x25c   : > { %4243 = vtanh.f32 %v1738_v3  ;;  %v1550_v63 = vpop.f32.mrb[36].mxu1  ;;  %v1743_v4 = vpop.f32.mrb[36].mxu0 }
 0x25d   : > { %4245 = vtanh.f32 %v1547_v57  ;;  %v1551_v7 = vadd.f32 %v1550_v63, %v5397_v36  ;;  %v1744_v15 = vadd.f32 %v1743_v4, %v5399_v12  ;;  %v1552_v16 = vpop.f32.mrb[37].mxu1  ;;  %v1745_v34 = vpop.f32.mrb[37].mxu0 }
 0x25e   : > { %4247 = vtanh.f32 %v1740_v60  ;;  %v1553_v17 = vadd.f32 %v1552_v16, %v5405_v13  ;;  %v1746_v19 = vadd.f32 %v1745_v34, %v5407_v14  ;;  %v1554_v20 = vpop.f32.mrb[38].mxu1  ;;  %v1747_v26 = vpop.f32.mrb[38].mxu0 }
 0x25f   : > { %4249 = vtanh.f32 %v1551_v7  ;;  %v1555_v24 = vadd.f32 %v1554_v20, %v5397_v36  ;;  %v1556_v25 = vpop.f32.mrb[39].mxu1  ;;  %v1749_v27 = vpop.f32.mrb[39].mxu0  ;;  %v1748_v28 = vadd.f32 %v1747_v26, %v5399_v12 }
 0x260   : > { %4251 = vtanh.f32 %v1744_v15  ;;  %v1557_v30 = vadd.f32 %v1556_v25, %v5405_v13  ;;  %v1750_v32 = vadd.f32 %v1749_v27, %v5407_v14 }
 0x261   : > { %v4234_v29 = vpop.eup %4233  ;;  %4253 = vtanh.f32 %v1553_v17  ;;  %2045 = vmatmul.mubr.bf16.gmra.mrb[144].mxu1 %v5247_v22  ;;  %2214 = vmatmul.mubr.bf16.gmra.mrb[144].mxu0 %v5247_v22 }
 0x262   : > { %v4236_v31 = vpop.eup %4235  ;;  %4255 = vtanh.f32 %v1746_v19  ;;  %2054 = vmatprep.mubr.bf16.mxu1 %v5271_v11  ;;  %2221 = vmatprep.mubr.bf16.mxu0 %v5271_v11 }
 0x263   : > { %v4238_v39 = vpop.eup %4237  ;;  %4257 = vtanh.f32 %v1555_v24 }
 0x264   : > { %v4240_v40 = vpop.eup %4239  ;;  %v3710_v43 = vpack.c.bf16 %v4238_v39, %v4234_v29  ;;  %4259 = vtanh.f32 %v1748_v28  ;;  %v1560_v44 = vpop.f32.mrb[40].mxu1 }
 0x265   : > { %v1753_v45 = vpop.f32.mrb[40].mxu0  ;;  %v4242_v46 = vpop.eup %4241  ;;  %v3711_v47 = vpack.c.bf16 %v4240_v40, %v4236_v31  ;;  %4261 = vtanh.f32 %v1557_v30  ;;  %v1561_v22 = vadd.f32 %v1560_v44, %v5397_v36 }
 0x266   : > { %v1754_v48 = vadd.f32 %v1753_v45, %v5399_v12  ;;  %v1562_v49 = vpop.f32.mrb[41].mxu1  ;;  %v1755_v50 = vpop.f32.mrb[41].mxu0  ;;  %3174 = vst [vmem:[%s5441_s16] sm:$0xff] %v3710_v43  ;;  %4263 = vtanh.f32 %v1750_v32 }
 0x267   : > { %v4244_v51 = vpop.eup %4243  ;;  %v1563_v11 = vadd.f32 %v1562_v49, %v5405_v13  ;;  %v1756_v9 = vadd.f32 %v1755_v50, %v5407_v14  ;;  %v1564_v61 = vpop.f32.mrb[42].mxu1  ;;  %3175 = vst [vmem:[%s5441_s16 + $0x8] sm:$0xff] %v3711_v47  ;;  %4265 = vtanh.f32 %v1561_v22 }
 0x268   : > { %v1757_v10 = vpop.f32.mrb[42].mxu0  ;;  %v4246_v0 = vpop.eup %4245  ;;  %v1565_v35 = vadd.f32 %v1564_v61, %v5397_v36  ;;  %4267 = vtanh.f32 %v1754_v48 }
 0x269   : > { %v1566_v37 = vpop.f32.mrb[43].mxu1  ;;  %v1759_v41 = vpop.f32.mrb[43].mxu0  ;;  %v3714_v52 = vpack.c.bf16 %v4246_v0, %v4242_v46  ;;  %v1758_v53 = vadd.f32 %v1757_v10, %v5399_v12  ;;  %4269 = vtanh.f32 %v1563_v11  ;;  %2055 = vmatmul.mubr.bf16.gmra.mrb[148].mxu1 %v5267_v2  ;;  %2222 = vmatmul.mubr.bf16.gmra.mrb[148].mxu0 %v5267_v2 }
 0x26a   : > { %v4248_v18 = vpop.eup %4247  ;;  %v1567_v58 = vadd.f32 %v1566_v37, %v5405_v13  ;;  %4271 = vtanh.f32 %v1756_v9  ;;  %v1760_v38 = vadd.f32 %v1759_v41, %v5407_v14  ;;  %2064 = vmatprep.mubr.bf16.mxu1 %v5291_v62  ;;  %2229 = vmatprep.mubr.bf16.mxu0 %v5291_v62 }
 0x26b   : > { %v4250_v54 = vpop.eup %4249  ;;  %v3715_v6 = vpack.c.bf16 %v4248_v18, %v4244_v51  ;;  %3178 = vst [vmem:[%s5441_s16 + $0x1c] sm:$0xff] %v3714_v52  ;;  %4273 = vtanh.f32 %v1565_v35 }
 0x26c   : > { %v4252_v33 = vpop.eup %4251  ;;  %4275 = vtanh.f32 %v1758_v53  ;;  %v1570_v23 = vpop.f32.mrb[44].mxu1 }
 0x26d   : > { %v4254_v21 = vpop.eup %4253  ;;  %3179 = vst [vmem:[%s5441_s16 + $0x24] sm:$0xff] %v3715_v6  ;;  %v1763_v1 = vpop.f32.mrb[44].mxu0  ;;  %4277 = vtanh.f32 %v1567_v58  ;;  %v1571_v57 = vadd.f32 %v1570_v23, %v5397_v36 }
 0x26e   : > { %v4256_v42 = vpop.eup %4255  ;;  %v3718_v8 = vpack.c.bf16 %v4254_v21, %v4250_v54  ;;  %v1764_v60 = vadd.f32 %v1763_v1, %v5399_v12  ;;  %v1572_v63 = vpop.f32.mrb[45].mxu1  ;;  %4279 = vtanh.f32 %v1760_v38 }
 0x26f   : > { %v4258_v2 = vpop.eup %4257  ;;  %v3719_v3 = vpack.c.bf16 %v4256_v42, %v4252_v33  ;;  %v1765_v4 = vpop.f32.mrb[45].mxu0  ;;  %v1573_v7 = vadd.f32 %v1572_v63, %v5405_v13  ;;  %4281 = vtanh.f32 %v1571_v57 }
 0x270   : > { %v4260_v62 = vpop.eup %4259  ;;  %3182 = vst [vmem:[%s5441_s16 + $0x38] sm:$0xff] %v3718_v8  ;;  %v1766_v15 = vadd.f32 %v1765_v4, %v5407_v14  ;;  %v1574_v16 = vpop.f32.mrb[46].mxu1  ;;  %4283 = vtanh.f32 %v1764_v60 }
 0x271   : > { %v1767_v34 = vpop.f32.mrb[46].mxu0  ;;  %v4262_v17 = vpop.eup %4261  ;;  %3183 = vst [vmem:[%s5441_s16 + $0x40] sm:$0xff] %v3719_v3  ;;  %v1575_v19 = vadd.f32 %v1574_v16, %v5397_v36  ;;  %4285 = vtanh.f32 %v1573_v7  ;;  %2065 = vmatmul.mubr.bf16.gmra.mrb[152].mxu1 %v5287_v59  ;;  %2230 = vmatmul.mubr.bf16.gmra.mrb[152].mxu0 %v5287_v59 }
 0x272   : > { %v1576_v20 = vpop.f32.mrb[47].mxu1  ;;  %v1769_v26 = vpop.f32.mrb[47].mxu0  ;;  %v3722_v25 = vpack.c.bf16 %v4262_v17, %v4258_v2  ;;  %v1768_v27 = vadd.f32 %v1767_v34, %v5399_v12  ;;  %4287 = vtanh.f32 %v1766_v15  ;;  %2074 = vmatprep.mubr.bf16.mxu1 %v5311_v56  ;;  %2237 = vmatprep.mubr.bf16.mxu0 %v5311_v56 }
 0x273   : > { %v4264_v24 = vpop.eup %4263  ;;  %v1577_v30 = vadd.f32 %v1576_v20, %v5405_v13  ;;  %v1770_v32 = vadd.f32 %v1769_v26, %v5407_v14  ;;  %4289 = vtanh.f32 %v1575_v19 }
 0x274   : > { %v4266_v28 = vpop.eup %4265  ;;  %v3723_v29 = vpack.c.bf16 %v4264_v24, %v4260_v62  ;;  %3186 = vst [vmem:[%s5441_s16 + $0x54] sm:$0xff] %v3722_v25  ;;  %4291 = vtanh.f32 %v1768_v27  ;;  %v1580_v44 = vpop.f32.mrb[48].mxu1 }
 0x275   : > { %v4268_v31 = vpop.eup %4267  ;;  %v1773_v45 = vpop.f32.mrb[48].mxu0  ;;  %4293 = vtanh.f32 %v1577_v30  ;;  %v1581_v47 = vadd.f32 %v1580_v44, %v5397_v36 }
 0x276   : > { %v4270_v39 = vpop.eup %4269  ;;  %3187 = vst [vmem:[%s5441_s16 + $0x5c] sm:$0xff] %v3723_v29  ;;  %v1774_v22 = vadd.f32 %v1773_v45, %v5399_v12  ;;  %v1582_v48 = vpop.f32.mrb[49].mxu1  ;;  %4295 = vtanh.f32 %v1770_v32 }
 0x277   : > { %v4272_v40 = vpop.eup %4271  ;;  %v3726_v43 = vpack.c.bf16 %v4270_v39, %v4266_v28  ;;  %v1775_v49 = vpop.f32.mrb[49].mxu0  ;;  %v1583_v50 = vadd.f32 %v1582_v48, %v5405_v13  ;;  %4297 = vtanh.f32 %v1581_v47 }
 0x278   : > { %v4274_v59 = vpop.eup %4273  ;;  %v3727_v46 = vpack.c.bf16 %v4272_v40, %v4268_v31  ;;  %v1776_v51 = vadd.f32 %v1775_v49, %v5407_v14  ;;  %v1584_v11 = vpop.f32.mrb[50].mxu1  ;;  %4299 = vtanh.f32 %v1774_v22 }
 0x279   : > { %v4276_v56 = vpop.eup %4275  ;;  %3190 = vst [vmem:[%s5441_s16 + $0x70] sm:$0xff] %v3726_v43  ;;  %v1777_v9 = vpop.f32.mrb[50].mxu0  ;;  %v1585_v10 = vadd.f32 %v1584_v11, %v5397_v36  ;;  %4301 = vtanh.f32 %v1583_v50  ;;  %2075 = vmatmul.mubr.bf16.gmra.mrb[156].mxu1 %v5307_v55  ;;  %2238 = vmatmul.mubr.bf16.gmra.mrb[156].mxu0 %v5307_v55 }
 0x27a   : > { %v4278_v61 = vpop.eup %4277  ;;  %3191 = vst [vmem:[%s5441_s16 + $0x78] sm:$0xff] %v3727_v46  ;;  %v1586_v0 = vpop.f32.mrb[51].mxu1  ;;  %v1778_v18 = vadd.f32 %v1777_v9, %v5399_v12  ;;  %4303 = vtanh.f32 %v1776_v51 }
 0x27b   : > { %v1779_v35 = vpop.f32.mrb[51].mxu0  ;;  %v4280_v37 = vpop.eup %4279  ;;  %v3730_v41 = vpack.c.bf16 %v4278_v61, %v4274_v59  ;;  %v1587_v54 = vadd.f32 %v1586_v0, %v5405_v13  ;;  %4305 = vtanh.f32 %v1585_v10 }
 0x27c   : > { %v4282_v52 = vpop.eup %4281  ;;  %v3731_v53 = vpack.c.bf16 %v4280_v37, %v4276_v56  ;;  %v1780_v58 = vadd.f32 %v1779_v35, %v5407_v14  ;;  %4307 = vtanh.f32 %v1778_v18  ;;  %v1590_v42 = vpop.f32.mrb[52].mxu1 }
 0x27d   : > { %v4284_v6 = vpop.eup %4283  ;;  %3194 = vst [vmem:[%s5441_s16 + $0x8c] sm:$0xff] %v3730_v41  ;;  %v1783_v8 = vpop.f32.mrb[52].mxu0  ;;  %4309 = vtanh.f32 %v1587_v54  ;;  %v1591_v55 = vadd.f32 %v1590_v42, %v5397_v36 }
 0x27e   : > { %v4286_v33 = vpop.eup %4285  ;;  %3195 = vst [vmem:[%s5441_s16 + $0x94] sm:$0xff] %v3731_v53  ;;  %v1784_v2 = vadd.f32 %v1783_v8, %v5399_v12  ;;  %v1592_v3 = vpop.f32.mrb[53].mxu1  ;;  %4311 = vtanh.f32 %v1780_v58 }
 0x27f   : > { %v4288_v38 = vpop.eup %4287  ;;  %v3734_v21 = vpack.c.bf16 %v4286_v33, %v4282_v52  ;;  %v1785_v57 = vpop.f32.mrb[53].mxu0  ;;  %v1593_v63 = vadd.f32 %v1592_v3, %v5405_v13  ;;  %4313 = vtanh.f32 %v1591_v55 }
 0x280   : > { %v4290_v23 = vpop.eup %4289  ;;  %v3735_v1 = vpack.c.bf16 %v4288_v38, %v4284_v6  ;;  %v1786_v4 = vadd.f32 %v1785_v57, %v5407_v14  ;;  %v1594_v62 = vpop.f32.mrb[54].mxu1  ;;  %4315 = vtanh.f32 %v1784_v2 }
 0x281   : > { %v4292_v60 = vpop.eup %4291  ;;  %3198 = vst [vmem:[%s5441_s16 + $0xa8] sm:$0xff] %v3734_v21  ;;  %v1787_v7 = vpop.f32.mrb[54].mxu0  ;;  %v1595_v16 = vadd.f32 %v1594_v62, %v5397_v36  ;;  %4317 = vtanh.f32 %v1593_v63 }
 0x282   : > { %v4294_v15 = vpop.eup %4293  ;;  %3199 = vst [vmem:[%s5441_s16 + $0xb0] sm:$0xff] %v3735_v1  ;;  %v1596_v34 = vpop.f32.mrb[55].mxu1  ;;  %v1788_v26 = vadd.f32 %v1787_v7, %v5399_v12  ;;  %4319 = vtanh.f32 %v1786_v4 }
 0x283   : > { %v1789_v17 = vpop.f32.mrb[55].mxu0  ;;  %v4296_v19 = vpop.eup %4295  ;;  %v3738_v20 = vpack.c.bf16 %v4294_v15, %v4290_v23  ;;  %v1597_v27 = vadd.f32 %v1596_v34, %v5405_v13  ;;  %4321 = vtanh.f32 %v1595_v16 }
 0x284   : > { %v4298_v24 = vpop.eup %4297  ;;  %v3739_v25 = vpack.c.bf16 %v4296_v19, %v4292_v60  ;;  %v1790_v29 = vadd.f32 %v1789_v17, %v5407_v14  ;;  %4323 = vtanh.f32 %v1788_v26  ;;  %v1600_v39 = vpop.f32.mrb[56].mxu1 }
 0x285   : > { %v4300_v28 = vpop.eup %4299  ;;  %3202 = vst [vmem:[%s5441_s16 + $0xc4] sm:$0xff] %v3738_v20  ;;  %v1793_v40 = vpop.f32.mrb[56].mxu0  ;;  %4325 = vtanh.f32 %v1597_v27  ;;  %v1601_v45 = vadd.f32 %v1600_v39, %v5397_v36 }
 0x286   : > { %v4302_v30 = vpop.eup %4301  ;;  %3203 = vst [vmem:[%s5441_s16 + $0xcc] sm:$0xff] %v3739_v25  ;;  %v1794_v59 = vadd.f32 %v1793_v40, %v5399_v12  ;;  %v1602_v46 = vpop.f32.mrb[57].mxu1  ;;  %4327 = vtanh.f32 %v1790_v29 }
 0x287   : > { %v4304_v31 = vpop.eup %4303  ;;  %v3742_v32 = vpack.c.bf16 %v4302_v30, %v4298_v24  ;;  %v1795_v47 = vpop.f32.mrb[57].mxu0  ;;  %v1603_v48 = vadd.f32 %v1602_v46, %v5405_v13  ;;  %4329 = vtanh.f32 %v1601_v45 }
 0x288   : > { %v4306_v43 = vpop.eup %4305  ;;  %v3743_v44 = vpack.c.bf16 %v4304_v31, %v4300_v28  ;;  %v1796_v49 = vadd.f32 %v1795_v47, %v5407_v14  ;;  %v1604_v56 = vpop.f32.mrb[58].mxu1  ;;  %4331 = vtanh.f32 %v1794_v59 }
 0x289   : > { %v4308_v22 = vpop.eup %4307  ;;  %3206 = vst [vmem:[%s5441_s16 + $0xe0] sm:$0xff] %v3742_v32  ;;  %v1797_v50 = vpop.f32.mrb[58].mxu0  ;;  %v1605_v11 = vadd.f32 %v1604_v56, %v5397_v36  ;;  %4333 = vtanh.f32 %v1603_v48 }
 0x28a   : > { %v4310_v51 = vpop.eup %4309  ;;  %3207 = vst [vmem:[%s5441_s16 + $0xe8] sm:$0xff] %v3743_v44  ;;  %v1606_v9 = vpop.f32.mrb[59].mxu1  ;;  %v1798_v35 = vadd.f32 %v1797_v50, %v5399_v12  ;;  %4335 = vtanh.f32 %v1796_v49 }
 0x28b   : > { %v1799_v61 = vpop.f32.mrb[59].mxu0  ;;  %v4312_v10 = vpop.eup %4311  ;;  %v3746_v0 = vpack.c.bf16 %v4310_v51, %v4306_v43  ;;  %v1607_v18 = vadd.f32 %v1606_v9, %v5405_v13  ;;  %4337 = vtanh.f32 %v1605_v11 }
 0x28c   : > { %v4314_v37 = vpop.eup %4313  ;;  %v3747_v41 = vpack.c.bf16 %v4312_v10, %v4308_v22  ;;  %v1800_v53 = vadd.f32 %v1799_v61, %v5407_v14  ;;  %4339 = vtanh.f32 %v1798_v35  ;;  %v1610_v33 = vpop.f32.mrb[60].mxu1 }
 0x28d   : > { %v4316_v52 = vpop.eup %4315  ;;  %3210 = vst [vmem:[%s5441_s16 + $0xfc] sm:$0xff] %v3746_v0  ;;  %v1803_v38 = vpop.f32.mrb[60].mxu0  ;;  %4341 = vtanh.f32 %v1607_v18  ;;  %v1611_v8 = vadd.f32 %v1610_v33, %v5397_v36 }
 0x28e   : > { %v4318_v54 = vpop.eup %4317  ;;  %3211 = vst [vmem:[%s5441_s16 + $0x104] sm:$0xff] %v3747_v41  ;;  %v1804_v23 = vadd.f32 %v1803_v38, %v5399_v12  ;;  %v1612_v1 = vpop.f32.mrb[61].mxu1  ;;  %4343 = vtanh.f32 %v1800_v53 }
 0x28f   : > { %v4320_v6 = vpop.eup %4319  ;;  %v3750_v58 = vpack.c.bf16 %v4318_v54, %v4314_v37  ;;  %v1805_v55 = vpop.f32.mrb[61].mxu0  ;;  %v1613_v3 = vadd.f32 %v1612_v1, %v5405_v13  ;;  %4345 = vtanh.f32 %v1611_v8 }
 0x290   : > { %v4322_v21 = vpop.eup %4321  ;;  %v3751_v42 = vpack.c.bf16 %v4320_v6, %v4316_v52  ;;  %v1806_v57 = vadd.f32 %v1805_v55, %v5407_v14  ;;  %v1614_v60 = vpop.f32.mrb[62].mxu1  ;;  %4347 = vtanh.f32 %v1804_v23 }
 0x291   : > { %v4324_v2 = vpop.eup %4323  ;;  %3214 = vst [vmem:[%s5441_s16 + $0x118] sm:$0xff] %v3750_v58  ;;  %v1807_v63 = vpop.f32.mrb[62].mxu0  ;;  %v1615_v62 = vadd.f32 %v1614_v60, %v5397_v36  ;;  %4349 = vtanh.f32 %v1613_v3 }
 0x292   : > { %v4326_v4 = vpop.eup %4325  ;;  %3215 = vst [vmem:[%s5441_s16 + $0x120] sm:$0xff] %v3751_v42  ;;  %v1616_v7 = vpop.f32.mrb[63].mxu1  ;;  %v1808_v17 = vadd.f32 %v1807_v63, %v5399_v12  ;;  %4351 = vtanh.f32 %v1806_v57 }
 0x293   : > { %v1809_v15 = vpop.f32.mrb[63].mxu0  ;;  %v4328_v16 = vpop.eup %4327  ;;  %v3754_v34 = vpack.c.bf16 %v4326_v4, %v4322_v21  ;;  %v1617_v26 = vadd.f32 %v1616_v7, %v5405_v13  ;;  %4353 = vtanh.f32 %v1615_v62 }
 0x294   : > { %v4330_v19 = vpop.eup %4329  ;;  %v3755_v20 = vpack.c.bf16 %v4328_v16, %v4324_v2  ;;  %v1810_v25 = vadd.f32 %v1809_v15, %v5407_v14  ;;  %4355 = vtanh.f32 %v1808_v17  ;;  %v1620_v30 = vpop.f32.mrb[64].mxu1 }
 0x295   : > { %v4332_v24 = vpop.eup %4331  ;;  %3218 = vst [vmem:[%s5441_s16 + $0x134] sm:$0xff] %v3754_v34  ;;  %v1813_v31 = vpop.f32.mrb[64].mxu0  ;;  %4357 = vtanh.f32 %v1617_v26  ;;  %v1621_v40 = vadd.f32 %v1620_v30, %v5397_v36 }
 0x296   : > { %v4334_v27 = vpop.eup %4333  ;;  %3219 = vst [vmem:[%s5441_s16 + $0x13c] sm:$0xff] %v3755_v20  ;;  %v1814_v43 = vadd.f32 %v1813_v31, %v5399_v12  ;;  %v1622_v44 = vpop.f32.mrb[65].mxu1  ;;  %4359 = vtanh.f32 %v1810_v25 }
 0x297   : > { %v4336_v28 = vpop.eup %4335  ;;  %v3758_v29 = vpack.c.bf16 %v4334_v27, %v4330_v19  ;;  %v1815_v45 = vpop.f32.mrb[65].mxu0  ;;  %v1623_v46 = vadd.f32 %v1622_v44, %v5405_v13  ;;  %4361 = vtanh.f32 %v1621_v40 }
 0x298   : > { %v4338_v32 = vpop.eup %4337  ;;  %v3759_v39 = vpack.c.bf16 %v4336_v28, %v4332_v24  ;;  %v1816_v47 = vadd.f32 %v1815_v45, %v5407_v14  ;;  %v1624_v22 = vpop.f32.mrb[66].mxu1  ;;  %4363 = vtanh.f32 %v1814_v43 }
 0x299   : > { %v4340_v59 = vpop.eup %4339  ;;  %3222 = vst [vmem:[%s5441_s16 + $0x150] sm:$0xff] %v3758_v29  ;;  %v1817_v48 = vpop.f32.mrb[66].mxu0  ;;  %v1625_v56 = vadd.f32 %v1624_v22, %v5397_v36  ;;  %4365 = vtanh.f32 %v1623_v46 }
 0x29a   : > { %v4342_v49 = vpop.eup %4341  ;;  %3223 = vst [vmem:[%s5441_s16 + $0x158] sm:$0xff] %v3759_v39  ;;  %v1626_v50 = vpop.f32.mrb[67].mxu1  ;;  %v1818_v61 = vadd.f32 %v1817_v48, %v5399_v12  ;;  %4367 = vtanh.f32 %v1816_v47 }
 0x29b   : > { %v1819_v51 = vpop.f32.mrb[67].mxu0  ;;  %v4344_v11 = vpop.eup %4343  ;;  %v3762_v9 = vpack.c.bf16 %v4342_v49, %v4338_v32  ;;  %v1627_v35 = vadd.f32 %v1626_v50, %v5405_v13  ;;  %4369 = vtanh.f32 %v1625_v56 }
 0x29c   : > { %v4346_v10 = vpop.eup %4345  ;;  %v3763_v0 = vpack.c.bf16 %v4344_v11, %v4340_v59  ;;  %v1820_v41 = vadd.f32 %v1819_v51, %v5407_v14  ;;  %4371 = vtanh.f32 %v1818_v61  ;;  %v1630_v54 = vpop.f32.mrb[68].mxu1 }
 0x29d   : > { %v4348_v37 = vpop.eup %4347  ;;  %3226 = vst [vmem:[%s5441_s16 + $0x16c] sm:$0xff] %v3762_v9  ;;  %v1823_v6 = vpop.f32.mrb[68].mxu0  ;;  %4373 = vtanh.f32 %v1627_v35  ;;  %v1631_v38 = vadd.f32 %v1630_v54, %v5397_v36 }
 0x29e   : > { %v4350_v18 = vpop.eup %4349  ;;  %3227 = vst [vmem:[%s5441_s16 + $0x174] sm:$0xff] %v3763_v0  ;;  %v1824_v21 = vadd.f32 %v1823_v6, %v5399_v12  ;;  %v1632_v42 = vpop.f32.mrb[69].mxu1  ;;  %4375 = vtanh.f32 %v1820_v41 }
 0x29f   : > { %v4352_v52 = vpop.eup %4351  ;;  %v3766_v53 = vpack.c.bf16 %v4350_v18, %v4346_v10  ;;  %v1825_v8 = vpop.f32.mrb[69].mxu0  ;;  %v1633_v1 = vadd.f32 %v1632_v42, %v5405_v13  ;;  %4377 = vtanh.f32 %v1631_v38 }
 0x2a0   : > { %v4354_v58 = vpop.eup %4353  ;;  %v3767_v33 = vpack.c.bf16 %v4352_v52, %v4348_v37  ;;  %v1826_v55 = vadd.f32 %v1825_v8, %v5407_v14  ;;  %v1634_v2 = vpop.f32.mrb[70].mxu1  ;;  %4379 = vtanh.f32 %v1824_v21 }
 0x2a1   : > { %v4356_v23 = vpop.eup %4355  ;;  %3230 = vst [vmem:[%s5441_s16 + $0x188] sm:$0xff] %v3766_v53  ;;  %v1827_v3 = vpop.f32.mrb[70].mxu0  ;;  %v1635_v60 = vadd.f32 %v1634_v2, %v5397_v36  ;;  %4381 = vtanh.f32 %v1633_v1 }
 0x2a2   : > { %v4358_v57 = vpop.eup %4357  ;;  %3231 = vst [vmem:[%s5441_s16 + $0x190] sm:$0xff] %v3767_v33  ;;  %v1636_v63 = vpop.f32.mrb[71].mxu1  ;;  %v1828_v15 = vadd.f32 %v1827_v3, %v5399_v12  ;;  %4383 = vtanh.f32 %v1826_v55 }
 0x2a3   : > { %v1829_v4 = vpop.f32.mrb[71].mxu0  ;;  %v4360_v62 = vpop.eup %4359  ;;  %v3770_v7 = vpack.c.bf16 %v4358_v57, %v4354_v58  ;;  %v1637_v17 = vadd.f32 %v1636_v63, %v5405_v13  ;;  %4385 = vtanh.f32 %v1635_v60 }
 0x2a4   : > { %v4362_v16 = vpop.eup %4361  ;;  %v3771_v34 = vpack.c.bf16 %v4360_v62, %v4356_v23  ;;  %v1830_v20 = vadd.f32 %v1829_v4, %v5407_v14  ;;  %4387 = vtanh.f32 %v1828_v15  ;;  %v1640_v27 = vpop.f32.mrb[72].mxu1 }
 0x2a5   : > { %v4364_v19 = vpop.eup %4363  ;;  %3234 = vst [vmem:[%s5441_s16 + $0x1a4] sm:$0xff] %v3770_v7  ;;  %v1833_v28 = vpop.f32.mrb[72].mxu0  ;;  %4389 = vtanh.f32 %v1637_v17  ;;  %v1641_v31 = vadd.f32 %v1640_v27, %v5397_v36 }
 0x2a6   : > { %v4366_v26 = vpop.eup %4365  ;;  %3235 = vst [vmem:[%s5441_s16 + $0x1ac] sm:$0xff] %v3771_v34  ;;  %v1834_v32 = vadd.f32 %v1833_v28, %v5399_v12  ;;  %v1642_v39 = vpop.f32.mrb[73].mxu1  ;;  %4391 = vtanh.f32 %v1830_v20 }
 0x2a7   : > { %v4368_v24 = vpop.eup %4367  ;;  %v3774_v25 = vpack.c.bf16 %v4366_v26, %v4362_v16  ;;  %v1835_v40 = vpop.f32.mrb[73].mxu0  ;;  %v1643_v44 = vadd.f32 %v1642_v39, %v5405_v13  ;;  %4393 = vtanh.f32 %v1641_v31 }
 0x2a8   : > { %v4370_v29 = vpop.eup %4369  ;;  %v3775_v30 = vpack.c.bf16 %v4368_v24, %v4364_v19  ;;  %v1836_v45 = vadd.f32 %v1835_v40, %v5407_v14  ;;  %v1644_v59 = vpop.f32.mrb[74].mxu1  ;;  %4395 = vtanh.f32 %v1834_v32 }
 0x2a9   : > { %v4372_v43 = vpop.eup %4371  ;;  %3238 = vst [vmem:[%s5441_s16 + $0x1c0] sm:$0xff] %v3774_v25  ;;  %v1837_v46 = vpop.f32.mrb[74].mxu0  ;;  %v1645_v22 = vadd.f32 %v1644_v59, %v5397_v36  ;;  %4397 = vtanh.f32 %v1643_v44 }
 0x2aa   : > { %v4374_v47 = vpop.eup %4373  ;;  %3239 = vst [vmem:[%s5441_s16 + $0x1c8] sm:$0xff] %v3775_v30  ;;  %v1646_v48 = vpop.f32.mrb[75].mxu1  ;;  %v1838_v51 = vadd.f32 %v1837_v46, %v5399_v12  ;;  %4399 = vtanh.f32 %v1836_v45 }
 0x2ab   : > { %v1839_v49 = vpop.f32.mrb[75].mxu0  ;;  %v4376_v56 = vpop.eup %4375  ;;  %v3778_v50 = vpack.c.bf16 %v4374_v47, %v4370_v29  ;;  %v1647_v61 = vadd.f32 %v1646_v48, %v5405_v13  ;;  %4401 = vtanh.f32 %v1645_v22 }
 0x2ac   : > { %v4378_v11 = vpop.eup %4377  ;;  %v3779_v9 = vpack.c.bf16 %v4376_v56, %v4372_v43  ;;  %v1840_v0 = vadd.f32 %v1839_v49, %v5407_v14  ;;  %4403 = vtanh.f32 %v1838_v51  ;;  %v1650_v18 = vpop.f32.mrb[76].mxu1 }
 0x2ad   : > { %v4380_v10 = vpop.eup %4379  ;;  %3242 = vst [vmem:[%s5441_s16 + $0x1dc] sm:$0xff] %v3778_v50  ;;  %v1843_v52 = vpop.f32.mrb[76].mxu0  ;;  %4405 = vtanh.f32 %v1647_v61  ;;  %v1651_v6 = vadd.f32 %v1650_v18, %v5397_v36 }
 0x2ae   : > { %v4382_v35 = vpop.eup %4381  ;;  %3243 = vst [vmem:[%s5441_s16 + $0x1e4] sm:$0xff] %v3779_v9  ;;  %v1844_v58 = vadd.f32 %v1843_v52, %v5399_v12  ;;  %v1652_v33 = vpop.f32.mrb[77].mxu1  ;;  %4407 = vtanh.f32 %v1840_v0 }
 0x2af   : > { %v4384_v37 = vpop.eup %4383  ;;  %v3782_v41 = vpack.c.bf16 %v4382_v35, %v4378_v11  ;;  %v1845_v38 = vpop.f32.mrb[77].mxu0  ;;  %v1653_v42 = vadd.f32 %v1652_v33, %v5405_v13  ;;  %4409 = vtanh.f32 %v1651_v6 }
 0x2b0   : > { %v4386_v53 = vpop.eup %4385  ;;  %v3783_v54 = vpack.c.bf16 %v4384_v37, %v4380_v10  ;;  %v1846_v8 = vadd.f32 %v1845_v38, %v5407_v14  ;;  %v1654_v23 = vpop.f32.mrb[78].mxu1  ;;  %4411 = vtanh.f32 %v1844_v58 }
 0x2b1   : > { %v4388_v21 = vpop.eup %4387  ;;  %3246 = vst [vmem:[%s5441_s16 + $0x1f8] sm:$0xff] %v3782_v41  ;;  %v1847_v1 = vpop.f32.mrb[78].mxu0  ;;  %v1655_v2 = vadd.f32 %v1654_v23, %v5397_v36  ;;  %4413 = vtanh.f32 %v1653_v42 }
 0x2b2   : > { %v4390_v55 = vpop.eup %4389  ;;  %3247 = vst [vmem:[%s5441_s16 + $0x200] sm:$0xff] %v3783_v54  ;;  %v1656_v3 = vpop.f32.mrb[79].mxu1  ;;  %v1848_v4 = vadd.f32 %v1847_v1, %v5399_v12  ;;  %4415 = vtanh.f32 %v1846_v8 }
 0x2b3   : > { %v1849_v57 = vpop.f32.mrb[79].mxu0  ;;  %v4392_v60 = vpop.eup %4391  ;;  %v3786_v63 = vpack.c.bf16 %v4390_v55, %v4386_v53  ;;  %v1657_v15 = vadd.f32 %v1656_v3, %v5405_v13  ;;  %4417 = vtanh.f32 %v1655_v2 }
 0x2b4   : > { %v4394_v62 = vpop.eup %4393  ;;  %v3787_v7 = vpack.c.bf16 %v4392_v60, %v4388_v21  ;;  %v1850_v34 = vadd.f32 %v1849_v57, %v5407_v14  ;;  %4419 = vtanh.f32 %v1848_v4  ;;  %v1660_v26 = vpop.f32.mrb[80].mxu1 }
 0x2b5   : > { %v4396_v16 = vpop.eup %4395  ;;  %3250 = vst [vmem:[%s5441_s16 + $0x214] sm:$0xff] %v3786_v63  ;;  %v1853_v24 = vpop.f32.mrb[80].mxu0  ;;  %4421 = vtanh.f32 %v1657_v15  ;;  %v1661_v28 = vadd.f32 %v1660_v26, %v5397_v36 }
 0x2b6   : > { %v4398_v17 = vpop.eup %4397  ;;  %3251 = vst [vmem:[%s5441_s16 + $0x21c] sm:$0xff] %v3787_v7  ;;  %v1854_v29 = vadd.f32 %v1853_v24, %v5399_v12  ;;  %v1662_v30 = vpop.f32.mrb[81].mxu1  ;;  %4423 = vtanh.f32 %v1850_v34 }
 0x2b7   : > { %v4400_v19 = vpop.eup %4399  ;;  %v3790_v20 = vpack.c.bf16 %v4398_v17, %v4394_v62  ;;  %v1855_v31 = vpop.f32.mrb[81].mxu0  ;;  %v1663_v39 = vadd.f32 %v1662_v30, %v5405_v13  ;;  %4425 = vtanh.f32 %v1661_v28 }
 0x2b8   : > { %v4402_v25 = vpop.eup %4401  ;;  %v3791_v27 = vpack.c.bf16 %v4400_v19, %v4396_v16  ;;  %v1856_v40 = vadd.f32 %v1855_v31, %v5407_v14  ;;  %v1664_v43 = vpop.f32.mrb[82].mxu1  ;;  %4427 = vtanh.f32 %v1854_v29 }
 0x2b9   : > { %v4404_v32 = vpop.eup %4403  ;;  %3254 = vst [vmem:[%s5441_s16 + $0x230] sm:$0xff] %v3790_v20  ;;  %v1857_v44 = vpop.f32.mrb[82].mxu0  ;;  %v1665_v59 = vadd.f32 %v1664_v43, %v5397_v36  ;;  %4429 = vtanh.f32 %v1663_v39 }
 0x2ba   : > { %v4406_v45 = vpop.eup %4405  ;;  %3255 = vst [vmem:[%s5441_s16 + $0x238] sm:$0xff] %v3791_v27  ;;  %v1666_v46 = vpop.f32.mrb[83].mxu1  ;;  %v1858_v49 = vadd.f32 %v1857_v44, %v5399_v12  ;;  %4431 = vtanh.f32 %v1856_v40 }
 0x2bb   : > { %v1859_v47 = vpop.f32.mrb[83].mxu0  ;;  %v4408_v22 = vpop.eup %4407  ;;  %v3794_v48 = vpack.c.bf16 %v4406_v45, %v4402_v25  ;;  %v1667_v51 = vadd.f32 %v1666_v46, %v5405_v13  ;;  %4433 = vtanh.f32 %v1665_v59 }
 0x2bc   : > { %v4410_v56 = vpop.eup %4409  ;;  %v3795_v50 = vpack.c.bf16 %v4408_v22, %v4404_v32  ;;  %v1860_v9 = vadd.f32 %v1859_v47, %v5407_v14  ;;  %4435 = vtanh.f32 %v1858_v49  ;;  %v1670_v35 = vpop.f32.mrb[84].mxu1 }
 0x2bd   : > { %v4412_v11 = vpop.eup %4411  ;;  %3258 = vst [vmem:[%s5441_s16 + $0x24c] sm:$0xff] %v3794_v48  ;;  %v1863_v37 = vpop.f32.mrb[84].mxu0  ;;  %4437 = vtanh.f32 %v1667_v51  ;;  %v1671_v52 = vadd.f32 %v1670_v35, %v5397_v36 }
 0x2be   : > { %v4414_v61 = vpop.eup %4413  ;;  %3259 = vst [vmem:[%s5441_s16 + $0x254] sm:$0xff] %v3795_v50  ;;  %v1864_v53 = vadd.f32 %v1863_v37, %v5399_v12  ;;  %v1672_v54 = vpop.f32.mrb[85].mxu1  ;;  %4439 = vtanh.f32 %v1860_v9  ;;  %v913_v9 = vsub.s32 4, %v5145_v5 }
 0x2bf   : > { %v4416_v10 = vpop.eup %4415  ;;  %v3798_v0 = vpack.c.bf16 %v4414_v61, %v4410_v56  ;;  %v1865_v6 = vpop.f32.mrb[85].mxu0  ;;  %v1673_v33 = vadd.f32 %v1672_v54, %v5405_v13  ;;  %4441 = vtanh.f32 %v1671_v52 }
 0x2c0   : > { %v4418_v41 = vpop.eup %4417  ;;  %v3799_v18 = vpack.c.bf16 %v4416_v10, %v4412_v11  ;;  %v1866_v38 = vadd.f32 %v1865_v6, %v5407_v14  ;;  %v1674_v21 = vpop.f32.mrb[86].mxu1  ;;  %4443 = vtanh.f32 %v1864_v53  ;;  %v917_v6 = vsub.s32 5, %v5145_v5 }
 0x2c1   : > { %v4420_v58 = vpop.eup %4419  ;;  %3262 = vst [vmem:[%s5441_s16 + $0x268] sm:$0xff] %v3798_v0  ;;  %v1867_v42 = vpop.f32.mrb[86].mxu0  ;;  %v1675_v23 = vadd.f32 %v1674_v21, %v5397_v36  ;;  %4445 = vtanh.f32 %v1673_v33 }
 0x2c2   : > { %v4422_v8 = vpop.eup %4421  ;;  %3263 = vst [vmem:[%s5441_s16 + $0x270] sm:$0xff] %v3799_v18  ;;  %v1676_v1 = vpop.f32.mrb[87].mxu1  ;;  %v1868_v57 = vadd.f32 %v1867_v42, %v5399_v12  ;;  %4447 = vtanh.f32 %v1866_v38 }
 0x2c3   : > { %v1869_v55 = vpop.f32.mrb[87].mxu0  ;;  %v4424_v2 = vpop.eup %4423  ;;  %v3802_v3 = vpack.c.bf16 %v4422_v8, %v4418_v41  ;;  %v1677_v4 = vadd.f32 %v1676_v1, %v5405_v13  ;;  %4449 = vtanh.f32 %v1675_v23 }
 0x2c4   : > { %v4426_v60 = vpop.eup %4425  ;;  %v3803_v63 = vpack.c.bf16 %v4424_v2, %v4420_v58  ;;  %v1870_v7 = vadd.f32 %v1869_v55, %v5407_v14  ;;  %4451 = vtanh.f32 %v1868_v57  ;;  %v1680_v17 = vpop.f32.mrb[88].mxu1  ;;  %v921_v2 = vsub.s32 6, %v5145_v5 }
 0x2c5   : > { %v4428_v62 = vpop.eup %4427  ;;  %3266 = vst [vmem:[%s5441_s16 + $0x284] sm:$0xff] %v3802_v3  ;;  %v1873_v19 = vpop.f32.mrb[88].mxu0  ;;  %4453 = vtanh.f32 %v1677_v4  ;;  %v1681_v24 = vadd.f32 %v1680_v17, %v5397_v36 }
 0x2c6   : > { %v4430_v15 = vpop.eup %4429  ;;  %3267 = vst [vmem:[%s5441_s16 + $0x28c] sm:$0xff] %v3803_v63  ;;  %v1874_v25 = vadd.f32 %v1873_v19, %v5399_v12  ;;  %v1682_v27 = vpop.f32.mrb[89].mxu1  ;;  %4455 = vtanh.f32 %v1870_v7 }
 0x2c7   : > { %v4432_v16 = vpop.eup %4431  ;;  %v3806_v34 = vpack.c.bf16 %v4430_v15, %v4426_v60  ;;  %v1875_v28 = vpop.f32.mrb[89].mxu0  ;;  %v1683_v30 = vadd.f32 %v1682_v27, %v5405_v13  ;;  %4457 = vtanh.f32 %v1681_v24 }
 0x2c8   : > { %v4434_v20 = vpop.eup %4433  ;;  %v3807_v26 = vpack.c.bf16 %v4432_v16, %v4428_v62  ;;  %v1876_v31 = vadd.f32 %v1875_v28, %v5407_v14  ;;  %v1684_v32 = vpop.f32.mrb[90].mxu1  ;;  %4459 = vtanh.f32 %v1874_v25  ;;  %v4681_v62 = vld [vmem:[#allocation8] sm:$0xff] }
 0x2c9   : > { %v4436_v29 = vpop.eup %4435  ;;  %3270 = vst [vmem:[%s5441_s16 + $0x2a0] sm:$0xff] %v3806_v34  ;;  %v1877_v39 = vpop.f32.mrb[90].mxu0  ;;  %v1685_v43 = vadd.f32 %v1684_v32, %v5397_v36  ;;  %4461 = vtanh.f32 %v1683_v30  ;;  %v5619_v7 = vrot.slane %v4681_v62, %v913_v9  ;;  %v5623_v16 = vrot.slane %v4681_v62, %v917_v6 }
 0x2ca   : > { %v4438_v40 = vpop.eup %4437  ;;  %3271 = vst [vmem:[%s5441_s16 + $0x2a8] sm:$0xff] %v3807_v26  ;;  %v1686_v44 = vpop.f32.mrb[91].mxu1  ;;  %v1878_v47 = vadd.f32 %v1877_v39, %v5399_v12  ;;  %4463 = vtanh.f32 %v1876_v31 }
 0x2cb   : > { %v1879_v45 = vpop.f32.mrb[91].mxu0  ;;  %v4440_v59 = vpop.eup %4439  ;;  %v3810_v46 = vpack.c.bf16 %v4438_v40, %v4434_v20  ;;  %v1687_v49 = vadd.f32 %v1686_v44, %v5405_v13  ;;  %4465 = vtanh.f32 %v1685_v43 }
 0x2cc   : > { %v4442_v22 = vpop.eup %4441  ;;  %v3811_v48 = vpack.c.bf16 %v4440_v59, %v4436_v29  ;;  %v1880_v50 = vadd.f32 %v1879_v45, %v5407_v14  ;;  %4467 = vtanh.f32 %v1878_v47  ;;  %v1690_v10 = vpop.f32.mrb[92].mxu1 }
 0x2cd   : > { %v4444_v56 = vpop.eup %4443  ;;  %3274 = vst [vmem:[%s5441_s16 + $0x2bc] sm:$0xff] %v3810_v46  ;;  %v1883_v0 = vpop.f32.mrb[92].mxu0  ;;  %4469 = vtanh.f32 %v1687_v49  ;;  %v1691_v41 = vadd.f32 %v1690_v10, %v5397_v36 }
 0x2ce   : > { %v4446_v51 = vpop.eup %4445  ;;  %3275 = vst [vmem:[%s5441_s16 + $0x2c4] sm:$0xff] %v3811_v48  ;;  %v1884_v18 = vadd.f32 %v1883_v0, %v5399_v12  ;;  %v1692_v52 = vpop.f32.mrb[93].mxu1  ;;  %4471 = vtanh.f32 %v1880_v50 }
 0x2cf   : > { %v4448_v11 = vpop.eup %4447  ;;  %v3814_v61 = vpack.c.bf16 %v4446_v51, %v4442_v22  ;;  %v1885_v53 = vpop.f32.mrb[93].mxu0  ;;  %v1693_v58 = vadd.f32 %v1692_v52, %v5405_v13  ;;  %4473 = vtanh.f32 %v1691_v41 }
 0x2d0   : > { %v4450_v35 = vpop.eup %4449  ;;  %v3815_v37 = vpack.c.bf16 %v4448_v11, %v4444_v56  ;;  %v1886_v33 = vadd.f32 %v1885_v53, %v5407_v14  ;;  %v1694_v38 = vpop.f32.mrb[94].mxu1  ;;  %4475 = vtanh.f32 %v1884_v18 }
 0x2d1   : > { %v4452_v54 = vpop.eup %4451  ;;  %3278 = vst [vmem:[%s5441_s16 + $0x2d8] sm:$0xff] %v3814_v61  ;;  %v1887_v21 = vpop.f32.mrb[94].mxu0  ;;  %v1695_v8 = vadd.f32 %v1694_v38, %v5397_v36  ;;  %4477 = vtanh.f32 %v1693_v58 }
 0x2d2   : > { %v4454_v42 = vpop.eup %4453  ;;  %3279 = vst [vmem:[%s5441_s16 + $0x2e0] sm:$0xff] %v3815_v37  ;;  %v1696_v23 = vpop.f32.mrb[95].mxu1  ;;  %v1888_v57 = vadd.f32 %v1887_v21, %v5399_v12  ;;  %4479 = vtanh.f32 %v1886_v33 }
 0x2d3   : > { %v1889_v1 = vpop.f32.mrb[95].mxu0  ;;  %v4456_v55 = vpop.eup %4455  ;;  %v3818_v3 = vpack.c.bf16 %v4454_v42, %v4450_v35  ;;  %v1697_v4 = vadd.f32 %v1696_v23, %v5405_v13  ;;  %4481 = vtanh.f32 %v1695_v8  ;;  %v5626_v13 = vrot.slane %v4681_v62, %v921_v2 }
 0x2d4   : > { %v4458_v60 = vpop.eup %4457  ;;  %v3819_v63 = vpack.c.bf16 %v4456_v55, %v4452_v54  ;;  %v1890_v36 = vadd.f32 %v1889_v1, %v5407_v14  ;;  %4483 = vtanh.f32 %v1888_v57  ;;  %v1926_v17 = vpop.f32.mrb[96].mxu1 }
 0x2d5   : > { %v4460_v15 = vpop.eup %4459  ;;  %3282 = vst [vmem:[%s5441_s16 + $0x2f4] sm:$0xff] %v3818_v3  ;;  %v3854_v19 = vpop.f32.mrb[96].mxu0  ;;  %4485 = vtanh.f32 %v1697_v4  ;;  %v1927_v24 = vadd.f32 %v1926_v17, %v5619_v7 }
 0x2d6   : > { %v4462_v5 = vpop.eup %4461  ;;  %3283 = vst [vmem:[%s5441_s16 + $0x2fc] sm:$0xff] %v3819_v63  ;;  %v1928_v14 = vpop.f32.mrb[97].mxu1  ;;  %4487 = vtanh.f32 %v1890_v36 }
 0x2d7   : > { %v4464_v12 = vpop.eup %4463  ;;  %v3822_v34 = vpack.c.bf16 %v4462_v5, %v4458_v60  ;;  %v3855_v25 = vpop.f32.mrb[97].mxu0  ;;  %v1929_v28 = vadd.f32 %v1928_v14, %v5623_v16  ;;  %4489 = vtanh.f32 %v1927_v24 }
 0x2d8   : > { %v4466_v20 = vpop.eup %4465  ;;  %v3823_v26 = vpack.c.bf16 %v4464_v12, %v4460_v15  ;;  %v3856_v29 = vadd.f32 %v3855_v25, %v3854_v19  ;;  %v1930_v30 = vpop.f32.mrb[98].mxu1 }
 0x2d9   : > { %v4468_v27 = vpop.eup %4467  ;;  %3286 = vst [vmem:[%s5441_s16 + $0x310] sm:$0xff] %v3822_v34  ;;  %v3857_v31 = vpop.f32.mrb[98].mxu0  ;;  %v1931_v39 = vadd.f32 %v1930_v30, %v5619_v7  ;;  %4491 = vtanh.f32 %v1929_v28 }
 0x2da   : > { %v4470_v32 = vpop.eup %4469  ;;  %3287 = vst [vmem:[%s5441_s16 + $0x318] sm:$0xff] %v3823_v26  ;;  %v1932_v40 = vpop.f32.mrb[99].mxu1  ;;  %v2120_v59 = vadd.f32 %v3856_v29, %v5626_v13 }
 0x2db   : > { %v3858_v43 = vpop.f32.mrb[99].mxu0  ;;  %v4472_v44 = vpop.eup %4471  ;;  %v3826_v45 = vpack.c.bf16 %v4470_v32, %v4466_v20  ;;  %v1933_v46 = vadd.f32 %v1932_v40, %v5623_v16  ;;  %4493 = vtanh.f32 %v1931_v39 }
 0x2dc   : > { %v4474_v47 = vpop.eup %4473  ;;  %v3827_v22 = vpack.c.bf16 %v4472_v44, %v4468_v27  ;;  %v3859_v48 = vadd.f32 %v3858_v43, %v3857_v31  ;;  %4495 = vtanh.f32 %v2120_v59  ;;  %v1936_v9 = vpop.f32.mrb[100].mxu1 }
 0x2dd   : > { %v4476_v49 = vpop.eup %4475  ;;  %3290 = vst [vmem:[%s5441_s16 + $0x32c] sm:$0xff] %v3826_v45  ;;  %4497 = vtanh.f32 %v1933_v46  ;;  %v3860_v61 = vpop.f32.mrb[100].mxu0  ;;  %v1937_v35 = vadd.f32 %v1936_v9, %v5619_v7 }
 0x2de   : > { %v4478_v56 = vpop.eup %4477  ;;  %3291 = vst [vmem:[%s5441_s16 + $0x334] sm:$0xff] %v3827_v22  ;;  %v2123_v50 = vadd.f32 %v3859_v48, %v5626_v13  ;;  %v1938_v37 = vpop.f32.mrb[101].mxu1 }
 0x2df   : > { %v4480_v51 = vpop.eup %4479  ;;  %v3830_v11 = vpack.c.bf16 %v4478_v56, %v4474_v47  ;;  %v3861_v41 = vpop.f32.mrb[101].mxu0  ;;  %v1939_v52 = vadd.f32 %v1938_v37, %v5623_v16 }
 0x2e0   : > { %v4482_v10 = vpop.eup %4481  ;;  %v3831_v0 = vpack.c.bf16 %v4480_v51, %v4476_v49  ;;  %4499 = vtanh.f32 %v2123_v50  ;;  %v3862_v53 = vadd.f32 %v3861_v41, %v3860_v61  ;;  %v1940_v54 = vpop.f32.mrb[102].mxu1 }
 0x2e1   : > { %v4484_v18 = vpop.eup %4483  ;;  %3294 = vst [vmem:[%s5441_s16 + $0x348] sm:$0xff] %v3830_v11  ;;  %v3863_v6 = vpop.f32.mrb[102].mxu0  ;;  %4501 = vtanh.f32 %v1937_v35  ;;  %v1941_v33 = vadd.f32 %v1940_v54, %v5619_v7 }
 0x2e2   : > { %v4486_v58 = vpop.eup %4485  ;;  %3295 = vst [vmem:[%s5441_s16 + $0x350] sm:$0xff] %v3831_v0  ;;  %v1942_v38 = vpop.f32.mrb[103].mxu1  ;;  %4503 = vtanh.f32 %v1939_v52  ;;  %v2128_v23 = vadd.f32 %v3862_v53, %v5626_v13 }
 0x2e3   : > { %v3864_v21 = vpop.f32.mrb[103].mxu0  ;;  %v4488_v42 = vpop.eup %4487  ;;  %v3834_v8 = vpack.c.bf16 %v4486_v58, %v4482_v10  ;;  %v1943_v1 = vadd.f32 %v1942_v38, %v5623_v16  ;;  %4505 = vtanh.f32 %v1941_v33 }
 0x2e4   : > { %v4490_v55 = vpop.eup %4489  ;;  %v3835_v2 = vpack.c.bf16 %v4488_v42, %v4484_v18  ;;  %v3865_v3 = vadd.f32 %v3864_v21, %v3863_v6  ;;  %4507 = vtanh.f32 %v2128_v23  ;;  %v1946_v15 = vpop.f32.mrb[104].mxu1 }
 0x2e5   : > { %v4492_v57 = vpop.eup %4491  ;;  %3298 = vst [vmem:[%s5441_s16 + $0x364] sm:$0xff] %v3834_v8  ;;  %4509 = vtanh.f32 %v1943_v1  ;;  %v3866_v36 = vpop.f32.mrb[104].mxu0  ;;  %v1947_v34 = vadd.f32 %v1946_v15, %v5619_v7 }
 0x2e6   : > { %v4494_v60 = vpop.eup %4493  ;;  %3299 = vst [vmem:[%s5441_s16 + $0x36c] sm:$0xff] %v3835_v2  ;;  %v3712_v63 = vpack.c.bf16 %v4492_v57, %v4490_v55  ;;  %v2131_v4 = vadd.f32 %v3865_v3, %v5626_v13  ;;  %v1948_v17 = vpop.f32.mrb[105].mxu1 }
 0x2e7   : > { %v4496_v62 = vpop.eup %4495  ;;  %v3867_v19 = vpop.f32.mrb[105].mxu0  ;;  %v1949_v26 = vadd.f32 %v1948_v17, %v5623_v16 }
 0x2e8   : > { %v4498_v5 = vpop.eup %4497  ;;  %3176 = vst [vmem:[%s5441_s16 + $0x10] sm:$0xff] %v3712_v63  ;;  %v3713_v12 = vpack.c.bf16 %v4496_v62, %v4496_v62  ;;  %4511 = vtanh.f32 %v2131_v4  ;;  %v3868_v24 = vadd.f32 %v3867_v19, %v3866_v36  ;;  %v1950_v14 = vpop.f32.mrb[106].mxu1 }
 0x2e9   : > { %v3716_v20 = vpack.c.bf16 %v4498_v5, %v4494_v60  ;;  %v3869_v25 = vpop.f32.mrb[106].mxu0  ;;  %4513 = vtanh.f32 %v1947_v34  ;;  %v1951_v28 = vadd.f32 %v1950_v14, %v5619_v7  ;;  %v1952_v29 = vpop.f32.mrb[107].mxu1 }
 0x2ea   : > { %v4500_v27 = vpop.eup %4499  ;;  %3177 = vst [vmem:[%s5441_s16 + $0x18] sm:$0xf] %v3713_v12  ;;  %v3870_v30 = vpop.f32.mrb[107].mxu0  ;;  %4515 = vtanh.f32 %v1949_v26  ;;  %v2136_v32 = vadd.f32 %v3868_v24, %v5626_v13  ;;  %v1953_v39 = vadd.f32 %v1952_v29, %v5623_v16 }
 0x2eb   : > { %3180 = vst [vmem:[%s5441_s16 + $0x2c] sm:$0xff] %v3716_v20  ;;  %v3717_v31 = vpack.c.bf16 %v4500_v27, %v4500_v27  ;;  %v4502_v40 = vpop.eup %4501  ;;  %4517 = vtanh.f32 %v1951_v28  ;;  %v3871_v43 = vadd.f32 %v3870_v30, %v3869_v25 }
 0x2ec   : > { %v4504_v44 = vpop.eup %4503  ;;  %4519 = vtanh.f32 %v2136_v32  ;;  %v1956_v22 = vpop.f32.mrb[108].mxu1 }
 0x2ed   : > { %3181 = vst [vmem:[%s5441_s16 + $0x34] sm:$0xf] %v3717_v31  ;;  %v4506_v45 = vpop.eup %4505  ;;  %v3720_v59 = vpack.c.bf16 %v4504_v44, %v4502_v40  ;;  %4521 = vtanh.f32 %v1953_v39  ;;  %v2139_v46 = vadd.f32 %v3871_v43, %v5626_v13  ;;  %v3872_v48 = vpop.f32.mrb[108].mxu0  ;;  %v1957_v50 = vadd.f32 %v1956_v22, %v5619_v7 }
 0x2ee   : > { %v4508_v47 = vpop.eup %4507  ;;  %v1958_v51 = vpop.f32.mrb[109].mxu1 }
 0x2ef   : > { %v4510_v49 = vpop.eup %4509  ;;  %3184 = vst [vmem:[%s5441_s16 + $0x48] sm:$0xff] %v3720_v59  ;;  %v3721_v56 = vpack.c.bf16 %v4508_v47, %v4508_v47  ;;  %4523 = vtanh.f32 %v2139_v46  ;;  %v3873_v11 = vpop.f32.mrb[109].mxu0  ;;  %v1959_v61 = vadd.f32 %v1958_v51, %v5623_v16 }
 0x2f0   : > { %v3724_v9 = vpack.c.bf16 %v4510_v49, %v4506_v45  ;;  %v3874_v10 = vadd.f32 %v3873_v11, %v3872_v48  ;;  %v1960_v0 = vpop.f32.mrb[110].mxu1  ;;  %v3875_v35 = vpop.f32.mrb[110].mxu0  ;;  %4525 = vtanh.f32 %v1957_v50 }
 0x2f1   : > { %3185 = vst [vmem:[%s5441_s16 + $0x50] sm:$0xf] %v3721_v56  ;;  %v1961_v41 = vadd.f32 %v1960_v0, %v5619_v7  ;;  %v1962_v18 = vpop.f32.mrb[111].mxu1  ;;  %v3876_v52 = vpop.f32.mrb[111].mxu0  ;;  %4527 = vtanh.f32 %v1959_v61 }
 0x2f2   : > { %v4512_v37 = vpop.eup %4511  ;;  %3188 = vst [vmem:[%s5441_s16 + $0x64] sm:$0xff] %v3724_v9  ;;  %v2144_v54 = vadd.f32 %v3874_v10, %v5626_v13  ;;  %v1963_v6 = vadd.f32 %v1962_v18, %v5623_v16  ;;  %v3877_v33 = vadd.f32 %v3876_v52, %v3875_v35 }
 0x2f3   : > { %v3725_v53 = vpack.c.bf16 %v4512_v37, %v4512_v37  ;;  %v4514_v58 = vpop.eup %4513  ;;  %4529 = vtanh.f32 %v1961_v41 }
 0x2f4   : > { %v4516_v38 = vpop.eup %4515  ;;  %4531 = vtanh.f32 %v2144_v54  ;;  %v2147_v8 = vadd.f32 %v3877_v33, %v5626_v13  ;;  %v1966_v1 = vpop.f32.mrb[112].mxu1 }
 0x2f5   : > { %3189 = vst [vmem:[%s5441_s16 + $0x6c] sm:$0xf] %v3725_v53  ;;  %v4518_v21 = vpop.eup %4517  ;;  %v3728_v42 = vpack.c.bf16 %v4516_v38, %v4514_v58  ;;  %4533 = vtanh.f32 %v1963_v6  ;;  %v3878_v55 = vpop.f32.mrb[112].mxu0  ;;  %v1967_v57 = vadd.f32 %v1966_v1, %v5619_v7 }
 0x2f6   : > { %v4520_v23 = vpop.eup %4519  ;;  %4535 = vtanh.f32 %v2147_v8  ;;  %v1968_v60 = vpop.f32.mrb[113].mxu1 }
 0x2f7   : > { %v4522_v2 = vpop.eup %4521  ;;  %3192 = vst [vmem:[%s5441_s16 + $0x80] sm:$0xff] %v3728_v42  ;;  %v3729_v3 = vpack.c.bf16 %v4520_v23, %v4520_v23  ;;  %v3879_v63 = vpop.f32.mrb[113].mxu0  ;;  %v1969_v62 = vadd.f32 %v1968_v60, %v5623_v16  ;;  %4537 = vtanh.f32 %v1967_v57 }
 0x2f8   : > { %v3732_v4 = vpack.c.bf16 %v4522_v2, %v4518_v21  ;;  %v3880_v15 = vadd.f32 %v3879_v63, %v3878_v55  ;;  %v1970_v36 = vpop.f32.mrb[114].mxu1  ;;  %v3881_v5 = vpop.f32.mrb[114].mxu0 }
 0x2f9   : > { %v4524_v12 = vpop.eup %4523  ;;  %3193 = vst [vmem:[%s5441_s16 + $0x88] sm:$0xf] %v3729_v3  ;;  %v1971_v34 = vadd.f32 %v1970_v36, %v5619_v7  ;;  %v1972_v17 = vpop.f32.mrb[115].mxu1  ;;  %4539 = vtanh.f32 %v1969_v62 }
 0x2fa   : > { %v3882_v19 = vpop.f32.mrb[115].mxu0  ;;  %3196 = vst [vmem:[%s5441_s16 + $0x9c] sm:$0xff] %v3732_v4  ;;  %v3733_v20 = vpack.c.bf16 %v4524_v12, %v4524_v12  ;;  %v2152_v26 = vadd.f32 %v3880_v15, %v5626_v13  ;;  %v1973_v24 = vadd.f32 %v1972_v17, %v5623_v16  ;;  %v4526_v14 = vpop.eup %4525 }
 0x2fb   : > { %4541 = vtanh.f32 %v1971_v34  ;;  %v3883_v25 = vadd.f32 %v3882_v19, %v3881_v5  ;;  %v4528_v27 = vpop.eup %4527 }
 0x2fc   : > { %3197 = vst [vmem:[%s5441_s16 + $0xa4] sm:$0xf] %v3733_v20  ;;  %4543 = vtanh.f32 %v2152_v26  ;;  %v3736_v29 = vpack.c.bf16 %v4528_v27, %v4526_v14  ;;  %v1976_v32 = vpop.f32.mrb[116].mxu1  ;;  %v3884_v39 = vpop.f32.mrb[116].mxu0 }
 0x2fd   : > { %v4530_v28 = vpop.eup %4529  ;;  %4545 = vtanh.f32 %v1973_v24  ;;  %v2155_v30 = vadd.f32 %v3883_v25, %v5626_v13  ;;  %v1977_v44 = vadd.f32 %v1976_v32, %v5619_v7  ;;  %v1978_v45 = vpop.f32.mrb[117].mxu1 }
 0x2fe   : > { %v4532_v31 = vpop.eup %4531  ;;  %3200 = vst [vmem:[%s5441_s16 + $0xb8] sm:$0xff] %v3736_v29  ;;  %v3885_v59 = vpop.f32.mrb[117].mxu0  ;;  %v1979_v47 = vadd.f32 %v1978_v45, %v5623_v16 }
 0x2ff   : > { %v4534_v40 = vpop.eup %4533  ;;  %v3737_v43 = vpack.c.bf16 %v4532_v31, %v4532_v31  ;;  %4547 = vtanh.f32 %v2155_v30  ;;  %v3886_v22 = vadd.f32 %v3885_v59, %v3884_v39  ;;  %v1980_v48 = vpop.f32.mrb[118].mxu1 }
 0x300   : > { %v3740_v46 = vpack.c.bf16 %v4534_v40, %v4530_v28  ;;  %v3887_v49 = vpop.f32.mrb[118].mxu0  ;;  %v4536_v56 = vpop.eup %4535  ;;  %4549 = vtanh.f32 %v1977_v44  ;;  %v1981_v50 = vadd.f32 %v1980_v48, %v5619_v7 }
 0x301   : > { %3201 = vst [vmem:[%s5441_s16 + $0xc0] sm:$0xf] %v3737_v43  ;;  %v1982_v51 = vpop.f32.mrb[119].mxu1  ;;  %v3888_v11 = vpop.f32.mrb[119].mxu0  ;;  %v3741_v9 = vpack.c.bf16 %v4536_v56, %v4536_v56  ;;  %4551 = vtanh.f32 %v1979_v47  ;;  %v2160_v61 = vadd.f32 %v3886_v22, %v5626_v13 }
 0x302   : > { %3204 = vst [vmem:[%s5441_s16 + $0xd4] sm:$0xff] %v3740_v46  ;;  %v1983_v10 = vadd.f32 %v1982_v51, %v5623_v16  ;;  %v4538_v0 = vpop.eup %4537  ;;  %4553 = vtanh.f32 %v1981_v50  ;;  %v3889_v35 = vadd.f32 %v3888_v11, %v3887_v49 }
 0x303   : > { %v4540_v37 = vpop.eup %4539  ;;  %3205 = vst [vmem:[%s5441_s16 + $0xdc] sm:$0xf] %v3741_v9  ;;  %4555 = vtanh.f32 %v2160_v61 }
 0x304   : > { %v3744_v18 = vpack.c.bf16 %v4540_v37, %v4538_v0  ;;  %4557 = vtanh.f32 %v1983_v10  ;;  %v2163_v52 = vadd.f32 %v3889_v35, %v5626_v13  ;;  %v1986_v54 = vpop.f32.mrb[120].mxu1  ;;  %v3890_v6 = vpop.f32.mrb[120].mxu0 }
 0x305   : > { %v4542_v41 = vpop.eup %4541  ;;  %v1987_v38 = vadd.f32 %v1986_v54, %v5619_v7  ;;  %v1988_v21 = vpop.f32.mrb[121].mxu1 }
 0x306   : > { %v4544_v53 = vpop.eup %4543  ;;  %3208 = vst [vmem:[%s5441_s16 + $0xf0] sm:$0xff] %v3744_v18  ;;  %4559 = vtanh.f32 %v2163_v52  ;;  %v3891_v42 = vpop.f32.mrb[121].mxu0  ;;  %v1989_v23 = vadd.f32 %v1988_v21, %v5623_v16 }
 0x307   : > { %v4546_v58 = vpop.eup %4545  ;;  %v3745_v33 = vpack.c.bf16 %v4544_v53, %v4544_v53  ;;  %v3892_v1 = vadd.f32 %v3891_v42, %v3890_v6  ;;  %v1990_v55 = vpop.f32.mrb[122].mxu1  ;;  %4561 = vtanh.f32 %v1987_v38 }
 0x308   : > { %v3748_v8 = vpack.c.bf16 %v4546_v58, %v4542_v41  ;;  %v3893_v2 = vpop.f32.mrb[122].mxu0  ;;  %v1991_v57 = vadd.f32 %v1990_v55, %v5619_v7  ;;  %v1992_v60 = vpop.f32.mrb[123].mxu1  ;;  %4563 = vtanh.f32 %v1989_v23 }
 0x309   : > { %v4548_v3 = vpop.eup %4547  ;;  %3209 = vst [vmem:[%s5441_s16 + $0xf8] sm:$0xf] %v3745_v33  ;;  %v3894_v63 = vpop.f32.mrb[123].mxu0  ;;  %v2168_v62 = vadd.f32 %v3892_v1, %v5626_v13  ;;  %v1993_v15 = vadd.f32 %v1992_v60, %v5623_v16 }
 0x30a   : > { %3212 = vst [vmem:[%s5441_s16 + $0x10c] sm:$0xff] %v3748_v8  ;;  %v3749_v4 = vpack.c.bf16 %v4548_v3, %v4548_v3  ;;  %v4550_v36 = vpop.eup %4549  ;;  %4565 = vtanh.f32 %v1991_v57  ;;  %v3895_v5 = vadd.f32 %v3894_v63, %v3893_v2 }
 0x30b   : > { %v4552_v12 = vpop.eup %4551  ;;  %4567 = vtanh.f32 %v2168_v62 }
 0x30c   : > { %3213 = vst [vmem:[%s5441_s16 + $0x114] sm:$0xf] %v3749_v4  ;;  %v4554_v34 = vpop.eup %4553  ;;  %v3752_v17 = vpack.c.bf16 %v4552_v12, %v4550_v36  ;;  %4569 = vtanh.f32 %v1993_v15  ;;  %v2171_v19 = vadd.f32 %v3895_v5, %v5626_v13  ;;  %v1996_v26 = vpop.f32.mrb[124].mxu1 }
 0x30d   : > { %v4556_v20 = vpop.eup %4555  ;;  %v3896_v24 = vpop.f32.mrb[124].mxu0  ;;  %v1997_v27 = vadd.f32 %v1996_v26, %v5619_v7 }
 0x30e   : > { %v4558_v14 = vpop.eup %4557  ;;  %3216 = vst [vmem:[%s5441_s16 + $0x128] sm:$0xff] %v3752_v17  ;;  %v3753_v25 = vpack.c.bf16 %v4556_v20, %v4556_v20  ;;  %4571 = vtanh.f32 %v2171_v19  ;;  %v1998_v28 = vpop.f32.mrb[125].mxu1 }
 0x30f   : > { %v3897_v29 = vpop.f32.mrb[125].mxu0  ;;  %v3756_v30 = vpack.c.bf16 %v4558_v14, %v4554_v34  ;;  %v1999_v31 = vadd.f32 %v1998_v28, %v5623_v16  ;;  %v2000_v39 = vpop.f32.mrb[126].mxu1  ;;  %4573 = vtanh.f32 %v1997_v27 }
 0x310   : > { %v3898_v32 = vadd.f32 %v3897_v29, %v3896_v24  ;;  %v3899_v40 = vpop.f32.mrb[126].mxu0  ;;  %v4560_v43 = vpop.eup %4559  ;;  %3217 = vst [vmem:[%s5441_s16 + $0x130] sm:$0xf] %v3753_v25  ;;  %v2001_v44 = vadd.f32 %v2000_v39, %v5619_v7 }
 0x311   : > { %v2002_v45 = vpop.f32.mrb[127].mxu1  ;;  %v3900_v59 = vpop.f32.mrb[127].mxu0  ;;  %3220 = vst [vmem:[%s5441_s16 + $0x144] sm:$0xff] %v3756_v30  ;;  %v3757_v46 = vpack.c.bf16 %v4560_v43, %v4560_v43  ;;  %4575 = vtanh.f32 %v1999_v31 }
 0x312   : > { %v2176_v47 = vadd.f32 %v3898_v32, %v5626_v13  ;;  %v2003_v22 = vadd.f32 %v2002_v45, %v5623_v16  ;;  %v4562_v48 = vpop.eup %4561  ;;  %4577 = vtanh.f32 %v2001_v44  ;;  %v3901_v49 = vadd.f32 %v3900_v59, %v3899_v40 }
 0x313   : > { %v4564_v56 = vpop.eup %4563  ;;  %3221 = vst [vmem:[%s5441_s16 + $0x14c] sm:$0xf] %v3757_v46 }
 0x314   : > { %4579 = vtanh.f32 %v2176_v47  ;;  %v4566_v50 = vpop.eup %4565  ;;  %v3760_v51 = vpack.c.bf16 %v4564_v56, %v4562_v48  ;;  %v2179_v11 = vadd.f32 %v3901_v49, %v5626_v13  ;;  %v2006_v61 = vpop.f32.mrb[128].mxu1 }
 0x315   : > { %4581 = vtanh.f32 %v2003_v22  ;;  %v4568_v9 = vpop.eup %4567  ;;  %v3902_v10 = vpop.f32.mrb[128].mxu0  ;;  %v2007_v37 = vadd.f32 %v2006_v61, %v5619_v7 }
 0x316   : > { %v4570_v0 = vpop.eup %4569  ;;  %3224 = vst [vmem:[%s5441_s16 + $0x160] sm:$0xff] %v3760_v51  ;;  %v3761_v35 = vpack.c.bf16 %v4568_v9, %v4568_v9  ;;  %4583 = vtanh.f32 %v2179_v11  ;;  %v2008_v41 = vpop.f32.mrb[129].mxu1 }
 0x317   : > { %v3903_v18 = vpop.f32.mrb[129].mxu0  ;;  %v3764_v52 = vpack.c.bf16 %v4570_v0, %v4566_v50  ;;  %v2009_v53 = vadd.f32 %v2008_v41, %v5623_v16  ;;  %v2010_v6 = vpop.f32.mrb[130].mxu1  ;;  %4585 = vtanh.f32 %v2007_v37 }
 0x318   : > { %v3904_v54 = vadd.f32 %v3903_v18, %v3902_v10  ;;  %v3905_v58 = vpop.f32.mrb[130].mxu0  ;;  %v4572_v33 = vpop.eup %4571  ;;  %3225 = vst [vmem:[%s5441_s16 + $0x168] sm:$0xf] %v3761_v35  ;;  %v2011_v38 = vadd.f32 %v2010_v6, %v5619_v7 }
 0x319   : > { %v2012_v21 = vpop.f32.mrb[131].mxu1  ;;  %v3906_v42 = vpop.f32.mrb[131].mxu0  ;;  %3228 = vst [vmem:[%s5441_s16 + $0x17c] sm:$0xff] %v3764_v52  ;;  %v3765_v8 = vpack.c.bf16 %v4572_v33, %v4572_v33  ;;  %4587 = vtanh.f32 %v2009_v53 }
 0x31a   : > { %v2184_v23 = vadd.f32 %v3904_v54, %v5626_v13  ;;  %v2013_v1 = vadd.f32 %v2012_v21, %v5623_v16  ;;  %v4574_v55 = vpop.eup %4573  ;;  %4589 = vtanh.f32 %v2011_v38  ;;  %v3907_v2 = vadd.f32 %v3906_v42, %v3905_v58 }
 0x31b   : > { %v4576_v3 = vpop.eup %4575  ;;  %3229 = vst [vmem:[%s5441_s16 + $0x184] sm:$0xf] %v3765_v8 }
 0x31c   : > { %4591 = vtanh.f32 %v2184_v23  ;;  %v4578_v57 = vpop.eup %4577  ;;  %v3768_v60 = vpack.c.bf16 %v4576_v3, %v4574_v55  ;;  %v2187_v63 = vadd.f32 %v3907_v2, %v5626_v13  ;;  %v2016_v62 = vpop.f32.mrb[132].mxu1 }
 0x31d   : > { %4593 = vtanh.f32 %v2013_v1  ;;  %v3908_v15 = vpop.f32.mrb[132].mxu0  ;;  %v2017_v12 = vadd.f32 %v2016_v62, %v5619_v7  ;;  %v2018_v34 = vpop.f32.mrb[133].mxu1 }
 0x31e   : > { %v4580_v4 = vpop.eup %4579  ;;  %3232 = vst [vmem:[%s5441_s16 + $0x198] sm:$0xff] %v3768_v60  ;;  %4595 = vtanh.f32 %v2187_v63  ;;  %v3909_v17 = vpop.f32.mrb[133].mxu0  ;;  %v2019_v20 = vadd.f32 %v2018_v34, %v5623_v16 }
 0x31f   : > { %v4582_v36 = vpop.eup %4581  ;;  %v3769_v5 = vpack.c.bf16 %v4580_v4, %v4580_v4  ;;  %v3910_v26 = vadd.f32 %v3909_v17, %v3908_v15  ;;  %v2020_v24 = vpop.f32.mrb[134].mxu1  ;;  %4597 = vtanh.f32 %v2017_v12 }
 0x320   : > { %v3772_v19 = vpack.c.bf16 %v4582_v36, %v4578_v57  ;;  %v3911_v14 = vpop.f32.mrb[134].mxu0  ;;  %v4584_v25 = vpop.eup %4583  ;;  %v2021_v27 = vadd.f32 %v2020_v24, %v5619_v7  ;;  %4599 = vtanh.f32 %v2019_v20 }
 0x321   : > { %3233 = vst [vmem:[%s5441_s16 + $0x1a0] sm:$0xf] %v3769_v5  ;;  %v2022_v28 = vpop.f32.mrb[135].mxu1  ;;  %v3912_v29 = vpop.f32.mrb[135].mxu0  ;;  %v3773_v30 = vpack.c.bf16 %v4584_v25, %v4584_v25  ;;  %v2192_v31 = vadd.f32 %v3910_v26, %v5626_v13 }
 0x322   : > { %3236 = vst [vmem:[%s5441_s16 + $0x1b4] sm:$0xff] %v3772_v19  ;;  %v2023_v32 = vadd.f32 %v2022_v28, %v5623_v16  ;;  %v4586_v39 = vpop.eup %4585  ;;  %4601 = vtanh.f32 %v2021_v27  ;;  %v3913_v40 = vadd.f32 %v3912_v29, %v3911_v14 }
 0x323   : > { %v4588_v43 = vpop.eup %4587  ;;  %3237 = vst [vmem:[%s5441_s16 + $0x1bc] sm:$0xf] %v3773_v30  ;;  %4603 = vtanh.f32 %v2192_v31 }
 0x324   : > { %v4590_v44 = vpop.eup %4589  ;;  %v3776_v45 = vpack.c.bf16 %v4588_v43, %v4586_v39  ;;  %4605 = vtanh.f32 %v2023_v32  ;;  %v2195_v59 = vadd.f32 %v3913_v40, %v5626_v13  ;;  %v2026_v47 = vpop.f32.mrb[136].mxu1 }
 0x325   : > { %v3914_v22 = vpop.f32.mrb[136].mxu0  ;;  %v2027_v56 = vadd.f32 %v2026_v47, %v5619_v7  ;;  %v2028_v50 = vpop.f32.mrb[137].mxu1 }
 0x326   : > { %v4592_v46 = vpop.eup %4591  ;;  %3240 = vst [vmem:[%s5441_s16 + $0x1d0] sm:$0xff] %v3776_v45  ;;  %4607 = vtanh.f32 %v2195_v59  ;;  %v3915_v51 = vpop.f32.mrb[137].mxu0  ;;  %v2029_v9 = vadd.f32 %v2028_v50, %v5623_v16 }
 0x327   : > { %v4594_v48 = vpop.eup %4593  ;;  %v3777_v49 = vpack.c.bf16 %v4592_v46, %v4592_v46  ;;  %v3916_v61 = vadd.f32 %v3915_v51, %v3914_v22  ;;  %v2030_v10 = vpop.f32.mrb[138].mxu1  ;;  %4609 = vtanh.f32 %v2027_v56 }
 0x328   : > { %v3780_v11 = vpack.c.bf16 %v4594_v48, %v4590_v44  ;;  %v3917_v0 = vpop.f32.mrb[138].mxu0  ;;  %v4596_v35 = vpop.eup %4595  ;;  %v2031_v37 = vadd.f32 %v2030_v10, %v5619_v7  ;;  %4611 = vtanh.f32 %v2029_v9 }
 0x329   : > { %3241 = vst [vmem:[%s5441_s16 + $0x1d8] sm:$0xf] %v3777_v49  ;;  %v2032_v41 = vpop.f32.mrb[139].mxu1  ;;  %v3918_v18 = vpop.f32.mrb[139].mxu0  ;;  %v3781_v52 = vpack.c.bf16 %v4596_v35, %v4596_v35  ;;  %v2200_v53 = vadd.f32 %v3916_v61, %v5626_v13 }
 0x32a   : > { %3244 = vst [vmem:[%s5441_s16 + $0x1ec] sm:$0xff] %v3780_v11  ;;  %v2033_v54 = vadd.f32 %v2032_v41, %v5623_v16  ;;  %v4598_v6 = vpop.eup %4597  ;;  %4613 = vtanh.f32 %v2031_v37  ;;  %v3919_v58 = vadd.f32 %v3918_v18, %v3917_v0 }
 0x32b   : > { %v4600_v33 = vpop.eup %4599  ;;  %3245 = vst [vmem:[%s5441_s16 + $0x1f4] sm:$0xf] %v3781_v52  ;;  %4615 = vtanh.f32 %v2200_v53 }
 0x32c   : > { %v4602_v38 = vpop.eup %4601  ;;  %v3784_v21 = vpack.c.bf16 %v4600_v33, %v4598_v6  ;;  %4617 = vtanh.f32 %v2033_v54  ;;  %v2203_v42 = vadd.f32 %v3919_v58, %v5626_v13  ;;  %v2036_v23 = vpop.f32.mrb[140].mxu1 }
 0x32d   : > { %v4604_v8 = vpop.eup %4603  ;;  %v3920_v1 = vpop.f32.mrb[140].mxu0  ;;  %v2037_v3 = vadd.f32 %v2036_v23, %v5619_v7 }
 0x32e   : > { %v4606_v55 = vpop.eup %4605  ;;  %3248 = vst [vmem:[%s5441_s16 + $0x208] sm:$0xff] %v3784_v21  ;;  %v3785_v2 = vpack.c.bf16 %v4604_v8, %v4604_v8  ;;  %4619 = vtanh.f32 %v2203_v42  ;;  %v2038_v57 = vpop.f32.mrb[141].mxu1 }
 0x32f   : > { %v3921_v60 = vpop.f32.mrb[141].mxu0  ;;  %v3788_v63 = vpack.c.bf16 %v4606_v55, %v4602_v38  ;;  %v2039_v4 = vadd.f32 %v2038_v57, %v5623_v16  ;;  %v2040_v15 = vpop.f32.mrb[142].mxu1  ;;  %4621 = vtanh.f32 %v2037_v3 }
 0x330   : > { %v3922_v62 = vadd.f32 %v3921_v60, %v3920_v1  ;;  %v3923_v36 = vpop.f32.mrb[142].mxu0  ;;  %v4608_v5 = vpop.eup %4607  ;;  %3249 = vst [vmem:[%s5441_s16 + $0x210] sm:$0xf] %v3785_v2  ;;  %v2041_v12 = vadd.f32 %v2040_v15, %v5619_v7 }
 0x331   : > { %v2042_v34 = vpop.f32.mrb[143].mxu1  ;;  %v3924_v17 = vpop.f32.mrb[143].mxu0  ;;  %3252 = vst [vmem:[%s5441_s16 + $0x224] sm:$0xff] %v3788_v63  ;;  %v3789_v19 = vpack.c.bf16 %v4608_v5, %v4608_v5  ;;  %4623 = vtanh.f32 %v2039_v4 }
 0x332   : > { %v2208_v20 = vadd.f32 %v3922_v62, %v5626_v13  ;;  %v2043_v26 = vadd.f32 %v2042_v34, %v5623_v16  ;;  %v4610_v24 = vpop.eup %4609  ;;  %4625 = vtanh.f32 %v2041_v12  ;;  %v3925_v14 = vadd.f32 %v3924_v17, %v3923_v36 }
 0x333   : > { %v4612_v25 = vpop.eup %4611  ;;  %3253 = vst [vmem:[%s5441_s16 + $0x22c] sm:$0xf] %v3789_v19 }
 0x334   : > { %4627 = vtanh.f32 %v2208_v20  ;;  %v4614_v27 = vpop.eup %4613  ;;  %v3792_v28 = vpack.c.bf16 %v4612_v25, %v4610_v24  ;;  %v2211_v29 = vadd.f32 %v3925_v14, %v5626_v13  ;;  %v2046_v31 = vpop.f32.mrb[144].mxu1 }
 0x335   : > { %4629 = vtanh.f32 %v2043_v26  ;;  %v4616_v30 = vpop.eup %4615  ;;  %v3926_v32 = vpop.f32.mrb[144].mxu0  ;;  %v2047_v43 = vadd.f32 %v2046_v31, %v5619_v7 }
 0x336   : > { %v4618_v39 = vpop.eup %4617  ;;  %3256 = vst [vmem:[%s5441_s16 + $0x240] sm:$0xff] %v3792_v28  ;;  %v3793_v40 = vpack.c.bf16 %v4616_v30, %v4616_v30  ;;  %4631 = vtanh.f32 %v2211_v29  ;;  %v2048_v44 = vpop.f32.mrb[145].mxu1 }
 0x337   : > { %v3927_v45 = vpop.f32.mrb[145].mxu0  ;;  %v3796_v59 = vpack.c.bf16 %v4618_v39, %v4614_v27  ;;  %v2049_v46 = vadd.f32 %v2048_v44, %v5623_v16  ;;  %v2050_v22 = vpop.f32.mrb[146].mxu1  ;;  %4633 = vtanh.f32 %v2047_v43 }
 0x338   : > { %v3928_v47 = vadd.f32 %v3927_v45, %v3926_v32  ;;  %v3929_v48 = vpop.f32.mrb[146].mxu0  ;;  %v4620_v49 = vpop.eup %4619  ;;  %3257 = vst [vmem:[%s5441_s16 + $0x248] sm:$0xf] %v3793_v40  ;;  %v2051_v56 = vadd.f32 %v2050_v22, %v5619_v7 }
 0x339   : > { %v2052_v50 = vpop.f32.mrb[147].mxu1  ;;  %v3930_v51 = vpop.f32.mrb[147].mxu0  ;;  %3260 = vst [vmem:[%s5441_s16 + $0x25c] sm:$0xff] %v3796_v59  ;;  %v3797_v11 = vpack.c.bf16 %v4620_v49, %v4620_v49  ;;  %4635 = vtanh.f32 %v2049_v46 }
 0x33a   : > { %v2216_v9 = vadd.f32 %v3928_v47, %v5626_v13  ;;  %v2053_v61 = vadd.f32 %v2052_v50, %v5623_v16  ;;  %v4622_v10 = vpop.eup %4621  ;;  %4637 = vtanh.f32 %v2051_v56  ;;  %v3931_v0 = vadd.f32 %v3930_v51, %v3929_v48 }
 0x33b   : > { %v4624_v35 = vpop.eup %4623  ;;  %3261 = vst [vmem:[%s5441_s16 + $0x264] sm:$0xf] %v3797_v11 }
 0x33c   : > { %4639 = vtanh.f32 %v2216_v9  ;;  %v4626_v37 = vpop.eup %4625  ;;  %v3800_v41 = vpack.c.bf16 %v4624_v35, %v4622_v10  ;;  %v2219_v18 = vadd.f32 %v3931_v0, %v5626_v13  ;;  %v2056_v53 = vpop.f32.mrb[148].mxu1 }
 0x33d   : > { %4641 = vtanh.f32 %v2053_v61  ;;  %v3932_v54 = vpop.f32.mrb[148].mxu0  ;;  %v2057_v33 = vadd.f32 %v2056_v53, %v5619_v7  ;;  %v2058_v38 = vpop.f32.mrb[149].mxu1 }
 0x33e   : > { %v4628_v52 = vpop.eup %4627  ;;  %3264 = vst [vmem:[%s5441_s16 + $0x278] sm:$0xff] %v3800_v41  ;;  %4643 = vtanh.f32 %v2219_v18  ;;  %v3933_v21 = vpop.f32.mrb[149].mxu0  ;;  %v2059_v8 = vadd.f32 %v2058_v38, %v5623_v16 }
 0x33f   : > { %v4630_v6 = vpop.eup %4629  ;;  %v3801_v58 = vpack.c.bf16 %v4628_v52, %v4628_v52  ;;  %v3934_v23 = vadd.f32 %v3933_v21, %v3932_v54  ;;  %v2060_v1 = vpop.f32.mrb[150].mxu1  ;;  %4645 = vtanh.f32 %v2057_v33 }
 0x340   : > { %v3804_v42 = vpack.c.bf16 %v4630_v6, %v4626_v37  ;;  %v3935_v55 = vpop.f32.mrb[150].mxu0  ;;  %v4632_v2 = vpop.eup %4631  ;;  %v2061_v3 = vadd.f32 %v2060_v1, %v5619_v7  ;;  %4647 = vtanh.f32 %v2059_v8 }
 0x341   : > { %3265 = vst [vmem:[%s5441_s16 + $0x280] sm:$0xf] %v3801_v58  ;;  %v2062_v57 = vpop.f32.mrb[151].mxu1  ;;  %v3936_v60 = vpop.f32.mrb[151].mxu0  ;;  %v3805_v63 = vpack.c.bf16 %v4632_v2, %v4632_v2  ;;  %v2224_v4 = vadd.f32 %v3934_v23, %v5626_v13 }
 0x342   : > { %3268 = vst [vmem:[%s5441_s16 + $0x294] sm:$0xff] %v3804_v42  ;;  %v2063_v62 = vadd.f32 %v2062_v57, %v5623_v16  ;;  %v4634_v15 = vpop.eup %4633  ;;  %4649 = vtanh.f32 %v2061_v3  ;;  %v3937_v36 = vadd.f32 %v3936_v60, %v3935_v55 }
 0x343   : > { %v4636_v5 = vpop.eup %4635  ;;  %3269 = vst [vmem:[%s5441_s16 + $0x29c] sm:$0xf] %v3805_v63  ;;  %4651 = vtanh.f32 %v2224_v4 }
 0x344   : > { %v4638_v12 = vpop.eup %4637  ;;  %v3808_v34 = vpack.c.bf16 %v4636_v5, %v4634_v15  ;;  %4653 = vtanh.f32 %v2063_v62  ;;  %v2227_v17 = vadd.f32 %v3937_v36, %v5626_v13  ;;  %v2066_v20 = vpop.f32.mrb[152].mxu1 }
 0x345   : > { %v3938_v26 = vpop.f32.mrb[152].mxu0  ;;  %v2067_v25 = vadd.f32 %v2066_v20, %v5619_v7  ;;  %v2068_v27 = vpop.f32.mrb[153].mxu1 }
 0x346   : > { %v4640_v19 = vpop.eup %4639  ;;  %3272 = vst [vmem:[%s5441_s16 + $0x2b0] sm:$0xff] %v3808_v34  ;;  %4655 = vtanh.f32 %v2227_v17  ;;  %v3939_v28 = vpop.f32.mrb[153].mxu0  ;;  %v2069_v30 = vadd.f32 %v2068_v27, %v5623_v16 }
 0x347   : > { %v4642_v24 = vpop.eup %4641  ;;  %v3809_v14 = vpack.c.bf16 %v4640_v19, %v4640_v19  ;;  %v3940_v31 = vadd.f32 %v3939_v28, %v3938_v26  ;;  %v2070_v32 = vpop.f32.mrb[154].mxu1  ;;  %4657 = vtanh.f32 %v2067_v25 }
 0x348   : > { %v3812_v29 = vpack.c.bf16 %v4642_v24, %v4638_v12  ;;  %v3941_v39 = vpop.f32.mrb[154].mxu0  ;;  %v4644_v40 = vpop.eup %4643  ;;  %v2071_v43 = vadd.f32 %v2070_v32, %v5619_v7  ;;  %4659 = vtanh.f32 %v2069_v30 }
 0x349   : > { %3273 = vst [vmem:[%s5441_s16 + $0x2b8] sm:$0xf] %v3809_v14  ;;  %v2072_v44 = vpop.f32.mrb[155].mxu1  ;;  %v3942_v45 = vpop.f32.mrb[155].mxu0  ;;  %v3813_v59 = vpack.c.bf16 %v4644_v40, %v4644_v40  ;;  %v2232_v46 = vadd.f32 %v3940_v31, %v5626_v13 }
 0x34a   : > { %3276 = vst [vmem:[%s5441_s16 + $0x2cc] sm:$0xff] %v3812_v29  ;;  %v2073_v47 = vadd.f32 %v2072_v44, %v5623_v16  ;;  %v4646_v22 = vpop.eup %4645  ;;  %4661 = vtanh.f32 %v2071_v43  ;;  %v3943_v48 = vadd.f32 %v3942_v45, %v3941_v39 }
 0x34b   : > { %v4648_v49 = vpop.eup %4647  ;;  %3277 = vst [vmem:[%s5441_s16 + $0x2d4] sm:$0xf] %v3813_v59  ;;  %4663 = vtanh.f32 %v2232_v46 }
 0x34c   : > { %v4650_v56 = vpop.eup %4649  ;;  %v3816_v50 = vpack.c.bf16 %v4648_v49, %v4646_v22  ;;  %4665 = vtanh.f32 %v2073_v47  ;;  %v2235_v51 = vadd.f32 %v3943_v48, %v5626_v13  ;;  %v2076_v9 = vpop.f32.mrb[156].mxu1 }
 0x34d   : > { %v4652_v11 = vpop.eup %4651  ;;  %v3944_v61 = vpop.f32.mrb[156].mxu0  ;;  %v2077_v35 = vadd.f32 %v2076_v9, %v5619_v7 }
 0x34e   : > { %v4654_v10 = vpop.eup %4653  ;;  %3280 = vst [vmem:[%s5441_s16 + $0x2e8] sm:$0xff] %v3816_v50  ;;  %v3817_v0 = vpack.c.bf16 %v4652_v11, %v4652_v11  ;;  %4667 = vtanh.f32 %v2235_v51  ;;  %v2078_v37 = vpop.f32.mrb[157].mxu1 }
 0x34f   : > { %v3945_v41 = vpop.f32.mrb[157].mxu0  ;;  %v3820_v18 = vpack.c.bf16 %v4654_v10, %v4650_v56  ;;  %v2079_v52 = vadd.f32 %v2078_v37, %v5623_v16  ;;  %v2080_v54 = vpop.f32.mrb[158].mxu1  ;;  %4669 = vtanh.f32 %v2077_v35 }
 0x350   : > { %v3946_v53 = vadd.f32 %v3945_v41, %v3944_v61  ;;  %v3947_v6 = vpop.f32.mrb[158].mxu0  ;;  %v4656_v58 = vpop.eup %4655  ;;  %3281 = vst [vmem:[%s5441_s16 + $0x2f0] sm:$0xf] %v3817_v0  ;;  %v2081_v33 = vadd.f32 %v2080_v54, %v5619_v7 }
 0x351   : > { %v2082_v38 = vpop.f32.mrb[159].mxu1  ;;  %v3948_v21 = vpop.f32.mrb[159].mxu0  ;;  %3284 = vst [vmem:[%s5441_s16 + $0x304] sm:$0xff] %v3820_v18  ;;  %v3821_v42 = vpack.c.bf16 %v4656_v58, %v4656_v58  ;;  %4671 = vtanh.f32 %v2079_v52 }
 0x352   : > { %v2240_v8 = vadd.f32 %v3946_v53, %v5626_v13  ;;  %v2083_v23 = vadd.f32 %v2082_v38, %v5623_v16  ;;  %v4658_v1 = vpop.eup %4657  ;;  %4673 = vtanh.f32 %v2081_v33  ;;  %v3949_v55 = vadd.f32 %v3948_v21, %v3947_v6 }
 0x353   : > { %v4660_v2 = vpop.eup %4659  ;;  %3285 = vst [vmem:[%s5441_s16 + $0x30c] sm:$0xf] %v3821_v42 }
 0x354   : > { %4675 = vtanh.f32 %v2240_v8  ;;  %v4662_v3 = vpop.eup %4661  ;;  %v3824_v7 = vpack.c.bf16 %v4660_v2, %v4658_v1  ;;  %v2243_v57 = vadd.f32 %v3949_v55, %v5626_v13 }
 0x355   : > { %4677 = vtanh.f32 %v2083_v23  ;;  %v4664_v60 = vpop.eup %4663 }
 0x356   : > { %v4666_v63 = vpop.eup %4665  ;;  %3288 = vst [vmem:[%s5441_s16 + $0x320] sm:$0xff] %v3824_v7  ;;  %v3825_v16 = vpack.c.bf16 %v4664_v60, %v4664_v60  ;;  %4679 = vtanh.f32 %v2243_v57 }
 0x357   : > { %v3828_v4 = vpack.c.bf16 %v4666_v63, %v4662_v3 }
 0x358   : > { %v4668_v62 = vpop.eup %4667  ;;  %3289 = vst [vmem:[%s5441_s16 + $0x328] sm:$0xf] %v3825_v16 }
 0x359   : > { %3292 = vst [vmem:[%s5441_s16 + $0x33c] sm:$0xff] %v3828_v4  ;;  %v3829_v15 = vpack.c.bf16 %v4668_v62, %v4668_v62  ;;  %v4670_v36 = vpop.eup %4669 }
 0x35b   : > { %v4672_v5 = vpop.eup %4671  ;;  %3293 = vst [vmem:[%s5441_s16 + $0x344] sm:$0xf] %v3829_v15 }
 0x35c   : > { %v4674_v13 = vpop.eup %4673  ;;  %v3832_v12 = vpack.c.bf16 %v4672_v5, %v4670_v36 }
 0x35e   : > { %v4676_v34 = vpop.eup %4675  ;;  %3296 = vst [vmem:[%s5441_s16 + $0x358] sm:$0xff] %v3832_v12 }
 0x35f   : > { %v4678_v17 = vpop.eup %4677  ;;  %v3833_v19 = vpack.c.bf16 %v4676_v34, %v4676_v34 }
 0x360   : > { %v3836_v20 = vpack.c.bf16 %v4678_v17, %v4674_v13  ;;  %v4680_v26 = vpop.eup %4679 }
 0x361   : > { %3297 = vst [vmem:[%s5441_s16 + $0x360] sm:$0xf] %v3833_v19  ;;  %v3837_v24 = vpack.c.bf16 %v4680_v26, %v4680_v26 }
 0x362   : > { %3300 = vst [vmem:[%s5441_s16 + $0x374] sm:$0xff] %v3836_v20 }
 0x363   : > { %3301 = vst [vmem:[%s5441_s16 + $0x37c] sm:$0xf] %v3837_v24 }
 0x364   : > { %4807 = shalt.err (!%p4804_p1)
}
 0x365   : > { %s4808_s1 = scalar_lea.hbm %s5799_s11, 14336  ;;  %s4812_s23 = scalar_lea.hbm %s5853_s5, 57344 }
 0x366   : > { %p4809_p0 = scmp.ne.s32.totalorder %s5799_s11, %s4808_s1  ;;  %p4813_p9 = scmp.lt.u32.totalorder %s5799_s11, %s5853_s5 }
 0x367   : > { %p4814_p12 = scmp.lt.u32.totalorder %s4812_s23, %s4808_s1  ;;  %p4816_p2 = scmp.lt.u32.totalorder %s4808_s1, %s5799_s11 }
 0x368   : > { %p4810_p6 = pnand %p4809_p0, %p5871_p3 }
 0x369   : > { %p4815_p10 = por %p4814_p12, %p4813_p9 }
 0x36a   : > { %p4811_p5 = pneg %p4810_p6 }
 0x36b   : > { %p4817_p4 = por %p4816_p2, %p4815_p10 }
 0x36d   : > { %p4818_p7 = pnand %p4817_p4, %p4811_p5 }
 0x36f   : > { %4821 = shalt.err (!%p4818_p7)
}
 0x370   : > { %s4880_s15 = smov 448   ;;  %s4881_s16 = smov 28  }
 0x371   : > { %3982 = dma.vmem_to_hbm [thread:$0]  (%p5871_p3), %s5802_s25, 14336, %s5799_s11, %s5807_s22, %s4880_s15, %s4880_s15, %s4881_s16  }
 0x372 PF: > { %p4009_p8 = scmp.ge.s32.totalorder %s4868_s21, 2  ;;  %s3332_s17 = sand.u32 1, %s4856_s18  }
 0x373   : > { %p5872_p11 = scmp.ne.s32.totalorder %s5859_s29, 0  ;;  %s3333_s26 = scalar_lea.sflag [#allocation4], %s3332_s17 }
 0x375   : > { %p3998_p13 = pnand %p4009_p8, %p5872_p11 }
 0x377   : > { %4851 = dma.done.wait (!%p3998_p13), %s3333_s26, 14336  }
 0x378   : > { %4853 = vsyncadd (!%p3998_p13), %s3333_s26, 4294952960  ;;  %p18_p1 = scmp.ge.s32.totalorder %s4937_s24, 6   ;;  %s5873_s18 = smov %s4860_s19 }
 0x379   : > { %s5874_s19 = smov %s4864_s20  ;;  %s5875_s20 = smov %s4948_s27 }
 0x37a   : > { %s5876_s21 = smov %s4937_s24  ;;  %20 = sbr.rel (!%p18_p1) target bundleno = 8 (0x8), region = 92 }
 0x381   :  { %3338 = vsyncpa [#allocation3], 1 }
 0x382   :  { %3340 = vsyncpa [#allocation3 + $0x1], 1 }
 0x383   :  { %3341 = vsyncpa [#allocation6], 1 }
 0x384   :  { %3342 = vsyncpa [#allocation9], 1 }
 0x385   :  { %3343 = vsyncpa [#allocation4], 1 }
 0x386   :  { %3345 = vsyncpa [#allocation4 + $0x1], 1 }

</bundles_post_ra>
